<compile_context>
chip_gen: v6e
topology: v6e:2x2x1
jax: 0.10.0
libtpu: 0.0.40
codegen_flags: <defaults>
</compile_context>

<pallas_src>
import numpy as np
import jax
import jax.numpy as jnp
from jax.experimental import pallas as pl
from jax.experimental.pallas import tpu as pltpu

IN_LEN = 28   # input length forced by Linear(1664, 64): 64*(28-2) == 1664
T1 = 27       # length after conv1 (28 - 2 + 1)
T2 = 26       # length after conv2 (27 - 2 + 1)
C1 = 32       # conv1 out channels
C2 = 64       # conv2 out channels
H = 64        # dense hidden
EPS = 1e-5

GROUP = 4                                   # conv2 timesteps per MXU group
GROUP_STARTS = (0, 4, 8, 12, 16, 20, 22)    # last group overlaps; dups zeroed in w3g
N_GROUPS = len(GROUP_STARTS)
KB = C1 * (GROUP + 1)                       # 160 conv1 rows consumed per group

# offsets inside the packed f32 parameter slab (all multiples of 8)
_WA, _WB, _B1 = 0, 32, 64
_B2 = 96                                    # conv2 bias (BN1 folded), tiled x GROUP
_B3 = _B2 + GROUP * C2                      # 352  dense bias (BN2 folded)
_W4 = _B3 + H                               # 416
_B4 = _W4 + H                               # 480
SLAB = _B4 + 1                              # 481


def _cnn_kernel(x_ref, w2_ref, w3_ref, p_ref, o_ref, a_ref, acc_ref):
    # x_ref  : (28, Bt)  f32, time on sublanes, examples on lanes (lane-dense).
    # w2_ref : (256,160) bf16 banded conv2 weight (taps fused, BN1 folded, 4 steps).
    # w3_ref : (7,64,256) bf16 grouped dense weight (BN2 folded, duplicates zeroed).
    # p_ref  : (481, 1)  f32 packed small params.
    # a_ref  : (864, Bt) bf16 scratch; row 32*pos + chan = relu(conv1)[pos, chan].
    # acc_ref: (64, Bt)  f32 dense K-accumulator.
    wa = p_ref[_WA:_WA + C1, :]              # (32,1) conv1 tap 0
    wb = p_ref[_WB:_WB + C1, :]              # (32,1) conv1 tap 1
    b1 = p_ref[_B1:_B1 + C1, :]              # (32,1) conv1 bias
    b2t = p_ref[_B2:_B2 + GROUP * C2, :]     # (256,1) conv2 bias, tiled x4
    b3 = p_ref[_B3:_B3 + H, :]               # (64,1)
    w4 = p_ref[_W4:_W4 + H, :]               # (64,1)
    b4 = p_ref[_B4:_B4 + 1, :]               # (1,1)

    # TODO(synk): Dropout(0.2)/Dropout(0.2)/Dropout(0.5) are identity in eval mode.

    # Stage 1: relu(conv1) for all 27 positions -> bf16 scratch (VPU work done
    # once per position instead of twice).  Each iteration's live range ends at
    # the store, so this 27x static unroll keeps vreg pressure flat.
    for pos in range(T1):
        x0 = x_ref[pos:pos + 1, :]                      # (1, Bt)
        x1 = x_ref[pos + 1:pos + 2, :]                  # (1, Bt)
        blk = jnp.maximum(wa * x0 + wb * x1 + b1, 0.0)  # (32, Bt) f32, VPU
        a_ref[C1 * pos:C1 * (pos + 1), :] = blk.astype(jnp.bfloat16)

    acc_ref[...] = jnp.zeros_like(acc_ref)
    w2b = w2_ref[...]                                   # (256, 160) bf16

    # Stage 2: 7 groups of 4 conv2 timesteps; 2 MXU matmuls per group.
    for g, s in enumerate(GROUP_STARTS):
        h1 = a_ref[C1 * s:C1 * s + KB, :]               # (160, Bt) bf16
        # conv2 (+bias, ReLU): full-tile banded matmul (M=256, K=160).
        h2 = jnp.dot(w2b, h1, preferred_element_type=jnp.float32) + b2t
        r = jnp.maximum(h2, 0.0).astype(jnp.bfloat16)   # (256, Bt)
        # dense (1664 -> 64): K=256 accumulating matmul, f32 accumulator.
        acc_ref[...] += jnp.dot(w3_ref[g], r, preferred_element_type=jnp.float32)

    d = jnp.maximum(acc_ref[...] + b3, 0.0)             # (64, Bt) f32
    # dense1 (64 -> 1): weighted sublane reduction -> lane-dense output row.
    z = jnp.sum(w4 * d, axis=0, keepdims=True) + b4     # (1, Bt)
    o_ref[0] = jax.nn.sigmoid(z)


def baseline_cnn_forward(x, p, block_b=1024):
    """x: (N, 1, 28) float32, torch Conv1d layout. Returns (N, 1)."""
    N = x.shape[0]
    assert x.shape[1] == 1 and x.shape[2] == IN_LEN, \
        "Linear(1664, 64) fixes the input length to 28"
    x2d = x[:, 0, :].astype(jnp.float32)                                # (N, 28)

    # ---------- one-time parameter folding / packing (plain JAX) ----------
    s1 = p["g1"] * jax.lax.rsqrt(p["v1"] + EPS)
    t1 = p["be1"] - p["m1"] * s1
    s2 = p["g2"] * jax.lax.rsqrt(p["v2"] + EPS)
    t2 = p["be2"] - p["m2"] * s2

    wa = p["w1"][:, 0, 0].reshape(C1, 1)
    wb = p["w1"][:, 0, 1].reshape(C1, 1)
    b1 = p["b1"].reshape(C1, 1)

    # conv2: taps fused along K with BN1 scale folded in -> (64, 64); then a
    # banded (256, 160) weight covering 4 consecutive timesteps (block-row i
    # reads the 64 conv1 rows starting at 32*i) -> one full 256-wide MXU tile.
    w2f = jnp.concatenate([p["w2"][:, :, 0] * s1[None, :],
                           p["w2"][:, :, 1] * s1[None, :]], axis=1)     # (64, 64)
    b2f = p["b2"] + (p["w2"][:, :, 0] + p["w2"][:, :, 1]) @ t1          # (64,)
    w2band = jnp.zeros((GROUP * C2, KB), jnp.float32)
    for i in range(GROUP):
        w2band = w2band.at[C2 * i:C2 * (i + 1), C1 * i:C1 * i + 2 * C1].set(w2f)
    w2band = w2band.astype(jnp.bfloat16)
    b2t = jnp.tile(b2f, GROUP).reshape(GROUP * C2, 1)                   # (256, 1)

    # dense: torch flatten is channel-major (idx = c*26 + t); regroup the time
    # axis into the 7 groups of 4 (K = 4*64 = 256), folding BN2 along c.
    # Timesteps covered twice (22, 23 reappear in the ragged last group) get
    # zero weight on their second occurrence.
    W3r = p["W3"].reshape(H, C2, T2)                                    # [j, c, t]
    w3_time = jnp.transpose(W3r * s2[None, :, None], (2, 0, 1))         # (26, 64, 64)
    b3f = p["b3"] + W3r.sum(axis=2) @ t2                                # (64,)
    used, gmats = set(), []
    for s in GROUP_STARTS:
        blks = []
        for i in range(GROUP):
            t = s + i
            blks.append(jnp.zeros((H, C2), jnp.float32) if t in used else w3_time[t])
            used.add(t)
        gmats.append(jnp.concatenate(blks, axis=1))                     # (64, 256)
    assert used == set(range(T2))
    w3g = jnp.stack(gmats).astype(jnp.bfloat16)                         # (7, 64, 256)

    # packed small-parameter slab (single DMA; all offsets are multiples of 8).
    slab = jnp.concatenate([wa, wb, b1, b2t, b3f.reshape(H, 1),
                            p["W4"].reshape(H, 1), p["b4"].reshape(1, 1)],
                           axis=0).astype(jnp.float32)                  # (481, 1)
    assert slab.shape[0] == SLAB

    # ---------- batch tiling: Bt examples per grid step, lane-dense ----------
    Bt = int(block_b)
    assert Bt % 128 == 0
    if N <= Bt:   # keep >= 2 grid steps when possible so v7x's 2 TCs both get work
        Bt = max(128, pl.cdiv((N + 1) // 2, 128) * 128)
    G = pl.cdiv(N, Bt)
    n_pad = G * Bt
    # TODO(synk): have the producer emit (28, N) directly to skip this pad+transpose pass.
    xt = jnp.pad(x2d, ((0, n_pad - N), (0, 0))).T                       # (28, n_pad)

    full = lambda a: pl.BlockSpec(a.shape, lambda g: (0,) * a.ndim)
    out = pl.pallas_call(
        _cnn_kernel,
        out_shape=jax.ShapeDtypeStruct((G, 1, Bt), jnp.float32),
        grid=(G,),
        in_specs=[
            pl.BlockSpec((IN_LEN, Bt), lambda g: (0, g)),               # x tile (28, Bt)
            full(w2band), full(w3g), full(slab),
        ],
        out_specs=pl.BlockSpec((1, 1, Bt), lambda g: (g, 0, 0)),        # lane-dense row
        scratch_shapes=[pltpu.VMEM((C1 * T1, Bt), jnp.bfloat16),        # relu(conv1)
                        pltpu.VMEM((H, Bt), jnp.float32)],              # dense acc
        compiler_params=pltpu.CompilerParams(dimension_semantics=("parallel",)),
    )(xt, w2band, w3g, slab)

    # padded tail examples produce finite garbage through sigmoid and are sliced off.
    return out.reshape(n_pad, 1)[:N]


def reference_forward(x, p):
    """Pure-JAX f32 reference mirroring the PyTorch forward (eval mode)."""
    hp = "highest"
    s1 = p["g1"] / jnp.sqrt(p["v1"] + EPS)
    t1 = p["be1"] - p["m1"] * s1
    s2 = p["g2"] / jnp.sqrt(p["v2"] + EPS)
    t2 = p["be2"] - p["m2"] * s2

    h = (jnp.einsum("oc,nct->not", p["w1"][:, :, 0], x[:, :, :-1], precision=hp)
         + jnp.einsum("oc,nct->not", p["w1"][:, :, 1], x[:, :, 1:], precision=hp)
         + p["b1"][None, :, None])
    h = jnp.maximum(h, 0.0)
    h = h * s1[None, :, None] + t1[None, :, None]

    h = (jnp.einsum("oc,nct->not", p["w2"][:, :, 0], h[:, :, :-1], precision=hp)
         + jnp.einsum("oc,nct->not", p["w2"][:, :, 1], h[:, :, 1:], precision=hp)
         + p["b2"][None, :, None])
    h = jnp.maximum(h, 0.0)
    h = h * s2[None, :, None] + t2[None, :, None]

    flat = h.reshape(h.shape[0], C2 * T2)
    d = jnp.maximum(jnp.dot(flat, p["W3"].T, precision=hp) + p["b3"], 0.0)
    z = jnp.dot(d, p["W4"].T, precision=hp) + p["b4"]
    return jax.nn.sigmoid(z)


def make_params(key):
    ks = jax.random.split(key, 16)
    return {
        "w1": jax.random.normal(ks[0], (C1, 1, 2), jnp.float32) * 0.2,
        "b1": jax.random.normal(ks[1], (C1,), jnp.float32) * 0.1,
        "g1": jax.random.uniform(ks[2], (C1,), jnp.float32, 0.5, 1.5),
        "be1": jax.random.normal(ks[3], (C1,), jnp.float32) * 0.1,
        "m1": jax.random.normal(ks[4], (C1,), jnp.float32) * 0.1,
        "v1": jax.random.uniform(ks[5], (C1,), jnp.float32, 0.5, 1.5),
        "w2": jax.random.normal(ks[6], (C2, C1, 2), jnp.float32) * 0.1,
        "b2": jax.random.normal(ks[7], (C2,), jnp.float32) * 0.1,
        "g2": jax.random.uniform(ks[8], (C2,), jnp.float32, 0.5, 1.5),
        "be2": jax.random.normal(ks[9], (C2,), jnp.float32) * 0.1,
        "m2": jax.random.normal(ks[10], (C2,), jnp.float32) * 0.1,
        "v2": jax.random.uniform(ks[11], (C2,), jnp.float32, 0.5, 1.5),
        "W3": jax.random.normal(ks[12], (H, C2 * T2), jnp.float32) * 0.02,
        "b3": jax.random.normal(ks[13], (H,), jnp.float32) * 0.1,
        "W4": jax.random.normal(ks[14], (1, H), jnp.float32) * 0.1,
        "b4": jax.random.normal(ks[15], (1,), jnp.float32) * 0.1,
    }


if __name__ == "__main__":
    key = jax.random.PRNGKey(0)
    kx, kp = jax.random.split(key)
    params = make_params(kp)

    # batch=2 smoke test, a multi-block case (grid + padding + small-N Bt logic),
    # and one case on the default Bt=1024 path.  bf16 MXU operands -> 2e-2 tol.
    for n in (2, 300, 2300):
        x = jax.random.normal(jax.random.fold_in(kx, n), (n, 1, IN_LEN), jnp.float32)
        out = jax.block_until_ready(baseline_cnn_forward(x, params))
        ref = reference_forward(x, params)
        np.testing.assert_allclose(np.asarray(out), np.asarray(ref),
                                   rtol=2e-2, atol=2e-2)
    print("KERNEL_OK")
</pallas_src>

<mosaic_0001>
module attributes {stable_mosaic.version = 11 : i64} {
  func.func @_cnn_kernel(%arg0: i32, %arg1: memref<28x128xf32, #tpu.memory_space<vmem>>, %arg2: memref<256x160xbf16, #tpu.memory_space<vmem>>, %arg3: memref<7x64x256xbf16, #tpu.memory_space<vmem>>, %arg4: memref<481x1xf32, #tpu.memory_space<vmem>>, %arg5: memref<1x1x128xf32, #tpu.memory_space<vmem>>, %arg6: memref<864x128xbf16, #tpu.memory_space<vmem>>, %arg7: memref<64x128xf32, #tpu.memory_space<vmem>>) attributes {dimension_semantics = [#tpu.dimension_semantics<parallel>], iteration_bounds = array<i64: 1>, scalar_prefetch = 0 : i64, scratch_operands = 2 : i64, tpu.core_type = #tpu.core_type<tc>, window_params = [{transform_indices = @transform_0, window_bounds = array<i64: 28, 128>}, {pipeline_mode = #tpu.pipeline_mode<synchronous>, transform_indices = @transform_1, window_bounds = array<i64: 256, 160>}, {pipeline_mode = #tpu.pipeline_mode<synchronous>, transform_indices = @transform_2, window_bounds = array<i64: 7, 64, 256>}, {pipeline_mode = #tpu.pipeline_mode<synchronous>, transform_indices = @transform_3, window_bounds = array<i64: 481, 1>}, {transform_indices = @transform_4, window_bounds = array<i64: 1, 1, 128>}]} {
    %c0 = arith.constant 0 : index
    %c0_0 = arith.constant 0 : index
    %0 = vector.load %arg4[%c0, %c0_0] : memref<481x1xf32, #tpu.memory_space<vmem>>, vector<32x1xf32>
    %c32 = arith.constant 32 : index
    %c0_1 = arith.constant 0 : index
    %1 = vector.load %arg4[%c32, %c0_1] : memref<481x1xf32, #tpu.memory_space<vmem>>, vector<32x1xf32>
    %c64 = arith.constant 64 : index
    %c0_2 = arith.constant 0 : index
    %2 = vector.load %arg4[%c64, %c0_2] : memref<481x1xf32, #tpu.memory_space<vmem>>, vector<32x1xf32>
    %c96 = arith.constant 96 : index
    %c0_3 = arith.constant 0 : index
    %3 = vector.load %arg4[%c96, %c0_3] : memref<481x1xf32, #tpu.memory_space<vmem>>, vector<256x1xf32>
    %c352 = arith.constant 352 : index
    %c0_4 = arith.constant 0 : index
    %4 = vector.load %arg4[%c352, %c0_4] : memref<481x1xf32, #tpu.memory_space<vmem>>, vector<64x1xf32>
    %c416 = arith.constant 416 : index
    %c0_5 = arith.constant 0 : index
    %5 = vector.load %arg4[%c416, %c0_5] : memref<481x1xf32, #tpu.memory_space<vmem>>, vector<64x1xf32>
    %c480 = arith.constant 480 : index
    %c0_6 = arith.constant 0 : index
    %6 = vector.load %arg4[%c480, %c0_6] : memref<481x1xf32, #tpu.memory_space<vmem>>, vector<1x1xf32>
    %c0_7 = arith.constant 0 : index
    %c0_8 = arith.constant 0 : index
    %7 = vector.load %arg1[%c0_7, %c0_8] : memref<28x128xf32, #tpu.memory_space<vmem>>, vector<1x128xf32>
    %c1 = arith.constant 1 : index
    %c0_9 = arith.constant 0 : index
    %8 = vector.load %arg1[%c1, %c0_9] : memref<28x128xf32, #tpu.memory_space<vmem>>, vector<1x128xf32>
    %9 = vector.broadcast %0 : vector<32x1xf32> to vector<32x128xf32>
    %10 = vector.broadcast %7 : vector<1x128xf32> to vector<32x128xf32>
    %11 = arith.mulf %9, %10 : vector<32x128xf32>
    %12 = vector.broadcast %1 : vector<32x1xf32> to vector<32x128xf32>
    %13 = vector.broadcast %8 : vector<1x128xf32> to vector<32x128xf32>
    %14 = arith.mulf %12, %13 : vector<32x128xf32>
    %15 = arith.addf %11, %14 : vector<32x128xf32>
    %16 = vector.broadcast %2 : vector<32x1xf32> to vector<32x128xf32>
    %17 = arith.addf %15, %16 : vector<32x128xf32>
    %cst = arith.constant 0.000000e+00 : f32
    %18 = vector.broadcast %cst : f32 to vector<32x128xf32>
    %19 = arith.maximumf %17, %18 : vector<32x128xf32>
    %20 = arith.truncf %19 : vector<32x128xf32> to vector<32x128xbf16>
    %c0_10 = arith.constant 0 : index
    %c0_11 = arith.constant 0 : index
    %21 = vector.load %arg6[%c0_10, %c0_11] : memref<864x128xbf16, #tpu.memory_space<vmem>>, vector<32x128xbf16>
    tpu.vector_store %arg6[%c0_10, %c0_11], %20 {strides = array<i32>} : memref<864x128xbf16, #tpu.memory_space<vmem>>, vector<32x128xbf16>,
    %c1_12 = arith.constant 1 : index
    %c0_13 = arith.constant 0 : index
    %22 = vector.load %arg1[%c1_12, %c0_13] : memref<28x128xf32, #tpu.memory_space<vmem>>, vector<1x128xf32>
    %c2 = arith.constant 2 : index
    %c0_14 = arith.constant 0 : index
    %23 = vector.load %arg1[%c2, %c0_14] : memref<28x128xf32, #tpu.memory_space<vmem>>, vector<1x128xf32>
    %24 = vector.broadcast %0 : vector<32x1xf32> to vector<32x128xf32>
    %25 = vector.broadcast %22 : vector<1x128xf32> to vector<32x128xf32>
    %26 = arith.mulf %24, %25 : vector<32x128xf32>
    %27 = vector.broadcast %1 : vector<32x1xf32> to vector<32x128xf32>
    %28 = vector.broadcast %23 : vector<1x128xf32> to vector<32x128xf32>
    %29 = arith.mulf %27, %28 : vector<32x128xf32>
    %30 = arith.addf %26, %29 : vector<32x128xf32>
    %31 = vector.broadcast %2 : vector<32x1xf32> to vector<32x128xf32>
    %32 = arith.addf %30, %31 : vector<32x128xf32>
    %cst_15 = arith.constant 0.000000e+00 : f32
    %33 = vector.broadcast %cst_15 : f32 to vector<32x128xf32>
    %34 = arith.maximumf %32, %33 : vector<32x128xf32>
    %35 = arith.truncf %34 : vector<32x128xf32> to vector<32x128xbf16>
    %c32_16 = arith.constant 32 : index
    %c0_17 = arith.constant 0 : index
    %36 = vector.load %arg6[%c32_16, %c0_17] : memref<864x128xbf16, #tpu.memory_space<vmem>>, vector<32x128xbf16>
    tpu.vector_store %arg6[%c32_16, %c0_17], %35 {strides = array<i32>} : memref<864x128xbf16, #tpu.memory_space<vmem>>, vector<32x128xbf16>,
    %c2_18 = arith.constant 2 : index
    %c0_19 = arith.constant 0 : index
    %37 = vector.load %arg1[%c2_18, %c0_19] : memref<28x128xf32, #tpu.memory_space<vmem>>, vector<1x128xf32>
    %c3 = arith.constant 3 : index
    %c0_20 = arith.constant 0 : index
    %38 = vector.load %arg1[%c3, %c0_20] : memref<28x128xf32, #tpu.memory_space<vmem>>, vector<1x128xf32>
    %39 = vector.broadcast %0 : vector<32x1xf32> to vector<32x128xf32>
    %40 = vector.broadcast %37 : vector<1x128xf32> to vector<32x128xf32>
    %41 = arith.mulf %39, %40 : vector<32x128xf32>
    %42 = vector.broadcast %1 : vector<32x1xf32> to vector<32x128xf32>
    %43 = vector.broadcast %38 : vector<1x128xf32> to vector<32x128xf32>
    %44 = arith.mulf %42, %43 : vector<32x128xf32>
    %45 = arith.addf %41, %44 : vector<32x128xf32>
    %46 = vector.broadcast %2 : vector<32x1xf32> to vector<32x128xf32>
    %47 = arith.addf %45, %46 : vector<32x128xf32>
    %cst_21 = arith.constant 0.000000e+00 : f32
    %48 = vector.broadcast %cst_21 : f32 to vector<32x128xf32>
    %49 = arith.maximumf %47, %48 : vector<32x128xf32>
    %50 = arith.truncf %49 : vector<32x128xf32> to vector<32x128xbf16>
    %c64_22 = arith.constant 64 : index
    %c0_23 = arith.constant 0 : index
    %51 = vector.load %arg6[%c64_22, %c0_23] : memref<864x128xbf16, #tpu.memory_space<vmem>>, vector<32x128xbf16>
    tpu.vector_store %arg6[%c64_22, %c0_23], %50 {strides = array<i32>} : memref<864x128xbf16, #tpu.memory_space<vmem>>, vector<32x128xbf16>,
    %c3_24 = arith.constant 3 : index
    %c0_25 = arith.constant 0 : index
    %52 = vector.load %arg1[%c3_24, %c0_25] : memref<28x128xf32, #tpu.memory_space<vmem>>, vector<1x128xf32>
    %c4 = arith.constant 4 : index
    %c0_26 = arith.constant 0 : index
    %53 = vector.load %arg1[%c4, %c0_26] : memref<28x128xf32, #tpu.memory_space<vmem>>, vector<1x128xf32>
    %54 = vector.broadcast %0 : vector<32x1xf32> to vector<32x128xf32>
    %55 = vector.broadcast %52 : vector<1x128xf32> to vector<32x128xf32>
    %56 = arith.mulf %54, %55 : vector<32x128xf32>
    %57 = vector.broadcast %1 : vector<32x1xf32> to vector<32x128xf32>
    %58 = vector.broadcast %53 : vector<1x128xf32> to vector<32x128xf32>
    %59 = arith.mulf %57, %58 : vector<32x128xf32>
    %60 = arith.addf %56, %59 : vector<32x128xf32>
    %61 = vector.broadcast %2 : vector<32x1xf32> to vector<32x128xf32>
    %62 = arith.addf %60, %61 : vector<32x128xf32>
    %cst_27 = arith.constant 0.000000e+00 : f32
    %63 = vector.broadcast %cst_27 : f32 to vector<32x128xf32>
    %64 = arith.maximumf %62, %63 : vector<32x128xf32>
    %65 = arith.truncf %64 : vector<32x128xf32> to vector<32x128xbf16>
    %c96_28 = arith.constant 96 : index
    %c0_29 = arith.constant 0 : index
    %66 = vector.load %arg6[%c96_28, %c0_29] : memref<864x128xbf16, #tpu.memory_space<vmem>>, vector<32x128xbf16>
    tpu.vector_store %arg6[%c96_28, %c0_29], %65 {strides = array<i32>} : memref<864x128xbf16, #tpu.memory_space<vmem>>, vector<32x128xbf16>,
    %c4_30 = arith.constant 4 : index
    %c0_31 = arith.constant 0 : index
    %67 = vector.load %arg1[%c4_30, %c0_31] : memref<28x128xf32, #tpu.memory_space<vmem>>, vector<1x128xf32>
    %c5 = arith.constant 5 : index
    %c0_32 = arith.constant 0 : index
    %68 = vector.load %arg1[%c5, %c0_32] : memref<28x128xf32, #tpu.memory_space<vmem>>, vector<1x128xf32>
    %69 = vector.broadcast %0 : vector<32x1xf32> to vector<32x128xf32>
    %70 = vector.broadcast %67 : vector<1x128xf32> to vector<32x128xf32>
    %71 = arith.mulf %69, %70 : vector<32x128xf32>
    %72 = vector.broadcast %1 : vector<32x1xf32> to vector<32x128xf32>
    %73 = vector.broadcast %68 : vector<1x128xf32> to vector<32x128xf32>
    %74 = arith.mulf %72, %73 : vector<32x128xf32>
    %75 = arith.addf %71, %74 : vector<32x128xf32>
    %76 = vector.broadcast %2 : vector<32x1xf32> to vector<32x128xf32>
    %77 = arith.addf %75, %76 : vector<32x128xf32>
    %cst_33 = arith.constant 0.000000e+00 : f32
    %78 = vector.broadcast %cst_33 : f32 to vector<32x128xf32>
    %79 = arith.maximumf %77, %78 : vector<32x128xf32>
    %80 = arith.truncf %79 : vector<32x128xf32> to vector<32x128xbf16>
    %c128 = arith.constant 128 : index
    %c0_34 = arith.constant 0 : index
    %81 = vector.load %arg6[%c128, %c0_34] : memref<864x128xbf16, #tpu.memory_space<vmem>>, vector<32x128xbf16>
    tpu.vector_store %arg6[%c128, %c0_34], %80 {strides = array<i32>} : memref<864x128xbf16, #tpu.memory_space<vmem>>, vector<32x128xbf16>,
    %c5_35 = arith.constant 5 : index
    %c0_36 = arith.constant 0 : index
    %82 = vector.load %arg1[%c5_35, %c0_36] : memref<28x128xf32, #tpu.memory_space<vmem>>, vector<1x128xf32>
    %c6 = arith.constant 6 : index
    %c0_37 = arith.constant 0 : index
    %83 = vector.load %arg1[%c6, %c0_37] : memref<28x128xf32, #tpu.memory_space<vmem>>, vector<1x128xf32>
    %84 = vector.broadcast %0 : vector<32x1xf32> to vector<32x128xf32>
    %85 = vector.broadcast %82 : vector<1x128xf32> to vector<32x128xf32>
    %86 = arith.mulf %84, %85 : vector<32x128xf32>
    %87 = vector.broadcast %1 : vector<32x1xf32> to vector<32x128xf32>
    %88 = vector.broadcast %83 : vector<1x128xf32> to vector<32x128xf32>
    %89 = arith.mulf %87, %88 : vector<32x128xf32>
    %90 = arith.addf %86, %89 : vector<32x128xf32>
    %91 = vector.broadcast %2 : vector<32x1xf32> to vector<32x128xf32>
    %92 = arith.addf %90, %91 : vector<32x128xf32>
    %cst_38 = arith.constant 0.000000e+00 : f32
    %93 = vector.broadcast %cst_38 : f32 to vector<32x128xf32>
    %94 = arith.maximumf %92, %93 : vector<32x128xf32>
    %95 = arith.truncf %94 : vector<32x128xf32> to vector<32x128xbf16>
    %c160 = arith.constant 160 : index
    %c0_39 = arith.constant 0 : index
    %96 = vector.load %arg6[%c160, %c0_39] : memref<864x128xbf16, #tpu.memory_space<vmem>>, vector<32x128xbf16>
    tpu.vector_store %arg6[%c160, %c0_39], %95 {strides = array<i32>} : memref<864x128xbf16, #tpu.memory_space<vmem>>, vector<32x128xbf16>,
    %c6_40 = arith.constant 6 : index
    %c0_41 = arith.constant 0 : index
    %97 = vector.load %arg1[%c6_40, %c0_41] : memref<28x128xf32, #tpu.memory_space<vmem>>, vector<1x128xf32>
    %c7 = arith.constant 7 : index
    %c0_42 = arith.constant 0 : index
    %98 = vector.load %arg1[%c7, %c0_42] : memref<28x128xf32, #tpu.memory_space<vmem>>, vector<1x128xf32>
    %99 = vector.broadcast %0 : vector<32x1xf32> to vector<32x128xf32>
    %100 = vector.broadcast %97 : vector<1x128xf32> to vector<32x128xf32>
    %101 = arith.mulf %99, %100 : vector<32x128xf32>
    %102 = vector.broadcast %1 : vector<32x1xf32> to vector<32x128xf32>
    %103 = vector.broadcast %98 : vector<1x128xf32> to vector<32x128xf32>
    %104 = arith.mulf %102, %103 : vector<32x128xf32>
    %105 = arith.addf %101, %104 : vector<32x128xf32>
    %106 = vector.broadcast %2 : vector<32x1xf32> to vector<32x128xf32>
    %107 = arith.addf %105, %106 : vector<32x128xf32>
    %cst_43 = arith.constant 0.000000e+00 : f32
    %108 = vector.broadcast %cst_43 : f32 to vector<32x128xf32>
    %109 = arith.maximumf %107, %108 : vector<32x128xf32>
    %110 = arith.truncf %109 : vector<32x128xf32> to vector<32x128xbf16>
    %c192 = arith.constant 192 : index
    %c0_44 = arith.constant 0 : index
    %111 = vector.load %arg6[%c192, %c0_44] : memref<864x128xbf16, #tpu.memory_space<vmem>>, vector<32x128xbf16>
    tpu.vector_store %arg6[%c192, %c0_44], %110 {strides = array<i32>} : memref<864x128xbf16, #tpu.memory_space<vmem>>, vector<32x128xbf16>,
    %c7_45 = arith.constant 7 : index
    %c0_46 = arith.constant 0 : index
    %112 = vector.load %arg1[%c7_45, %c0_46] : memref<28x128xf32, #tpu.memory_space<vmem>>, vector<1x128xf32>
    %c8 = arith.constant 8 : index
    %c0_47 = arith.constant 0 : index
    %113 = vector.load %arg1[%c8, %c0_47] : memref<28x128xf32, #tpu.memory_space<vmem>>, vector<1x128xf32>
    %114 = vector.broadcast %0 : vector<32x1xf32> to vector<32x128xf32>
    %115 = vector.broadcast %112 : vector<1x128xf32> to vector<32x128xf32>
    %116 = arith.mulf %114, %115 : vector<32x128xf32>
    %117 = vector.broadcast %1 : vector<32x1xf32> to vector<32x128xf32>
    %118 = vector.broadcast %113 : vector<1x128xf32> to vector<32x128xf32>
    %119 = arith.mulf %117, %118 : vector<32x128xf32>
    %120 = arith.addf %116, %119 : vector<32x128xf32>
    %121 = vector.broadcast %2 : vector<32x1xf32> to vector<32x128xf32>
    %122 = arith.addf %120, %121 : vector<32x128xf32>
    %cst_48 = arith.constant 0.000000e+00 : f32
    %123 = vector.broadcast %cst_48 : f32 to vector<32x128xf32>
    %124 = arith.maximumf %122, %123 : vector<32x128xf32>
    %125 = arith.truncf %124 : vector<32x128xf32> to vector<32x128xbf16>
    %c224 = arith.constant 224 : index
    %c0_49 = arith.constant 0 : index
    %126 = vector.load %arg6[%c224, %c0_49] : memref<864x128xbf16, #tpu.memory_space<vmem>>, vector<32x128xbf16>
    tpu.vector_store %arg6[%c224, %c0_49], %125 {strides = array<i32>} : memref<864x128xbf16, #tpu.memory_space<vmem>>, vector<32x128xbf16>,
    %c8_50 = arith.constant 8 : index
    %c0_51 = arith.constant 0 : index
    %127 = vector.load %arg1[%c8_50, %c0_51] : memref<28x128xf32, #tpu.memory_space<vmem>>, vector<1x128xf32>
    %c9 = arith.constant 9 : index
    %c0_52 = arith.constant 0 : index
    %128 = vector.load %arg1[%c9, %c0_52] : memref<28x128xf32, #tpu.memory_space<vmem>>, vector<1x128xf32>
    %129 = vector.broadcast %0 : vector<32x1xf32> to vector<32x128xf32>
    %130 = vector.broadcast %127 : vector<1x128xf32> to vector<32x128xf32>
    %131 = arith.mulf %129, %130 : vector<32x128xf32>
    %132 = vector.broadcast %1 : vector<32x1xf32> to vector<32x128xf32>
    %133 = vector.broadcast %128 : vector<1x128xf32> to vector<32x128xf32>
    %134 = arith.mulf %132, %133 : vector<32x128xf32>
    %135 = arith.addf %131, %134 : vector<32x128xf32>
    %136 = vector.broadcast %2 : vector<32x1xf32> to vector<32x128xf32>
    %137 = arith.addf %135, %136 : vector<32x128xf32>
    %cst_53 = arith.constant 0.000000e+00 : f32
    %138 = vector.broadcast %cst_53 : f32 to vector<32x128xf32>
    %139 = arith.maximumf %137, %138 : vector<32x128xf32>
    %140 = arith.truncf %139 : vector<32x128xf32> to vector<32x128xbf16>
    %c256 = arith.constant 256 : index
    %c0_54 = arith.constant 0 : index
    %141 = vector.load %arg6[%c256, %c0_54] : memref<864x128xbf16, #tpu.memory_space<vmem>>, vector<32x128xbf16>
    tpu.vector_store %arg6[%c256, %c0_54], %140 {strides = array<i32>} : memref<864x128xbf16, #tpu.memory_space<vmem>>, vector<32x128xbf16>,
    %c9_55 = arith.constant 9 : index
    %c0_56 = arith.constant 0 : index
    %142 = vector.load %arg1[%c9_55, %c0_56] : memref<28x128xf32, #tpu.memory_space<vmem>>, vector<1x128xf32>
    %c10 = arith.constant 10 : index
    %c0_57 = arith.constant 0 : index
    %143 = vector.load %arg1[%c10, %c0_57] : memref<28x128xf32, #tpu.memory_space<vmem>>, vector<1x128xf32>
    %144 = vector.broadcast %0 : vector<32x1xf32> to vector<32x128xf32>
    %145 = vector.broadcast %142 : vector<1x128xf32> to vector<32x128xf32>
    %146 = arith.mulf %144, %145 : vector<32x128xf32>
    %147 = vector.broadcast %1 : vector<32x1xf32> to vector<32x128xf32>
    %148 = vector.broadcast %143 : vector<1x128xf32> to vector<32x128xf32>
    %149 = arith.mulf %147, %148 : vector<32x128xf32>
    %150 = arith.addf %146, %149 : vector<32x128xf32>
    %151 = vector.broadcast %2 : vector<32x1xf32> to vector<32x128xf32>
    %152 = arith.addf %150, %151 : vector<32x128xf32>
    %cst_58 = arith.constant 0.000000e+00 : f32
    %153 = vector.broadcast %cst_58 : f32 to vector<32x128xf32>
    %154 = arith.maximumf %152, %153 : vector<32x128xf32>
    %155 = arith.truncf %154 : vector<32x128xf32> to vector<32x128xbf16>
    %c288 = arith.constant 288 : index
    %c0_59 = arith.constant 0 : index
    %156 = vector.load %arg6[%c288, %c0_59] : memref<864x128xbf16, #tpu.memory_space<vmem>>, vector<32x128xbf16>
    tpu.vector_store %arg6[%c288, %c0_59], %155 {strides = array<i32>} : memref<864x128xbf16, #tpu.memory_space<vmem>>, vector<32x128xbf16>,
    %c10_60 = arith.constant 10 : index
    %c0_61 = arith.constant 0 : index
    %157 = vector.load %arg1[%c10_60, %c0_61] : memref<28x128xf32, #tpu.memory_space<vmem>>, vector<1x128xf32>
    %c11 = arith.constant 11 : index
    %c0_62 = arith.constant 0 : index
    %158 = vector.load %arg1[%c11, %c0_62] : memref<28x128xf32, #tpu.memory_space<vmem>>, vector<1x128xf32>
    %159 = vector.broadcast %0 : vector<32x1xf32> to vector<32x128xf32>
    %160 = vector.broadcast %157 : vector<1x128xf32> to vector<32x128xf32>
    %161 = arith.mulf %159, %160 : vector<32x128xf32>
    %162 = vector.broadcast %1 : vector<32x1xf32> to vector<32x128xf32>
    %163 = vector.broadcast %158 : vector<1x128xf32> to vector<32x128xf32>
    %164 = arith.mulf %162, %163 : vector<32x128xf32>
    %165 = arith.addf %161, %164 : vector<32x128xf32>
    %166 = vector.broadcast %2 : vector<32x1xf32> to vector<32x128xf32>
    %167 = arith.addf %165, %166 : vector<32x128xf32>
    %cst_63 = arith.constant 0.000000e+00 : f32
    %168 = vector.broadcast %cst_63 : f32 to vector<32x128xf32>
    %169 = arith.maximumf %167, %168 : vector<32x128xf32>
    %170 = arith.truncf %169 : vector<32x128xf32> to vector<32x128xbf16>
    %c320 = arith.constant 320 : index
    %c0_64 = arith.constant 0 : index
    %171 = vector.load %arg6[%c320, %c0_64] : memref<864x128xbf16, #tpu.memory_space<vmem>>, vector<32x128xbf16>
    tpu.vector_store %arg6[%c320, %c0_64], %170 {strides = array<i32>} : memref<864x128xbf16, #tpu.memory_space<vmem>>, vector<32x128xbf16>,
    %c11_65 = arith.constant 11 : index
    %c0_66 = arith.constant 0 : index
    %172 = vector.load %arg1[%c11_65, %c0_66] : memref<28x128xf32, #tpu.memory_space<vmem>>, vector<1x128xf32>
    %c12 = arith.constant 12 : index
    %c0_67 = arith.constant 0 : index
    %173 = vector.load %arg1[%c12, %c0_67] : memref<28x128xf32, #tpu.memory_space<vmem>>, vector<1x128xf32>
    %174 = vector.broadcast %0 : vector<32x1xf32> to vector<32x128xf32>
    %175 = vector.broadcast %172 : vector<1x128xf32> to vector<32x128xf32>
    %176 = arith.mulf %174, %175 : vector<32x128xf32>
    %177 = vector.broadcast %1 : vector<32x1xf32> to vector<32x128xf32>
    %178 = vector.broadcast %173 : vector<1x128xf32> to vector<32x128xf32>
    %179 = arith.mulf %177, %178 : vector<32x128xf32>
    %180 = arith.addf %176, %179 : vector<32x128xf32>
    %181 = vector.broadcast %2 : vector<32x1xf32> to vector<32x128xf32>
    %182 = arith.addf %180, %181 : vector<32x128xf32>
    %cst_68 = arith.constant 0.000000e+00 : f32
    %183 = vector.broadcast %cst_68 : f32 to vector<32x128xf32>
    %184 = arith.maximumf %182, %183 : vector<32x128xf32>
    %185 = arith.truncf %184 : vector<32x128xf32> to vector<32x128xbf16>
    %c352_69 = arith.constant 352 : index
    %c0_70 = arith.constant 0 : index
    %186 = vector.load %arg6[%c352_69, %c0_70] : memref<864x128xbf16, #tpu.memory_space<vmem>>, vector<32x128xbf16>
    tpu.vector_store %arg6[%c352_69, %c0_70], %185 {strides = array<i32>} : memref<864x128xbf16, #tpu.memory_space<vmem>>, vector<32x128xbf16>,
    %c12_71 = arith.constant 12 : index
    %c0_72 = arith.constant 0 : index
    %187 = vector.load %arg1[%c12_71, %c0_72] : memref<28x128xf32, #tpu.memory_space<vmem>>, vector<1x128xf32>
    %c13 = arith.constant 13 : index
    %c0_73 = arith.constant 0 : index
    %188 = vector.load %arg1[%c13, %c0_73] : memref<28x128xf32, #tpu.memory_space<vmem>>, vector<1x128xf32>
    %189 = vector.broadcast %0 : vector<32x1xf32> to vector<32x128xf32>
    %190 = vector.broadcast %187 : vector<1x128xf32> to vector<32x128xf32>
    %191 = arith.mulf %189, %190 : vector<32x128xf32>
    %192 = vector.broadcast %1 : vector<32x1xf32> to vector<32x128xf32>
    %193 = vector.broadcast %188 : vector<1x128xf32> to vector<32x128xf32>
    %194 = arith.mulf %192, %193 : vector<32x128xf32>
    %195 = arith.addf %191, %194 : vector<32x128xf32>
    %196 = vector.broadcast %2 : vector<32x1xf32> to vector<32x128xf32>
    %197 = arith.addf %195, %196 : vector<32x128xf32>
    %cst_74 = arith.constant 0.000000e+00 : f32
    %198 = vector.broadcast %cst_74 : f32 to vector<32x128xf32>
    %199 = arith.maximumf %197, %198 : vector<32x128xf32>
    %200 = arith.truncf %199 : vector<32x128xf32> to vector<32x128xbf16>
    %c384 = arith.constant 384 : index
    %c0_75 = arith.constant 0 : index
    %201 = vector.load %arg6[%c384, %c0_75] : memref<864x128xbf16, #tpu.memory_space<vmem>>, vector<32x128xbf16>
    tpu.vector_store %arg6[%c384, %c0_75], %200 {strides = array<i32>} : memref<864x128xbf16, #tpu.memory_space<vmem>>, vector<32x128xbf16>,
    %c13_76 = arith.constant 13 : index
    %c0_77 = arith.constant 0 : index
    %202 = vector.load %arg1[%c13_76, %c0_77] : memref<28x128xf32, #tpu.memory_space<vmem>>, vector<1x128xf32>
    %c14 = arith.constant 14 : index
    %c0_78 = arith.constant 0 : index
    %203 = vector.load %arg1[%c14, %c0_78] : memref<28x128xf32, #tpu.memory_space<vmem>>, vector<1x128xf32>
    %204 = vector.broadcast %0 : vector<32x1xf32> to vector<32x128xf32>
    %205 = vector.broadcast %202 : vector<1x128xf32> to vector<32x128xf32>
    %206 = arith.mulf %204, %205 : vector<32x128xf32>
    %207 = vector.broadcast %1 : vector<32x1xf32> to vector<32x128xf32>
    %208 = vector.broadcast %203 : vector<1x128xf32> to vector<32x128xf32>
    %209 = arith.mulf %207, %208 : vector<32x128xf32>
    %210 = arith.addf %206, %209 : vector<32x128xf32>
    %211 = vector.broadcast %2 : vector<32x1xf32> to vector<32x128xf32>
    %212 = arith.addf %210, %211 : vector<32x128xf32>
    %cst_79 = arith.constant 0.000000e+00 : f32
    %213 = vector.broadcast %cst_79 : f32 to vector<32x128xf32>
    %214 = arith.maximumf %212, %213 : vector<32x128xf32>
    %215 = arith.truncf %214 : vector<32x128xf32> to vector<32x128xbf16>
    %c416_80 = arith.constant 416 : index
    %c0_81 = arith.constant 0 : index
    %216 = vector.load %arg6[%c416_80, %c0_81] : memref<864x128xbf16, #tpu.memory_space<vmem>>, vector<32x128xbf16>
    tpu.vector_store %arg6[%c416_80, %c0_81], %215 {strides = array<i32>} : memref<864x128xbf16, #tpu.memory_space<vmem>>, vector<32x128xbf16>,
    %c14_82 = arith.constant 14 : index
    %c0_83 = arith.constant 0 : index
    %217 = vector.load %arg1[%c14_82, %c0_83] : memref<28x128xf32, #tpu.memory_space<vmem>>, vector<1x128xf32>
    %c15 = arith.constant 15 : index
    %c0_84 = arith.constant 0 : index
    %218 = vector.load %arg1[%c15, %c0_84] : memref<28x128xf32, #tpu.memory_space<vmem>>, vector<1x128xf32>
    %219 = vector.broadcast %0 : vector<32x1xf32> to vector<32x128xf32>
    %220 = vector.broadcast %217 : vector<1x128xf32> to vector<32x128xf32>
    %221 = arith.mulf %219, %220 : vector<32x128xf32>
    %222 = vector.broadcast %1 : vector<32x1xf32> to vector<32x128xf32>
    %223 = vector.broadcast %218 : vector<1x128xf32> to vector<32x128xf32>
    %224 = arith.mulf %222, %223 : vector<32x128xf32>
    %225 = arith.addf %221, %224 : vector<32x128xf32>
    %226 = vector.broadcast %2 : vector<32x1xf32> to vector<32x128xf32>
    %227 = arith.addf %225, %226 : vector<32x128xf32>
    %cst_85 = arith.constant 0.000000e+00 : f32
    %228 = vector.broadcast %cst_85 : f32 to vector<32x128xf32>
    %229 = arith.maximumf %227, %228 : vector<32x128xf32>
    %230 = arith.truncf %229 : vector<32x128xf32> to vector<32x128xbf16>
    %c448 = arith.constant 448 : index
    %c0_86 = arith.constant 0 : index
    %231 = vector.load %arg6[%c448, %c0_86] : memref<864x128xbf16, #tpu.memory_space<vmem>>, vector<32x128xbf16>
    tpu.vector_store %arg6[%c448, %c0_86], %230 {strides = array<i32>} : memref<864x128xbf16, #tpu.memory_space<vmem>>, vector<32x128xbf16>,
    %c15_87 = arith.constant 15 : index
    %c0_88 = arith.constant 0 : index
    %232 = vector.load %arg1[%c15_87, %c0_88] : memref<28x128xf32, #tpu.memory_space<vmem>>, vector<1x128xf32>
    %c16 = arith.constant 16 : index
    %c0_89 = arith.constant 0 : index
    %233 = vector.load %arg1[%c16, %c0_89] : memref<28x128xf32, #tpu.memory_space<vmem>>, vector<1x128xf32>
    %234 = vector.broadcast %0 : vector<32x1xf32> to vector<32x128xf32>
    %235 = vector.broadcast %232 : vector<1x128xf32> to vector<32x128xf32>
    %236 = arith.mulf %234, %235 : vector<32x128xf32>
    %237 = vector.broadcast %1 : vector<32x1xf32> to vector<32x128xf32>
    %238 = vector.broadcast %233 : vector<1x128xf32> to vector<32x128xf32>
    %239 = arith.mulf %237, %238 : vector<32x128xf32>
    %240 = arith.addf %236, %239 : vector<32x128xf32>
    %241 = vector.broadcast %2 : vector<32x1xf32> to vector<32x128xf32>
    %242 = arith.addf %240, %241 : vector<32x128xf32>
    %cst_90 = arith.constant 0.000000e+00 : f32
    %243 = vector.broadcast %cst_90 : f32 to vector<32x128xf32>
    %244 = arith.maximumf %242, %243 : vector<32x128xf32>
    %245 = arith.truncf %244 : vector<32x128xf32> to vector<32x128xbf16>
    %c480_91 = arith.constant 480 : index
    %c0_92 = arith.constant 0 : index
    %246 = vector.load %arg6[%c480_91, %c0_92] : memref<864x128xbf16, #tpu.memory_space<vmem>>, vector<32x128xbf16>
    tpu.vector_store %arg6[%c480_91, %c0_92], %245 {strides = array<i32>} : memref<864x128xbf16, #tpu.memory_space<vmem>>, vector<32x128xbf16>,
    %c16_93 = arith.constant 16 : index
    %c0_94 = arith.constant 0 : index
    %247 = vector.load %arg1[%c16_93, %c0_94] : memref<28x128xf32, #tpu.memory_space<vmem>>, vector<1x128xf32>
    %c17 = arith.constant 17 : index
    %c0_95 = arith.constant 0 : index
    %248 = vector.load %arg1[%c17, %c0_95] : memref<28x128xf32, #tpu.memory_space<vmem>>, vector<1x128xf32>
    %249 = vector.broadcast %0 : vector<32x1xf32> to vector<32x128xf32>
    %250 = vector.broadcast %247 : vector<1x128xf32> to vector<32x128xf32>
    %251 = arith.mulf %249, %250 : vector<32x128xf32>
    %252 = vector.broadcast %1 : vector<32x1xf32> to vector<32x128xf32>
    %253 = vector.broadcast %248 : vector<1x128xf32> to vector<32x128xf32>
    %254 = arith.mulf %252, %253 : vector<32x128xf32>
    %255 = arith.addf %251, %254 : vector<32x128xf32>
    %256 = vector.broadcast %2 : vector<32x1xf32> to vector<32x128xf32>
    %257 = arith.addf %255, %256 : vector<32x128xf32>
    %cst_96 = arith.constant 0.000000e+00 : f32
    %258 = vector.broadcast %cst_96 : f32 to vector<32x128xf32>
    %259 = arith.maximumf %257, %258 : vector<32x128xf32>
    %260 = arith.truncf %259 : vector<32x128xf32> to vector<32x128xbf16>
    %c512 = arith.constant 512 : index
    %c0_97 = arith.constant 0 : index
    %261 = vector.load %arg6[%c512, %c0_97] : memref<864x128xbf16, #tpu.memory_space<vmem>>, vector<32x128xbf16>
    tpu.vector_store %arg6[%c512, %c0_97], %260 {strides = array<i32>} : memref<864x128xbf16, #tpu.memory_space<vmem>>, vector<32x128xbf16>,
    %c17_98 = arith.constant 17 : index
    %c0_99 = arith.constant 0 : index
    %262 = vector.load %arg1[%c17_98, %c0_99] : memref<28x128xf32, #tpu.memory_space<vmem>>, vector<1x128xf32>
    %c18 = arith.constant 18 : index
    %c0_100 = arith.constant 0 : index
    %263 = vector.load %arg1[%c18, %c0_100] : memref<28x128xf32, #tpu.memory_space<vmem>>, vector<1x128xf32>
    %264 = vector.broadcast %0 : vector<32x1xf32> to vector<32x128xf32>
    %265 = vector.broadcast %262 : vector<1x128xf32> to vector<32x128xf32>
    %266 = arith.mulf %264, %265 : vector<32x128xf32>
    %267 = vector.broadcast %1 : vector<32x1xf32> to vector<32x128xf32>
    %268 = vector.broadcast %263 : vector<1x128xf32> to vector<32x128xf32>
    %269 = arith.mulf %267, %268 : vector<32x128xf32>
    %270 = arith.addf %266, %269 : vector<32x128xf32>
    %271 = vector.broadcast %2 : vector<32x1xf32> to vector<32x128xf32>
    %272 = arith.addf %270, %271 : vector<32x128xf32>
    %cst_101 = arith.constant 0.000000e+00 : f32
    %273 = vector.broadcast %cst_101 : f32 to vector<32x128xf32>
    %274 = arith.maximumf %272, %273 : vector<32x128xf32>
    %275 = arith.truncf %274 : vector<32x128xf32> to vector<32x128xbf16>
    %c544 = arith.constant 544 : index
    %c0_102 = arith.constant 0 : index
    %276 = vector.load %arg6[%c544, %c0_102] : memref<864x128xbf16, #tpu.memory_space<vmem>>, vector<32x128xbf16>
    tpu.vector_store %arg6[%c544, %c0_102], %275 {strides = array<i32>} : memref<864x128xbf16, #tpu.memory_space<vmem>>, vector<32x128xbf16>,
    %c18_103 = arith.constant 18 : index
    %c0_104 = arith.constant 0 : index
    %277 = vector.load %arg1[%c18_103, %c0_104] : memref<28x128xf32, #tpu.memory_space<vmem>>, vector<1x128xf32>
    %c19 = arith.constant 19 : index
    %c0_105 = arith.constant 0 : index
    %278 = vector.load %arg1[%c19, %c0_105] : memref<28x128xf32, #tpu.memory_space<vmem>>, vector<1x128xf32>
    %279 = vector.broadcast %0 : vector<32x1xf32> to vector<32x128xf32>
    %280 = vector.broadcast %277 : vector<1x128xf32> to vector<32x128xf32>
    %281 = arith.mulf %279, %280 : vector<32x128xf32>
    %282 = vector.broadcast %1 : vector<32x1xf32> to vector<32x128xf32>
    %283 = vector.broadcast %278 : vector<1x128xf32> to vector<32x128xf32>
    %284 = arith.mulf %282, %283 : vector<32x128xf32>
    %285 = arith.addf %281, %284 : vector<32x128xf32>
    %286 = vector.broadcast %2 : vector<32x1xf32> to vector<32x128xf32>
    %287 = arith.addf %285, %286 : vector<32x128xf32>
    %cst_106 = arith.constant 0.000000e+00 : f32
    %288 = vector.broadcast %cst_106 : f32 to vector<32x128xf32>
    %289 = arith.maximumf %287, %288 : vector<32x128xf32>
    %290 = arith.truncf %289 : vector<32x128xf32> to vector<32x128xbf16>
    %c576 = arith.constant 576 : index
    %c0_107 = arith.constant 0 : index
    %291 = vector.load %arg6[%c576, %c0_107] : memref<864x128xbf16, #tpu.memory_space<vmem>>, vector<32x128xbf16>
    tpu.vector_store %arg6[%c576, %c0_107], %290 {strides = array<i32>} : memref<864x128xbf16, #tpu.memory_space<vmem>>, vector<32x128xbf16>,
    %c19_108 = arith.constant 19 : index
    %c0_109 = arith.constant 0 : index
    %292 = vector.load %arg1[%c19_108, %c0_109] : memref<28x128xf32, #tpu.memory_space<vmem>>, vector<1x128xf32>
    %c20 = arith.constant 20 : index
    %c0_110 = arith.constant 0 : index
    %293 = vector.load %arg1[%c20, %c0_110] : memref<28x128xf32, #tpu.memory_space<vmem>>, vector<1x128xf32>
    %294 = vector.broadcast %0 : vector<32x1xf32> to vector<32x128xf32>
    %295 = vector.broadcast %292 : vector<1x128xf32> to vector<32x128xf32>
    %296 = arith.mulf %294, %295 : vector<32x128xf32>
    %297 = vector.broadcast %1 : vector<32x1xf32> to vector<32x128xf32>
    %298 = vector.broadcast %293 : vector<1x128xf32> to vector<32x128xf32>
    %299 = arith.mulf %297, %298 : vector<32x128xf32>
    %300 = arith.addf %296, %299 : vector<32x128xf32>
    %301 = vector.broadcast %2 : vector<32x1xf32> to vector<32x128xf32>
    %302 = arith.addf %300, %301 : vector<32x128xf32>
    %cst_111 = arith.constant 0.000000e+00 : f32
    %303 = vector.broadcast %cst_111 : f32 to vector<32x128xf32>
    %304 = arith.maximumf %302, %303 : vector<32x128xf32>
    %305 = arith.truncf %304 : vector<32x128xf32> to vector<32x128xbf16>
    %c608 = arith.constant 608 : index
    %c0_112 = arith.constant 0 : index
    %306 = vector.load %arg6[%c608, %c0_112] : memref<864x128xbf16, #tpu.memory_space<vmem>>, vector<32x128xbf16>
    tpu.vector_store %arg6[%c608, %c0_112], %305 {strides = array<i32>} : memref<864x128xbf16, #tpu.memory_space<vmem>>, vector<32x128xbf16>,
    %c20_113 = arith.constant 20 : index
    %c0_114 = arith.constant 0 : index
    %307 = vector.load %arg1[%c20_113, %c0_114] : memref<28x128xf32, #tpu.memory_space<vmem>>, vector<1x128xf32>
    %c21 = arith.constant 21 : index
    %c0_115 = arith.constant 0 : index
    %308 = vector.load %arg1[%c21, %c0_115] : memref<28x128xf32, #tpu.memory_space<vmem>>, vector<1x128xf32>
    %309 = vector.broadcast %0 : vector<32x1xf32> to vector<32x128xf32>
    %310 = vector.broadcast %307 : vector<1x128xf32> to vector<32x128xf32>
    %311 = arith.mulf %309, %310 : vector<32x128xf32>
    %312 = vector.broadcast %1 : vector<32x1xf32> to vector<32x128xf32>
    %313 = vector.broadcast %308 : vector<1x128xf32> to vector<32x128xf32>
    %314 = arith.mulf %312, %313 : vector<32x128xf32>
    %315 = arith.addf %311, %314 : vector<32x128xf32>
    %316 = vector.broadcast %2 : vector<32x1xf32> to vector<32x128xf32>
    %317 = arith.addf %315, %316 : vector<32x128xf32>
    %cst_116 = arith.constant 0.000000e+00 : f32
    %318 = vector.broadcast %cst_116 : f32 to vector<32x128xf32>
    %319 = arith.maximumf %317, %318 : vector<32x128xf32>
    %320 = arith.truncf %319 : vector<32x128xf32> to vector<32x128xbf16>
    %c640 = arith.constant 640 : index
    %c0_117 = arith.constant 0 : index
    %321 = vector.load %arg6[%c640, %c0_117] : memref<864x128xbf16, #tpu.memory_space<vmem>>, vector<32x128xbf16>
    tpu.vector_store %arg6[%c640, %c0_117], %320 {strides = array<i32>} : memref<864x128xbf16, #tpu.memory_space<vmem>>, vector<32x128xbf16>,
    %c21_118 = arith.constant 21 : index
    %c0_119 = arith.constant 0 : index
    %322 = vector.load %arg1[%c21_118, %c0_119] : memref<28x128xf32, #tpu.memory_space<vmem>>, vector<1x128xf32>
    %c22 = arith.constant 22 : index
    %c0_120 = arith.constant 0 : index
    %323 = vector.load %arg1[%c22, %c0_120] : memref<28x128xf32, #tpu.memory_space<vmem>>, vector<1x128xf32>
    %324 = vector.broadcast %0 : vector<32x1xf32> to vector<32x128xf32>
    %325 = vector.broadcast %322 : vector<1x128xf32> to vector<32x128xf32>
    %326 = arith.mulf %324, %325 : vector<32x128xf32>
    %327 = vector.broadcast %1 : vector<32x1xf32> to vector<32x128xf32>
    %328 = vector.broadcast %323 : vector<1x128xf32> to vector<32x128xf32>
    %329 = arith.mulf %327, %328 : vector<32x128xf32>
    %330 = arith.addf %326, %329 : vector<32x128xf32>
    %331 = vector.broadcast %2 : vector<32x1xf32> to vector<32x128xf32>
    %332 = arith.addf %330, %331 : vector<32x128xf32>
    %cst_121 = arith.constant 0.000000e+00 : f32
    %333 = vector.broadcast %cst_121 : f32 to vector<32x128xf32>
    %334 = arith.maximumf %332, %333 : vector<32x128xf32>
    %335 = arith.truncf %334 : vector<32x128xf32> to vector<32x128xbf16>
    %c672 = arith.constant 672 : index
    %c0_122 = arith.constant 0 : index
    %336 = vector.load %arg6[%c672, %c0_122] : memref<864x128xbf16, #tpu.memory_space<vmem>>, vector<32x128xbf16>
    tpu.vector_store %arg6[%c672, %c0_122], %335 {strides = array<i32>} : memref<864x128xbf16, #tpu.memory_space<vmem>>, vector<32x128xbf16>,
    %c22_123 = arith.constant 22 : index
    %c0_124 = arith.constant 0 : index
    %337 = vector.load %arg1[%c22_123, %c0_124] : memref<28x128xf32, #tpu.memory_space<vmem>>, vector<1x128xf32>
    %c23 = arith.constant 23 : index
    %c0_125 = arith.constant 0 : index
    %338 = vector.load %arg1[%c23, %c0_125] : memref<28x128xf32, #tpu.memory_space<vmem>>, vector<1x128xf32>
    %339 = vector.broadcast %0 : vector<32x1xf32> to vector<32x128xf32>
    %340 = vector.broadcast %337 : vector<1x128xf32> to vector<32x128xf32>
    %341 = arith.mulf %339, %340 : vector<32x128xf32>
    %342 = vector.broadcast %1 : vector<32x1xf32> to vector<32x128xf32>
    %343 = vector.broadcast %338 : vector<1x128xf32> to vector<32x128xf32>
    %344 = arith.mulf %342, %343 : vector<32x128xf32>
    %345 = arith.addf %341, %344 : vector<32x128xf32>
    %346 = vector.broadcast %2 : vector<32x1xf32> to vector<32x128xf32>
    %347 = arith.addf %345, %346 : vector<32x128xf32>
    %cst_126 = arith.constant 0.000000e+00 : f32
    %348 = vector.broadcast %cst_126 : f32 to vector<32x128xf32>
    %349 = arith.maximumf %347, %348 : vector<32x128xf32>
    %350 = arith.truncf %349 : vector<32x128xf32> to vector<32x128xbf16>
    %c704 = arith.constant 704 : index
    %c0_127 = arith.constant 0 : index
    %351 = vector.load %arg6[%c704, %c0_127] : memref<864x128xbf16, #tpu.memory_space<vmem>>, vector<32x128xbf16>
    tpu.vector_store %arg6[%c704, %c0_127], %350 {strides = array<i32>} : memref<864x128xbf16, #tpu.memory_space<vmem>>, vector<32x128xbf16>,
    %c23_128 = arith.constant 23 : index
    %c0_129 = arith.constant 0 : index
    %352 = vector.load %arg1[%c23_128, %c0_129] : memref<28x128xf32, #tpu.memory_space<vmem>>, vector<1x128xf32>
    %c24 = arith.constant 24 : index
    %c0_130 = arith.constant 0 : index
    %353 = vector.load %arg1[%c24, %c0_130] : memref<28x128xf32, #tpu.memory_space<vmem>>, vector<1x128xf32>
    %354 = vector.broadcast %0 : vector<32x1xf32> to vector<32x128xf32>
    %355 = vector.broadcast %352 : vector<1x128xf32> to vector<32x128xf32>
    %356 = arith.mulf %354, %355 : vector<32x128xf32>
    %357 = vector.broadcast %1 : vector<32x1xf32> to vector<32x128xf32>
    %358 = vector.broadcast %353 : vector<1x128xf32> to vector<32x128xf32>
    %359 = arith.mulf %357, %358 : vector<32x128xf32>
    %360 = arith.addf %356, %359 : vector<32x128xf32>
    %361 = vector.broadcast %2 : vector<32x1xf32> to vector<32x128xf32>
    %362 = arith.addf %360, %361 : vector<32x128xf32>
    %cst_131 = arith.constant 0.000000e+00 : f32
    %363 = vector.broadcast %cst_131 : f32 to vector<32x128xf32>
    %364 = arith.maximumf %362, %363 : vector<32x128xf32>
    %365 = arith.truncf %364 : vector<32x128xf32> to vector<32x128xbf16>
    %c736 = arith.constant 736 : index
    %c0_132 = arith.constant 0 : index
    %366 = vector.load %arg6[%c736, %c0_132] : memref<864x128xbf16, #tpu.memory_space<vmem>>, vector<32x128xbf16>
    tpu.vector_store %arg6[%c736, %c0_132], %365 {strides = array<i32>} : memref<864x128xbf16, #tpu.memory_space<vmem>>, vector<32x128xbf16>,
    %c24_133 = arith.constant 24 : index
    %c0_134 = arith.constant 0 : index
    %367 = vector.load %arg1[%c24_133, %c0_134] : memref<28x128xf32, #tpu.memory_space<vmem>>, vector<1x128xf32>
    %c25 = arith.constant 25 : index
    %c0_135 = arith.constant 0 : index
    %368 = vector.load %arg1[%c25, %c0_135] : memref<28x128xf32, #tpu.memory_space<vmem>>, vector<1x128xf32>
    %369 = vector.broadcast %0 : vector<32x1xf32> to vector<32x128xf32>
    %370 = vector.broadcast %367 : vector<1x128xf32> to vector<32x128xf32>
    %371 = arith.mulf %369, %370 : vector<32x128xf32>
    %372 = vector.broadcast %1 : vector<32x1xf32> to vector<32x128xf32>
    %373 = vector.broadcast %368 : vector<1x128xf32> to vector<32x128xf32>
    %374 = arith.mulf %372, %373 : vector<32x128xf32>
    %375 = arith.addf %371, %374 : vector<32x128xf32>
    %376 = vector.broadcast %2 : vector<32x1xf32> to vector<32x128xf32>
    %377 = arith.addf %375, %376 : vector<32x128xf32>
    %cst_136 = arith.constant 0.000000e+00 : f32
    %378 = vector.broadcast %cst_136 : f32 to vector<32x128xf32>
    %379 = arith.maximumf %377, %378 : vector<32x128xf32>
    %380 = arith.truncf %379 : vector<32x128xf32> to vector<32x128xbf16>
    %c768 = arith.constant 768 : index
    %c0_137 = arith.constant 0 : index
    %381 = vector.load %arg6[%c768, %c0_137] : memref<864x128xbf16, #tpu.memory_space<vmem>>, vector<32x128xbf16>
    tpu.vector_store %arg6[%c768, %c0_137], %380 {strides = array<i32>} : memref<864x128xbf16, #tpu.memory_space<vmem>>, vector<32x128xbf16>,
    %c25_138 = arith.constant 25 : index
    %c0_139 = arith.constant 0 : index
    %382 = vector.load %arg1[%c25_138, %c0_139] : memref<28x128xf32, #tpu.memory_space<vmem>>, vector<1x128xf32>
    %c26 = arith.constant 26 : index
    %c0_140 = arith.constant 0 : index
    %383 = vector.load %arg1[%c26, %c0_140] : memref<28x128xf32, #tpu.memory_space<vmem>>, vector<1x128xf32>
    %384 = vector.broadcast %0 : vector<32x1xf32> to vector<32x128xf32>
    %385 = vector.broadcast %382 : vector<1x128xf32> to vector<32x128xf32>
    %386 = arith.mulf %384, %385 : vector<32x128xf32>
    %387 = vector.broadcast %1 : vector<32x1xf32> to vector<32x128xf32>
    %388 = vector.broadcast %383 : vector<1x128xf32> to vector<32x128xf32>
    %389 = arith.mulf %387, %388 : vector<32x128xf32>
    %390 = arith.addf %386, %389 : vector<32x128xf32>
    %391 = vector.broadcast %2 : vector<32x1xf32> to vector<32x128xf32>
    %392 = arith.addf %390, %391 : vector<32x128xf32>
    %cst_141 = arith.constant 0.000000e+00 : f32
    %393 = vector.broadcast %cst_141 : f32 to vector<32x128xf32>
    %394 = arith.maximumf %392, %393 : vector<32x128xf32>
    %395 = arith.truncf %394 : vector<32x128xf32> to vector<32x128xbf16>
    %c800 = arith.constant 800 : index
    %c0_142 = arith.constant 0 : index
    %396 = vector.load %arg6[%c800, %c0_142] : memref<864x128xbf16, #tpu.memory_space<vmem>>, vector<32x128xbf16>
    tpu.vector_store %arg6[%c800, %c0_142], %395 {strides = array<i32>} : memref<864x128xbf16, #tpu.memory_space<vmem>>, vector<32x128xbf16>,
    %c26_143 = arith.constant 26 : index
    %c0_144 = arith.constant 0 : index
    %397 = vector.load %arg1[%c26_143, %c0_144] : memref<28x128xf32, #tpu.memory_space<vmem>>, vector<1x128xf32>
    %c27 = arith.constant 27 : index
    %c0_145 = arith.constant 0 : index
    %398 = vector.load %arg1[%c27, %c0_145] : memref<28x128xf32, #tpu.memory_space<vmem>>, vector<1x128xf32>
    %399 = vector.broadcast %0 : vector<32x1xf32> to vector<32x128xf32>
    %400 = vector.broadcast %397 : vector<1x128xf32> to vector<32x128xf32>
    %401 = arith.mulf %399, %400 : vector<32x128xf32>
    %402 = vector.broadcast %1 : vector<32x1xf32> to vector<32x128xf32>
    %403 = vector.broadcast %398 : vector<1x128xf32> to vector<32x128xf32>
    %404 = arith.mulf %402, %403 : vector<32x128xf32>
    %405 = arith.addf %401, %404 : vector<32x128xf32>
    %406 = vector.broadcast %2 : vector<32x1xf32> to vector<32x128xf32>
    %407 = arith.addf %405, %406 : vector<32x128xf32>
    %cst_146 = arith.constant 0.000000e+00 : f32
    %408 = vector.broadcast %cst_146 : f32 to vector<32x128xf32>
    %409 = arith.maximumf %407, %408 : vector<32x128xf32>
    %410 = arith.truncf %409 : vector<32x128xf32> to vector<32x128xbf16>
    %c832 = arith.constant 832 : index
    %c0_147 = arith.constant 0 : index
    %411 = vector.load %arg6[%c832, %c0_147] : memref<864x128xbf16, #tpu.memory_space<vmem>>, vector<32x128xbf16>
    tpu.vector_store %arg6[%c832, %c0_147], %410 {strides = array<i32>} : memref<864x128xbf16, #tpu.memory_space<vmem>>, vector<32x128xbf16>,
    %cst_148 = arith.constant 0.000000e+00 : f32
    %412 = vector.broadcast %cst_148 : f32 to vector<64x128xf32>
    %c0_149 = arith.constant 0 : index
    %c0_150 = arith.constant 0 : index
    %413 = vector.load %arg7[%c0_149, %c0_150] : memref<64x128xf32, #tpu.memory_space<vmem>>, vector<64x128xf32>
    tpu.vector_store %arg7[%c0_149, %c0_150], %412 {strides = array<i32>} : memref<64x128xf32, #tpu.memory_space<vmem>>, vector<64x128xf32>,
    %c0_151 = arith.constant 0 : index
    %c0_152 = arith.constant 0 : index
    %414 = vector.load %arg2[%c0_151, %c0_152] : memref<256x160xbf16, #tpu.memory_space<vmem>>, vector<256x160xbf16>
    %c0_153 = arith.constant 0 : index
    %c0_154 = arith.constant 0 : index
    %415 = vector.load %arg6[%c0_153, %c0_154] : memref<864x128xbf16, #tpu.memory_space<vmem>>, vector<160x128xbf16>
    %cst_155 = arith.constant dense<0.000000e+00> : vector<256x128xf32>
    %416 = tpu.matmul %414, %415, %cst_155 {dimension_numbers = #tpu.dot_dimension_numbers<[1], [0], [0], [1], [0, 0, 1, 1], [], []>} : vector<256x160xbf16>, vector<160x128xbf16>, vector<256x128xf32> -> vector<256x128xf32>
    %417 = vector.broadcast %3 : vector<256x1xf32> to vector<256x128xf32>
    %418 = arith.addf %416, %417 : vector<256x128xf32>
    %cst_156 = arith.constant 0.000000e+00 : f32
    %419 = vector.broadcast %cst_156 : f32 to vector<256x128xf32>
    %420 = arith.maximumf %418, %419 : vector<256x128xf32>
    %421 = arith.truncf %420 : vector<256x128xf32> to vector<256x128xbf16>
    %c0_157 = arith.constant 0 : index
    %c0_158 = arith.constant 0 : index
    %422 = vector.load %arg7[%c0_157, %c0_158] : memref<64x128xf32, #tpu.memory_space<vmem>>, vector<64x128xf32>
    %c0_159 = arith.constant 0 : index
    %c0_160 = arith.constant 0 : index
    %c0_161 = arith.constant 0 : index
    %423 = vector.load %arg3[%c0_159, %c0_160, %c0_161] : memref<7x64x256xbf16, #tpu.memory_space<vmem>>, vector<1x64x256xbf16>
    %424 = vector.shape_cast %423 : vector<1x64x256xbf16> to vector<64x256xbf16>
    %cst_162 = arith.constant dense<0.000000e+00> : vector<64x128xf32>
    %425 = tpu.matmul %424, %421, %cst_162 {dimension_numbers = #tpu.dot_dimension_numbers<[1], [0], [0], [1], [0, 0, 1, 1], [], []>} : vector<64x256xbf16>, vector<256x128xbf16>, vector<64x128xf32> -> vector<64x128xf32>
    %426 = arith.addf %422, %425 : vector<64x128xf32>
    %c0_163 = arith.constant 0 : index
    %c0_164 = arith.constant 0 : index
    %427 = vector.load %arg7[%c0_163, %c0_164] : memref<64x128xf32, #tpu.memory_space<vmem>>, vector<64x128xf32>
    tpu.vector_store %arg7[%c0_163, %c0_164], %426 {strides = array<i32>} : memref<64x128xf32, #tpu.memory_space<vmem>>, vector<64x128xf32>,
    %c128_165 = arith.constant 128 : index
    %c0_166 = arith.constant 0 : index
    %428 = vector.load %arg6[%c128_165, %c0_166] : memref<864x128xbf16, #tpu.memory_space<vmem>>, vector<160x128xbf16>
    %cst_167 = arith.constant dense<0.000000e+00> : vector<256x128xf32>
    %429 = tpu.matmul %414, %428, %cst_167 {dimension_numbers = #tpu.dot_dimension_numbers<[1], [0], [0], [1], [0, 0, 1, 1], [], []>} : vector<256x160xbf16>, vector<160x128xbf16>, vector<256x128xf32> -> vector<256x128xf32>
    %430 = vector.broadcast %3 : vector<256x1xf32> to vector<256x128xf32>
    %431 = arith.addf %429, %430 : vector<256x128xf32>
    %cst_168 = arith.constant 0.000000e+00 : f32
    %432 = vector.broadcast %cst_168 : f32 to vector<256x128xf32>
    %433 = arith.maximumf %431, %432 : vector<256x128xf32>
    %434 = arith.truncf %433 : vector<256x128xf32> to vector<256x128xbf16>
    %c0_169 = arith.constant 0 : index
    %c0_170 = arith.constant 0 : index
    %435 = vector.load %arg7[%c0_169, %c0_170] : memref<64x128xf32, #tpu.memory_space<vmem>>, vector<64x128xf32>
    %c1_171 = arith.constant 1 : index
    %c0_172 = arith.constant 0 : index
    %c0_173 = arith.constant 0 : index
    %436 = vector.load %arg3[%c1_171, %c0_172, %c0_173] : memref<7x64x256xbf16, #tpu.memory_space<vmem>>, vector<1x64x256xbf16>
    %437 = vector.shape_cast %436 : vector<1x64x256xbf16> to vector<64x256xbf16>
    %cst_174 = arith.constant dense<0.000000e+00> : vector<64x128xf32>
    %438 = tpu.matmul %437, %434, %cst_174 {dimension_numbers = #tpu.dot_dimension_numbers<[1], [0], [0], [1], [0, 0, 1, 1], [], []>} : vector<64x256xbf16>, vector<256x128xbf16>, vector<64x128xf32> -> vector<64x128xf32>
    %439 = arith.addf %435, %438 : vector<64x128xf32>
    %c0_175 = arith.constant 0 : index
    %c0_176 = arith.constant 0 : index
    %440 = vector.load %arg7[%c0_175, %c0_176] : memref<64x128xf32, #tpu.memory_space<vmem>>, vector<64x128xf32>
    tpu.vector_store %arg7[%c0_175, %c0_176], %439 {strides = array<i32>} : memref<64x128xf32, #tpu.memory_space<vmem>>, vector<64x128xf32>,
    %c256_177 = arith.constant 256 : index
    %c0_178 = arith.constant 0 : index
    %441 = vector.load %arg6[%c256_177, %c0_178] : memref<864x128xbf16, #tpu.memory_space<vmem>>, vector<160x128xbf16>
    %cst_179 = arith.constant dense<0.000000e+00> : vector<256x128xf32>
    %442 = tpu.matmul %414, %441, %cst_179 {dimension_numbers = #tpu.dot_dimension_numbers<[1], [0], [0], [1], [0, 0, 1, 1], [], []>} : vector<256x160xbf16>, vector<160x128xbf16>, vector<256x128xf32> -> vector<256x128xf32>
    %443 = vector.broadcast %3 : vector<256x1xf32> to vector<256x128xf32>
    %444 = arith.addf %442, %443 : vector<256x128xf32>
    %cst_180 = arith.constant 0.000000e+00 : f32
    %445 = vector.broadcast %cst_180 : f32 to vector<256x128xf32>
    %446 = arith.maximumf %444, %445 : vector<256x128xf32>
    %447 = arith.truncf %446 : vector<256x128xf32> to vector<256x128xbf16>
    %c0_181 = arith.constant 0 : index
    %c0_182 = arith.constant 0 : index
    %448 = vector.load %arg7[%c0_181, %c0_182] : memref<64x128xf32, #tpu.memory_space<vmem>>, vector<64x128xf32>
    %c2_183 = arith.constant 2 : index
    %c0_184 = arith.constant 0 : index
    %c0_185 = arith.constant 0 : index
    %449 = vector.load %arg3[%c2_183, %c0_184, %c0_185] : memref<7x64x256xbf16, #tpu.memory_space<vmem>>, vector<1x64x256xbf16>
    %450 = vector.shape_cast %449 : vector<1x64x256xbf16> to vector<64x256xbf16>
    %cst_186 = arith.constant dense<0.000000e+00> : vector<64x128xf32>
    %451 = tpu.matmul %450, %447, %cst_186 {dimension_numbers = #tpu.dot_dimension_numbers<[1], [0], [0], [1], [0, 0, 1, 1], [], []>} : vector<64x256xbf16>, vector<256x128xbf16>, vector<64x128xf32> -> vector<64x128xf32>
    %452 = arith.addf %448, %451 : vector<64x128xf32>
    %c0_187 = arith.constant 0 : index
    %c0_188 = arith.constant 0 : index
    %453 = vector.load %arg7[%c0_187, %c0_188] : memref<64x128xf32, #tpu.memory_space<vmem>>, vector<64x128xf32>
    tpu.vector_store %arg7[%c0_187, %c0_188], %452 {strides = array<i32>} : memref<64x128xf32, #tpu.memory_space<vmem>>, vector<64x128xf32>,
    %c384_189 = arith.constant 384 : index
    %c0_190 = arith.constant 0 : index
    %454 = vector.load %arg6[%c384_189, %c0_190] : memref<864x128xbf16, #tpu.memory_space<vmem>>, vector<160x128xbf16>
    %cst_191 = arith.constant dense<0.000000e+00> : vector<256x128xf32>
    %455 = tpu.matmul %414, %454, %cst_191 {dimension_numbers = #tpu.dot_dimension_numbers<[1], [0], [0], [1], [0, 0, 1, 1], [], []>} : vector<256x160xbf16>, vector<160x128xbf16>, vector<256x128xf32> -> vector<256x128xf32>
    %456 = vector.broadcast %3 : vector<256x1xf32> to vector<256x128xf32>
    %457 = arith.addf %455, %456 : vector<256x128xf32>
    %cst_192 = arith.constant 0.000000e+00 : f32
    %458 = vector.broadcast %cst_192 : f32 to vector<256x128xf32>
    %459 = arith.maximumf %457, %458 : vector<256x128xf32>
    %460 = arith.truncf %459 : vector<256x128xf32> to vector<256x128xbf16>
    %c0_193 = arith.constant 0 : index
    %c0_194 = arith.constant 0 : index
    %461 = vector.load %arg7[%c0_193, %c0_194] : memref<64x128xf32, #tpu.memory_space<vmem>>, vector<64x128xf32>
    %c3_195 = arith.constant 3 : index
    %c0_196 = arith.constant 0 : index
    %c0_197 = arith.constant 0 : index
    %462 = vector.load %arg3[%c3_195, %c0_196, %c0_197] : memref<7x64x256xbf16, #tpu.memory_space<vmem>>, vector<1x64x256xbf16>
    %463 = vector.shape_cast %462 : vector<1x64x256xbf16> to vector<64x256xbf16>
    %cst_198 = arith.constant dense<0.000000e+00> : vector<64x128xf32>
    %464 = tpu.matmul %463, %460, %cst_198 {dimension_numbers = #tpu.dot_dimension_numbers<[1], [0], [0], [1], [0, 0, 1, 1], [], []>} : vector<64x256xbf16>, vector<256x128xbf16>, vector<64x128xf32> -> vector<64x128xf32>
    %465 = arith.addf %461, %464 : vector<64x128xf32>
    %c0_199 = arith.constant 0 : index
    %c0_200 = arith.constant 0 : index
    %466 = vector.load %arg7[%c0_199, %c0_200] : memref<64x128xf32, #tpu.memory_space<vmem>>, vector<64x128xf32>
    tpu.vector_store %arg7[%c0_199, %c0_200], %465 {strides = array<i32>} : memref<64x128xf32, #tpu.memory_space<vmem>>, vector<64x128xf32>,
    %c512_201 = arith.constant 512 : index
    %c0_202 = arith.constant 0 : index
    %467 = vector.load %arg6[%c512_201, %c0_202] : memref<864x128xbf16, #tpu.memory_space<vmem>>, vector<160x128xbf16>
    %cst_203 = arith.constant dense<0.000000e+00> : vector<256x128xf32>
    %468 = tpu.matmul %414, %467, %cst_203 {dimension_numbers = #tpu.dot_dimension_numbers<[1], [0], [0], [1], [0, 0, 1, 1], [], []>} : vector<256x160xbf16>, vector<160x128xbf16>, vector<256x128xf32> -> vector<256x128xf32>
    %469 = vector.broadcast %3 : vector<256x1xf32> to vector<256x128xf32>
    %470 = arith.addf %468, %469 : vector<256x128xf32>
    %cst_204 = arith.constant 0.000000e+00 : f32
    %471 = vector.broadcast %cst_204 : f32 to vector<256x128xf32>
    %472 = arith.maximumf %470, %471 : vector<256x128xf32>
    %473 = arith.truncf %472 : vector<256x128xf32> to vector<256x128xbf16>
    %c0_205 = arith.constant 0 : index
    %c0_206 = arith.constant 0 : index
    %474 = vector.load %arg7[%c0_205, %c0_206] : memref<64x128xf32, #tpu.memory_space<vmem>>, vector<64x128xf32>
    %c4_207 = arith.constant 4 : index
    %c0_208 = arith.constant 0 : index
    %c0_209 = arith.constant 0 : index
    %475 = vector.load %arg3[%c4_207, %c0_208, %c0_209] : memref<7x64x256xbf16, #tpu.memory_space<vmem>>, vector<1x64x256xbf16>
    %476 = vector.shape_cast %475 : vector<1x64x256xbf16> to vector<64x256xbf16>
    %cst_210 = arith.constant dense<0.000000e+00> : vector<64x128xf32>
    %477 = tpu.matmul %476, %473, %cst_210 {dimension_numbers = #tpu.dot_dimension_numbers<[1], [0], [0], [1], [0, 0, 1, 1], [], []>} : vector<64x256xbf16>, vector<256x128xbf16>, vector<64x128xf32> -> vector<64x128xf32>
    %478 = arith.addf %474, %477 : vector<64x128xf32>
    %c0_211 = arith.constant 0 : index
    %c0_212 = arith.constant 0 : index
    %479 = vector.load %arg7[%c0_211, %c0_212] : memref<64x128xf32, #tpu.memory_space<vmem>>, vector<64x128xf32>
    tpu.vector_store %arg7[%c0_211, %c0_212], %478 {strides = array<i32>} : memref<64x128xf32, #tpu.memory_space<vmem>>, vector<64x128xf32>,
    %c640_213 = arith.constant 640 : index
    %c0_214 = arith.constant 0 : index
    %480 = vector.load %arg6[%c640_213, %c0_214] : memref<864x128xbf16, #tpu.memory_space<vmem>>, vector<160x128xbf16>
    %cst_215 = arith.constant dense<0.000000e+00> : vector<256x128xf32>
    %481 = tpu.matmul %414, %480, %cst_215 {dimension_numbers = #tpu.dot_dimension_numbers<[1], [0], [0], [1], [0, 0, 1, 1], [], []>} : vector<256x160xbf16>, vector<160x128xbf16>, vector<256x128xf32> -> vector<256x128xf32>
    %482 = vector.broadcast %3 : vector<256x1xf32> to vector<256x128xf32>
    %483 = arith.addf %481, %482 : vector<256x128xf32>
    %cst_216 = arith.constant 0.000000e+00 : f32
    %484 = vector.broadcast %cst_216 : f32 to vector<256x128xf32>
    %485 = arith.maximumf %483, %484 : vector<256x128xf32>
    %486 = arith.truncf %485 : vector<256x128xf32> to vector<256x128xbf16>
    %c0_217 = arith.constant 0 : index
    %c0_218 = arith.constant 0 : index
    %487 = vector.load %arg7[%c0_217, %c0_218] : memref<64x128xf32, #tpu.memory_space<vmem>>, vector<64x128xf32>
    %c5_219 = arith.constant 5 : index
    %c0_220 = arith.constant 0 : index
    %c0_221 = arith.constant 0 : index
    %488 = vector.load %arg3[%c5_219, %c0_220, %c0_221] : memref<7x64x256xbf16, #tpu.memory_space<vmem>>, vector<1x64x256xbf16>
    %489 = vector.shape_cast %488 : vector<1x64x256xbf16> to vector<64x256xbf16>
    %cst_222 = arith.constant dense<0.000000e+00> : vector<64x128xf32>
    %490 = tpu.matmul %489, %486, %cst_222 {dimension_numbers = #tpu.dot_dimension_numbers<[1], [0], [0], [1], [0, 0, 1, 1], [], []>} : vector<64x256xbf16>, vector<256x128xbf16>, vector<64x128xf32> -> vector<64x128xf32>
    %491 = arith.addf %487, %490 : vector<64x128xf32>
    %c0_223 = arith.constant 0 : index
    %c0_224 = arith.constant 0 : index
    %492 = vector.load %arg7[%c0_223, %c0_224] : memref<64x128xf32, #tpu.memory_space<vmem>>, vector<64x128xf32>
    tpu.vector_store %arg7[%c0_223, %c0_224], %491 {strides = array<i32>} : memref<64x128xf32, #tpu.memory_space<vmem>>, vector<64x128xf32>,
    %c704_225 = arith.constant 704 : index
    %c0_226 = arith.constant 0 : index
    %493 = vector.load %arg6[%c704_225, %c0_226] : memref<864x128xbf16, #tpu.memory_space<vmem>>, vector<160x128xbf16>
    %cst_227 = arith.constant dense<0.000000e+00> : vector<256x128xf32>
    %494 = tpu.matmul %414, %493, %cst_227 {dimension_numbers = #tpu.dot_dimension_numbers<[1], [0], [0], [1], [0, 0, 1, 1], [], []>} : vector<256x160xbf16>, vector<160x128xbf16>, vector<256x128xf32> -> vector<256x128xf32>
    %495 = vector.broadcast %3 : vector<256x1xf32> to vector<256x128xf32>
    %496 = arith.addf %494, %495 : vector<256x128xf32>
    %cst_228 = arith.constant 0.000000e+00 : f32
    %497 = vector.broadcast %cst_228 : f32 to vector<256x128xf32>
    %498 = arith.maximumf %496, %497 : vector<256x128xf32>
    %499 = arith.truncf %498 : vector<256x128xf32> to vector<256x128xbf16>
    %c0_229 = arith.constant 0 : index
    %c0_230 = arith.constant 0 : index
    %500 = vector.load %arg7[%c0_229, %c0_230] : memref<64x128xf32, #tpu.memory_space<vmem>>, vector<64x128xf32>
    %c6_231 = arith.constant 6 : index
    %c0_232 = arith.constant 0 : index
    %c0_233 = arith.constant 0 : index
    %501 = vector.load %arg3[%c6_231, %c0_232, %c0_233] : memref<7x64x256xbf16, #tpu.memory_space<vmem>>, vector<1x64x256xbf16>
    %502 = vector.shape_cast %501 : vector<1x64x256xbf16> to vector<64x256xbf16>
    %cst_234 = arith.constant dense<0.000000e+00> : vector<64x128xf32>
    %503 = tpu.matmul %502, %499, %cst_234 {dimension_numbers = #tpu.dot_dimension_numbers<[1], [0], [0], [1], [0, 0, 1, 1], [], []>} : vector<64x256xbf16>, vector<256x128xbf16>, vector<64x128xf32> -> vector<64x128xf32>
    %504 = arith.addf %500, %503 : vector<64x128xf32>
    %c0_235 = arith.constant 0 : index
    %c0_236 = arith.constant 0 : index
    %505 = vector.load %arg7[%c0_235, %c0_236] : memref<64x128xf32, #tpu.memory_space<vmem>>, vector<64x128xf32>
    tpu.vector_store %arg7[%c0_235, %c0_236], %504 {strides = array<i32>} : memref<64x128xf32, #tpu.memory_space<vmem>>, vector<64x128xf32>,
    %c0_237 = arith.constant 0 : index
    %c0_238 = arith.constant 0 : index
    %506 = vector.load %arg7[%c0_237, %c0_238] : memref<64x128xf32, #tpu.memory_space<vmem>>, vector<64x128xf32>
    %507 = vector.broadcast %4 : vector<64x1xf32> to vector<64x128xf32>
    %508 = arith.addf %506, %507 : vector<64x128xf32>
    %cst_239 = arith.constant 0.000000e+00 : f32
    %509 = vector.broadcast %cst_239 : f32 to vector<64x128xf32>
    %510 = arith.maximumf %508, %509 : vector<64x128xf32>
    %511 = vector.broadcast %5 : vector<64x1xf32> to vector<64x128xf32>
    %512 = arith.mulf %511, %510 : vector<64x128xf32>
    %cst_240 = arith.constant dense<0.000000e+00> : vector<128xf32>
    %513 = vector.multi_reduction <add>, %512, %cst_240 [0] : vector<64x128xf32> to vector<128xf32>
    %514 = vector.shape_cast %513 : vector<128xf32> to vector<1x128xf32>
    %515 = vector.broadcast %6 : vector<1x1xf32> to vector<1x128xf32>
    %516 = arith.addf %514, %515 : vector<1x128xf32>
    %517 = arith.negf %516 : vector<1x128xf32>
    %518 = math.exp %517 : vector<1x128xf32>
    %cst_241 = arith.constant 1.000000e+00 : f32
    %519 = vector.broadcast %cst_241 : f32 to vector<1x128xf32>
    %520 = arith.addf %519, %518 : vector<1x128xf32>
    %521 = arith.divf %519, %520 : vector<1x128xf32>
    %c0_242 = arith.constant 0 : index
    %c0_243 = arith.constant 0 : index
    %c0_244 = arith.constant 0 : index
    %522 = vector.load %arg5[%c0_242, %c0_243, %c0_244] : memref<1x1x128xf32, #tpu.memory_space<vmem>>, vector<1x1x128xf32>
    %523 = vector.shape_cast %522 : vector<1x1x128xf32> to vector<1x128xf32>
    %524 = vector.shape_cast %521 : vector<1x128xf32> to vector<1x1x128xf32>
    tpu.vector_store %arg5[%c0_242, %c0_243, %c0_244], %524 {strides = array<i32>} : memref<1x1x128xf32, #tpu.memory_space<vmem>>, vector<1x1x128xf32>,
    return
  }
  func.func @transform_0(%arg0: i32) -> (i32, i32) {
    %c0_i32 = arith.constant 0 : i32
    %c0_i32_0 = arith.constant 0 : i32
    return %c0_i32, %arg0 : i32, i32
  }
  func.func @transform_1(%arg0: i32) -> (i32, i32) {
    %c0_i32 = arith.constant 0 : i32
    %c0_i32_0 = arith.constant 0 : i32
    %c0_i32_1 = arith.constant 0 : i32
    return %c0_i32, %c0_i32_0 : i32, i32
  }
  func.func @transform_2(%arg0: i32) -> (i32, i32, i32) {
    %c0_i32 = arith.constant 0 : i32
    %c0_i32_0 = arith.constant 0 : i32
    %c0_i32_1 = arith.constant 0 : i32
    %c0_i32_2 = arith.constant 0 : i32
    return %c0_i32, %c0_i32_0, %c0_i32_1 : i32, i32, i32
  }
  func.func @transform_3(%arg0: i32) -> (i32, i32) {
    %c0_i32 = arith.constant 0 : i32
    %c0_i32_0 = arith.constant 0 : i32
    %c0_i32_1 = arith.constant 0 : i32
    return %c0_i32, %c0_i32_0 : i32, i32
  }
  func.func @transform_4(%arg0: i32) -> (i32, i32, i32) {
    %c0_i32 = arith.constant 0 : i32
    %c0_i32_0 = arith.constant 0 : i32
    %c0_i32_1 = arith.constant 0 : i32
    return %arg0, %c0_i32, %c0_i32_0 : i32, i32, i32
  }
}

</mosaic_0001>

<bundles_post_ra>
// kernel: tpu_custom_call.1
= control target key start
LH: loop header
LB: loop body
LE: loop exit
PB: predicated region body
PF: predicated region fallthrough
CT: control target
= control target key end

     0   :  { %v9178_v2 = vmov 0   ;;  %s9173_s0 = inlined_call_operand.vmem [shape: f32[28,128], index: 0, kind: input, shape index: {}]   ;;  %s9174_s1 = inlined_call_operand.vmem [shape: bf16[256,160], index: 1, kind: input, shape index: {}]   ;;  %s9175_s2 = inlined_call_operand.vmem [shape: bf16[7,64,256], index: 2, kind: input, shape index: {}]   ;;  %s9176_s3 = inlined_call_operand.vmem [shape: f32[481,1], index: 3, kind: input, shape index: {}]   ;;  %s9177_s4 = inlined_call_operand.hbm [shape: f32[1,1,128], index: 4, kind: output, shape index: {}]  }
   0x1   :  { %v25_v0 = vld [vmem:[%s9176_s3 + $0x30] sm:$0xff]  ;;  %6238 = vset.pattern.permute.xlu1 %v9178_v2  ;;  %6237 = vset.pattern.permute.xlu0 %v9178_v2  ;;  %v26_v3 = vld [vmem:[%s9176_s3 + $0x38] sm:$0xff]  ;;  %v20_v5 = vld [vmem:[%s9176_s3 + $0x8] sm:$0xff] }
   0x2   :  { %v21_v1 = vld [vmem:[%s9176_s3 + $0x10] sm:$0xff]  ;;  %122 = vperm.xlu1 %6238, %v25_v0   ;;  %v22_v4 = vld [vmem:[%s9176_s3 + $0x18] sm:$0xff]  ;;  %1963 = vmatprep.subr.bf16.mxu0 %v9178_v2  ;;  %v19_v6 = vld [vmem:[%s9176_s3] sm:$0xff] }
   0x3   :  { %94 = vperm.xlu0 %6237, %v21_v1   ;;  %v24_v7 = vld [vmem:[%s9176_s3 + $0x28] sm:$0xff]  ;;  %v23_v8 = vld [vmem:[%s9176_s3 + $0x20] sm:$0xff]  ;;  %v30_v9 = vld [vmem:[%s9176_s3 + $0x58] sm:$0xff] }
   0x4   :  { %v29_v10 = vld [vmem:[%s9176_s3 + $0x50] sm:$0xff]  ;;  %v28_v11 = vld [vmem:[%s9176_s3 + $0x48] sm:$0xff]  ;;  %v27_v12 = vld [vmem:[%s9176_s3 + $0x40] sm:$0xff] }
   0x5   :  { %v62_v13 = vld [vmem:[%s9176_s3 + $0x158] sm:$0xff]  ;;  %v61_v14 = vld [vmem:[%s9176_s3 + $0x150] sm:$0xff]  ;;  %v60_v17 = vld [vmem:[%s9176_s3 + $0x148] sm:$0xff] }
   0x6   :  { %127 = vperm.xlu1 %6238, %v26_v3   ;;  %v46_v15 = vld [vmem:[%s9176_s3 + $0xd8] sm:$0xff]  ;;  %v45_v16 = vld [vmem:[%s9176_s3 + $0xd0] sm:$0xff]  ;;  %v59_v18 = vld [vmem:[%s9176_s3 + $0x140] sm:$0xff] }
   0x7   :  { %99 = vperm.xlu0 %6237, %v22_v4   ;;  %v44_v19 = vld [vmem:[%s9176_s3 + $0xc8] sm:$0xff]  ;;  %v43_v20 = vld [vmem:[%s9176_s3 + $0xc0] sm:$0xff]  ;;  %v58_v21 = vld [vmem:[%s9176_s3 + $0x138] sm:$0xff] }
   0x8   :  { %v57_v22 = vld [vmem:[%s9176_s3 + $0x130] sm:$0xff]  ;;  %v42_v23 = vld [vmem:[%s9176_s3 + $0xb8] sm:$0xff]  ;;  %v56_v25 = vld [vmem:[%s9176_s3 + $0x128] sm:$0xff] }
   0x9   :  { %v41_v24 = vld [vmem:[%s9176_s3 + $0xb0] sm:$0xff]  ;;  %v55_v26 = vld [vmem:[%s9176_s3 + $0x120] sm:$0xff]  ;;  %v40_v27 = vld [vmem:[%s9176_s3 + $0xa8] sm:$0xff] }
   0xa   :  { %89 = vperm.xlu1 %6238, %v20_v5   ;;  %v39_v28 = vld [vmem:[%s9176_s3 + $0xa0] sm:$0xff] }
   0xb   :  { %84 = vperm.xlu0 %6237, %v19_v6  }
   0xe   :  { %117 = vperm.xlu1 %6238, %v24_v7  }
   0xf   :  { %112 = vperm.xlu0 %6237, %v23_v8  }
  0x12   :  { %159 = vperm.xlu1 %6238, %v30_v9  }
  0x13   :  { %154 = vperm.xlu0 %6237, %v29_v10  }
  0x16   :  { %149 = vperm.xlu1 %6238, %v28_v11  }
  0x17   :  { %144 = vperm.xlu0 %6237, %v27_v12  }
  0x1a   :  { %1707 = vperm.xlu1 %6238, %v62_v13  }
  0x1b   :  { %1702 = vperm.xlu0 %6237, %v61_v14  }
  0x1e   :  { %1627 = vperm.xlu1 %6238, %v46_v15  }
  0x1f   :  { %1622 = vperm.xlu0 %6237, %v45_v16  }
  0x22   :  { %1697 = vperm.xlu1 %6238, %v60_v17  }
  0x23   :  { %1692 = vperm.xlu0 %6237, %v59_v18  }
  0x26   :  { %1617 = vperm.xlu1 %6238, %v44_v19  }
  0x27   :  { %1612 = vperm.xlu0 %6237, %v43_v20  }
  0x2a   :  { %1687 = vperm.xlu1 %6238, %v58_v21  }
  0x2b   :  { %1682 = vperm.xlu0 %6237, %v57_v22  }
  0x2e   :  { %1607 = vperm.xlu1 %6238, %v42_v23  }
  0x2f   :  { %1602 = vperm.xlu0 %6237, %v41_v24  }
  0x32   :  { %1677 = vperm.xlu1 %6238, %v56_v25  }
  0x33   :  { %1672 = vperm.xlu0 %6237, %v55_v26  }
  0x36   :  { %1597 = vperm.xlu1 %6238, %v40_v27  }
  0x37   :  { %1592 = vperm.xlu0 %6237, %v39_v28  }
  0x38   :  { %9 = vsyncpa [#allocation5], 0  ;;  %v54_v29 = vld [vmem:[%s9176_s3 + $0x118] sm:$0xff]  ;;  %v53_v30 = vld [vmem:[%s9176_s3 + $0x110] sm:$0xff]  ;;  %vm1914_vm0 = vcmask 261120  }
  0x39   :  { %v38_v31 = vld [vmem:[%s9176_s3 + $0x98] sm:$0xff]  ;;  %v37_v32 = vld [vmem:[%s9176_s3 + $0x90] sm:$0xff]  ;;  %v52_v33 = vld [vmem:[%s9176_s3 + $0x108] sm:$0xff] }
  0x3a   :  { %1667 = vperm.xlu1 %6238, %v54_v29   ;;  %v51_v34 = vld [vmem:[%s9176_s3 + $0x100] sm:$0xff]  ;;  %v36_v36 = vld [vmem:[%s9176_s3 + $0x88] sm:$0xff]  ;;  %v50_v38 = vld [vmem:[%s9176_s3 + $0xf8] sm:$0xff] }
  0x3b   :  { %1662 = vperm.xlu0 %6237, %v53_v30   ;;  %v6249_v35 = vld [vmem:[%s9174_s1 + $0x4] ss:$8 sps:$4 sm:$0xff]   ;;  %v49_v39 = vld [vmem:[%s9176_s3 + $0xf0] sm:$0xff]  ;;  %v34_v40 = vld [vmem:[%s9176_s3 + $0x78] sm:$0xff] }
  0x3c   :  { %v35_v37 = vld [vmem:[%s9176_s3 + $0x80] sm:$0xff]  ;;  %5227 = vmatprep.mubr.msk.bf16.mxu0 %vm1914_vm0, %v6249_v35  ;;  %v33_v41 = vld [vmem:[%s9176_s3 + $0x70] sm:$0xff]  ;;  %v48_v42 = vld [vmem:[%s9176_s3 + $0xe8] sm:$0xff] }
  0x3d   :  { %v47_v43 = vld [vmem:[%s9176_s3 + $0xe0] sm:$0xff]  ;;  %v32_v44 = vld [vmem:[%s9176_s3 + $0x68] sm:$0xff]  ;;  %v66_v48 = vld [vmem:[%s9176_s3 + $0x178] sm:$0xff] }
  0x3e   :  { %1587 = vperm.xlu1 %6238, %v38_v31   ;;  %v31_v45 = vld [vmem:[%s9176_s3 + $0x60] sm:$0xff]  ;;  %v64_v46 = vld [vmem:[%s9176_s3 + $0x168] sm:$0xff]  ;;  %v65_v49 = vld [vmem:[%s9176_s3 + $0x170] sm:$0xff] }
  0x3f   :  { %1582 = vperm.xlu0 %6237, %v37_v32   ;;  %v63_v47 = vld [vmem:[%s9176_s3 + $0x160] sm:$0xff]  ;;  %v72_v50 = vld [vmem:[%s9176_s3 + $0x1a8] sm:$0xff]  ;;  %v73_v52 = vld [vmem:[%s9176_s3 + $0x1b0] sm:$0xff] }
  0x40   :  { %v71_v51 = vld [vmem:[%s9176_s3 + $0x1a0] sm:$0xff]  ;;  %v74_v54 = vld [vmem:[%s9176_s3 + $0x1b8] sm:$0xff]  ;;  %v68_v55 = vld [vmem:[%s9176_s3 + $0x188] sm:$0xff] }
  0x41   :  { %v67_v53 = vld [vmem:[%s9176_s3 + $0x180] sm:$0xff]  ;;  %v69_v57 = vld [vmem:[%s9176_s3 + $0x190] sm:$0xff]  ;;  %v76_v58 = vld [vmem:[%s9176_s3 + $0x1c8] sm:$0xff] }
  0x42   :  { %1657 = vperm.xlu1 %6238, %v52_v33   ;;  %v75_v56 = vld [vmem:[%s9176_s3 + $0x1c0] sm:$0xff]  ;;  %v70_v59 = vld [vmem:[%s9176_s3 + $0x198] sm:$0xff]  ;;  %v77_v61 = vld [vmem:[%s9176_s3 + $0x1d0] sm:$0xff] }
  0x43   :  { %1652 = vperm.xlu0 %6237, %v51_v34   ;;  %v78_v60 = vld [vmem:[%s9176_s3 + $0x1d8] sm:$0xff]  ;;  %v79_v62 = vld [vmem:[%s9176_s3 + $0x1e0] sm:$0x1]  ;;  %v6769_v63 = vld [vmem:[%s9173_s0 + $0x3] ss:$0 sm:$0xff] }
  0x44   :  { %v6774_v0 = vld [vmem:[%s9173_s0 + $0x4] ss:$0 sm:$0xff]  ;;  %v6779_v1 = vld [vmem:[%s9173_s0 + $0x2] ss:$0 sm:$0xff]  ;;  %v6784_v3 = vld [vmem:[%s9173_s0 + $0x1] ss:$0 sm:$0xff] }
  0x45   :  { %v5023_v4 = vld [vmem:[%s9173_s0] ss:$0 sm:$0xff]  ;;  %v6796_v7 = vld [vmem:[%s9173_s0 + $0x5] ss:$0 sm:$0xff]  ;;  %v6809_v12 = vld [vmem:[%s9173_s0 + $0x7] ss:$0 sm:$0xff] }
  0x46   :  { %1577 = vperm.xlu1 %6238, %v36_v36   ;;  %v6814_v13 = vld [vmem:[%s9173_s0 + $0x8] ss:$0 sm:$0xff] }
  0x47   :  { %1572 = vperm.xlu0 %6237, %v35_v37  }
  0x4a   :  { %1647 = vperm.xlu1 %6238, %v50_v38  }
  0x4b   :  { %1642 = vperm.xlu0 %6237, %v49_v39  }
  0x4e   :  { %1567 = vperm.xlu1 %6238, %v34_v40  }
  0x4f   :  { %1562 = vperm.xlu0 %6237, %v33_v41  }
  0x52   :  { %1637 = vperm.xlu1 %6238, %v48_v42  }
  0x53   :  { %1632 = vperm.xlu0 %6237, %v47_v43  }
  0x56   :  { %1557 = vperm.xlu1 %6238, %v32_v44  }
  0x57   :  { %1552 = vperm.xlu0 %6237, %v31_v45  }
  0x5a   :  { %4886 = vperm.xlu1 %6238, %v64_v46  }
  0x5b   :  { %4881 = vperm.xlu0 %6237, %v63_v47  }
  0x5e   :  { %4896 = vperm.xlu1 %6238, %v66_v48  }
  0x5f   :  { %4891 = vperm.xlu0 %6237, %v65_v49  }
  0x62   :  { %4942 = vperm.xlu1 %6238, %v72_v50   ;;  %v6883_v50 = vld [vmem:[%s9173_s0 + $0x6] ss:$0 sm:$0xff] }
  0x63   :  { %4937 = vperm.xlu0 %6237, %v71_v51  }
  0x66   :  { %4947 = vperm.xlu1 %6238, %v73_v52  }
  0x67   :  { %4901 = vperm.xlu0 %6237, %v67_v53  }
  0x6a   :  { %4952 = vperm.xlu1 %6238, %v74_v54  }
  0x6b   :  { %4906 = vperm.xlu0 %6237, %v68_v55  }
  0x6e   :  { %4957 = vperm.xlu1 %6238, %v75_v56  }
  0x6f   :  { %4911 = vperm.xlu0 %6237, %v69_v57  }
  0x72   :  { %4962 = vperm.xlu1 %6238, %v76_v58  }
  0x73   :  { %4916 = vperm.xlu0 %6237, %v70_v59  }
  0x76   :  { %4972 = vperm.xlu1 %6238, %v78_v60  }
  0x77   :  { %4967 = vperm.xlu0 %6237, %v77_v61  }
  0x7b   :  { %4998 = vperm.xlu0 %6237, %v79_v62  }
  0x7d   :  { %v6789_v5 = vpop.permute.xlu1 %122 }
  0x7e   :  { %v6791_v6 = vpop.permute.xlu0 %94  ;;  %v306_v9 = vmul.f32 %v6774_v0, %v6789_v5  ;;  %v256_v11 = vmul.f32 %v6769_v63, %v6789_v5  ;;  %v206_v15 = vmul.f32 %v6779_v1, %v6789_v5  ;;  %v136_v17 = vmul.f32 %v6784_v3, %v6789_v5 }
  0x7f   :  { %v298_v8 = vmul.f32 %v6769_v63, %v6791_v6  ;;  %v248_v10 = vmul.f32 %v6779_v1, %v6791_v6  ;;  %v198_v14 = vmul.f32 %v6784_v3, %v6791_v6  ;;  %v108_v16 = vmul.f32 %v5023_v4, %v6791_v6 }
  0x80   :  { %v348_v20 = vmul.f32 %v6774_v0, %v6791_v6  ;;  %v356_v21 = vmul.f32 %v6796_v7, %v6789_v5  ;;  %v498_v26 = vmul.f32 %v6809_v12, %v6791_v6  ;;  %v506_v27 = vmul.f32 %v6814_v13, %v6789_v5 }
  0x81   :  { %v6823_v18 = vadd.f32 %v306_v9, %v298_v8  ;;  %v6825_v19 = vadd.f32 %v256_v11, %v248_v10  ;;  %v6831_v22 = vpop.permute.xlu1 %127  ;;  %v6835_v24 = vadd.f32 %v206_v15, %v198_v14  ;;  %v6837_v25 = vadd.f32 %v136_v17, %v108_v16 }
  0x82   :  { %v6833_v23 = vpop.permute.xlu0 %99  ;;  %v307_v29 = vmul.f32 %v6774_v0, %v6831_v22  ;;  %v257_v31 = vmul.f32 %v6769_v63, %v6831_v22  ;;  %v207_v33 = vmul.f32 %v6779_v1, %v6831_v22  ;;  %v137_v35 = vmul.f32 %v6784_v3, %v6831_v22 }
  0x83   :  { %v299_v28 = vmul.f32 %v6769_v63, %v6833_v23  ;;  %v249_v30 = vmul.f32 %v6779_v1, %v6833_v23  ;;  %v199_v32 = vmul.f32 %v6784_v3, %v6833_v23  ;;  %v109_v34 = vmul.f32 %v5023_v4, %v6833_v23 }
  0x84   :  { %v349_v38 = vmul.f32 %v6774_v0, %v6833_v23  ;;  %v357_v39 = vmul.f32 %v6796_v7, %v6831_v22  ;;  %v6866_v44 = vadd.f32 %v356_v21, %v348_v20  ;;  %v6870_v45 = vmul.f32 %v6809_v12, %v6833_v23 }
  0x85   :  { %v311_v36 = vadd.f32 %v307_v29, %v299_v28  ;;  %v261_v37 = vadd.f32 %v257_v31, %v249_v30  ;;  %v6862_v40 = vpop.permute.xlu1 %89  ;;  %v211_v42 = vadd.f32 %v207_v33, %v199_v32  ;;  %v141_v43 = vadd.f32 %v137_v35, %v109_v34 }
  0x86   :  { %v6864_v41 = vpop.permute.xlu0 %84  ;;  %v297_v47 = vmul.f32 %v6769_v63, %v6862_v40  ;;  %v247_v49 = vmul.f32 %v6779_v1, %v6862_v40  ;;  %v197_v52 = vmul.f32 %v6784_v3, %v6862_v40  ;;  %v107_v54 = vmul.f32 %v5023_v4, %v6862_v40 }
  0x87   :  { %v296_v46 = vmul.f32 %v6769_v63, %v6864_v41  ;;  %v246_v48 = vmul.f32 %v6779_v1, %v6864_v41  ;;  %v196_v51 = vmul.f32 %v6784_v3, %v6864_v41  ;;  %v106_v53 = vmul.f32 %v5023_v4, %v6864_v41 }
  0x88   :  { %v6891_v55 = vadd.f32 %v357_v39, %v349_v38  ;;  %v6895_v56 = vmul.f32 %v6774_v0, %v6864_v41  ;;  %v6899_v57 = vmul.f32 %v6774_v0, %v6862_v40  ;;  %v6903_v58 = vmul.f32 %v6814_v13, %v6831_v22 }
  0x89   :  { %v6905_v59 = vpop.permute.xlu1 %117  ;;  %v6909_v61 = vadd.f32 %v506_v27, %v498_v26  ;;  %v6913_v62 = vmul.f32 %v6809_v12, %v6864_v41  ;;  %v6917_v4 = vmul.f32 %v6809_v12, %v6862_v40  ;;  %v6921_v8 = vmul.f32 %v6883_v50, %v6791_v6 }
  0x8a   :  { %v6907_v60 = vpop.permute.xlu0 %112  ;;  %v305_v10 = vmul.f32 %v6774_v0, %v6905_v59  ;;  %v255_v14 = vmul.f32 %v6769_v63, %v6905_v59  ;;  %v205_v16 = vmul.f32 %v6779_v1, %v6905_v59  ;;  %v135_v20 = vmul.f32 %v6784_v3, %v6905_v59 }
  0x8b   :  { %v304_v9 = vmul.f32 %v6774_v0, %v6907_v60  ;;  %v254_v11 = vmul.f32 %v6769_v63, %v6907_v60  ;;  %v204_v15 = vmul.f32 %v6779_v1, %v6907_v60  ;;  %v134_v17 = vmul.f32 %v6784_v3, %v6907_v60 }
  0x8c   :  { %v309_v0 = vadd.f32 %v305_v10, %v297_v47  ;;  %v259_v27 = vadd.f32 %v255_v14, %v247_v49  ;;  %v209_v30 = vadd.f32 %v205_v16, %v197_v52  ;;  %v139_v32 = vadd.f32 %v135_v20, %v107_v54 }
  0x8d   :  { %v308_v21 = vadd.f32 %v304_v9, %v296_v46  ;;  %v258_v26 = vadd.f32 %v254_v11, %v246_v48  ;;  %v6939_v28 = vpop.permute.xlu1 %159  ;;  %v208_v63 = vadd.f32 %v204_v15, %v196_v51  ;;  %v138_v31 = vadd.f32 %v134_v17, %v106_v53 }
  0x8e   :  { %v6941_v29 = vpop.permute.xlu0 %154  ;;  %v315_v33 = vadd.f32 %v311_v36, %v6939_v28  ;;  %v265_v34 = vadd.f32 %v261_v37, %v6939_v28  ;;  %v215_v38 = vadd.f32 %v211_v42, %v6939_v28  ;;  %v165_v46 = vadd.f32 %v6939_v28, %v141_v43 }
  0x8f   :  { %v314_v1 = vadd.f32 %v6823_v18, %v6941_v29  ;;  %v264_v3 = vadd.f32 %v6825_v19, %v6941_v29  ;;  %v214_v35 = vadd.f32 %v6835_v24, %v6941_v29  ;;  %v164_v39 = vadd.f32 %v6941_v29, %v6837_v25 }
  0x90   :  { %v319_v48 = vmax.f32 %v315_v33, 0.0  ;;  %v269_v49 = vmax.f32 %v265_v34, 0.0  ;;  %v219_v37 = vmax.f32 %v215_v38, 0.0  ;;  %v169_v53 = vmax.f32 %v165_v46, 0.0 }
  0x91   :  { %v318_v47 = vmax.f32 %v314_v1, 0.0  ;;  %v268_v18 = vmax.f32 %v264_v3, 0.0  ;;  %v6955_v36 = vpop.permute.xlu1 %149  ;;  %v218_v19 = vmax.f32 %v214_v35, 0.0  ;;  %v168_v52 = vmax.f32 %v164_v39, 0.0 }
  0x92   :  { %v6957_v51 = vpop.permute.xlu0 %144  ;;  %v313_v54 = vadd.f32 %v309_v0, %v6955_v36  ;;  %v263_v9 = vadd.f32 %v259_v27, %v6955_v36  ;;  %v213_v16 = vadd.f32 %v209_v30, %v6955_v36  ;;  %v163_v27 = vadd.f32 %v6955_v36, %v139_v32 }
  0x93   :  { %v5650_v24 = vpack.c.bf16 %v319_v48, %v318_v47  ;;  %v312_v42 = vadd.f32 %v308_v21, %v6957_v51  ;;  %v5640_v25 = vpack.c.bf16 %v269_v49, %v268_v18  ;;  %v262_v43 = vadd.f32 %v258_v26, %v6957_v51 }
  0x94   :  { %v5630_v10 = vpack.c.bf16 %v219_v37, %v218_v19  ;;  %v212_v11 = vadd.f32 %v208_v63, %v6957_v51  ;;  %v317_v15 = vmax.f32 %v313_v54, 0.0  ;;  %v5620_v17 = vpack.c.bf16 %v169_v53, %v168_v52 }
  0x95   :  { %5888 = vst [vmem:[#allocation2 + $0x38] sm:$0xff] %v5650_v24   ;;  %v316_v14 = vmax.f32 %v312_v42, 0.0  ;;  %5886 = vst [vmem:[#allocation2 + $0x28] sm:$0xff] %v5640_v25   ;;  %v266_v20 = vmax.f32 %v262_v43, 0.0  ;;  %v267_v1 = vmax.f32 %v263_v9, 0.0  ;;  %v162_v0 = vadd.f32 %v6957_v51, %v138_v31 }
  0x96   :  { %5884 = vst [vmem:[#allocation2 + $0x18] sm:$0xff] %v5630_v10   ;;  %v216_v21 = vmax.f32 %v212_v11, 0.0  ;;  %v217_v26 = vmax.f32 %v213_v16, 0.0  ;;  %5882 = vst [vmem:[#allocation2 + $0x8] sm:$0xff] %v5620_v17   ;;  %v364_v63 = vadd.f32 %v6866_v44, %v6941_v29  ;;  %v365_v30 = vadd.f32 %v6891_v55, %v6939_v28 }
  0x97   :  { %v5645_v33 = vpack.c.bf16 %v317_v15, %v316_v14  ;;  %v5635_v3 = vpack.c.bf16 %v267_v1, %v266_v20  ;;  %v166_v34 = vmax.f32 %v162_v0, 0.0  ;;  %v354_v35 = vmul.f32 %v6796_v7, %v6907_v60 }
  0x98   :  { %v5625_v38 = vpack.c.bf16 %v217_v26, %v216_v21  ;;  %v167_v39 = vmax.f32 %v163_v27, 0.0  ;;  %v368_v31 = vmax.f32 %v364_v63, 0.0  ;;  %v355_v46 = vmul.f32 %v6796_v7, %v6905_v59 }
  0x99   :  { %5887 = vst [vmem:[#allocation2 + $0x30] sm:$0xff] %v5645_v33   ;;  %5885 = vst [vmem:[#allocation2 + $0x20] sm:$0xff] %v5635_v3   ;;  %v369_v32 = vmax.f32 %v365_v30, 0.0  ;;  %v358_v47 = vadd.f32 %v354_v35, %v6895_v56  ;;  %v511_v44 = vadd.f32 %v6903_v58, %v6870_v45  ;;  %v514_v55 = vadd.f32 %v6909_v61, %v6941_v29 }
  0x9a   :  { %5883 = vst [vmem:[#allocation2 + $0x10] sm:$0xff] %v5625_v38   ;;  %v5615_v48 = vpack.c.bf16 %v167_v39, %v166_v34  ;;  %v359_v18 = vadd.f32 %v355_v46, %v6899_v57  ;;  %v504_v49 = vmul.f32 %v6814_v13, %v6907_v60  ;;  %v505_v19 = vmul.f32 %v6814_v13, %v6905_v59 }
  0x9b   :  { %v5660_v52 = vpack.c.bf16 %v369_v32, %v368_v31  ;;  %v362_v56 = vadd.f32 %v358_v47, %v6957_v51  ;;  %v515_v53 = vadd.f32 %v511_v44, %v6939_v28  ;;  %v518_v45 = vmax.f32 %v514_v55, 0.0 }
  0x9c   :  { %v6239_v37 = vld [vmem:[#allocation2 + $0x38] sm:$0xff]   ;;  %5616 = vst [vmem:[#allocation2] sm:$0xff] %v5615_v48   ;;  %v363_v58 = vadd.f32 %v359_v18, %v6955_v36  ;;  %v508_v61 = vadd.f32 %v504_v49, %v6913_v62  ;;  %v509_v57 = vadd.f32 %v505_v19, %v6917_v4  ;;  %v449_v24 = vmul.f32 %v6883_v50, %v6833_v23  ;;  %v6241_v30 = vld [vmem:[#allocation2 + $0x28] sm:$0xff]  }
  0x9d   :  { %1964 = vmatpush1.bf16.msra.mxu0 %v6239_v37  ;;  %5890 = vst [vmem:[#allocation2 + $0x48] sm:$0xff] %v5660_v52   ;;  %v366_v42 = vmax.f32 %v362_v56, 0.0  ;;  %v456_v54 = vmul.f32 %v6809_v12, %v6789_v5  ;;  %v457_v25 = vmul.f32 %v6809_v12, %v6831_v22  ;;  %v446_v43 = vmul.f32 %v6883_v50, %v6864_v41  ;;  %v7032_v19 = vld [vmem:[%s9173_s0 + $0x9] ss:$0 sm:$0xff] }
  0x9e   :  { %1965 = vmatprep.subr.bf16.mxu0 %v9178_v2  ;;  %v367_v62 = vmax.f32 %v363_v58, 0.0  ;;  %v512_v4 = vadd.f32 %v508_v61, %v6957_v51  ;;  %v513_v9 = vadd.f32 %v509_v57, %v6955_v36  ;;  %v447_v10 = vmul.f32 %v6883_v50, %v6862_v40 }
  0x9f   :  { %v519_v14 = vmax.f32 %v515_v53, 0.0  ;;  %v460_v15 = vadd.f32 %v456_v54, %v6921_v8  ;;  %v461_v16 = vadd.f32 %v457_v25, %v449_v24  ;;  %v454_v17 = vmul.f32 %v6809_v12, %v6907_v60  ;;  %v7046_v25 = vld [vmem:[%s9173_s0 + $0xb] ss:$0 sm:$0xff] }
  0xa0   :  { %v6240_v11 = vld [vmem:[#allocation2 + $0x30] sm:$0xff]   ;;  %v5655_v20 = vpack.c.bf16 %v367_v62, %v366_v42  ;;  %v516_v1 = vmax.f32 %v512_v4, 0.0  ;;  %v455_v21 = vmul.f32 %v6809_v12, %v6905_v59  ;;  %v398_v0 = vmul.f32 %v6796_v7, %v6791_v6 }
  0xa1   :  { %1966 = vmatpush1.bf16.msra.mxu0 %v6240_v11  ;;  %v5690_v33 = vpack.c.bf16 %v519_v14, %v518_v45  ;;  %v517_v26 = vmax.f32 %v513_v9, 0.0  ;;  %v464_v27 = vadd.f32 %v460_v15, %v6941_v29  ;;  %v465_v63 = vadd.f32 %v461_v16, %v6939_v28  ;;  %v6242_v45 = vld [vmem:[#allocation2 + $0x20] sm:$0xff]   ;;  %v6243_v11 = vld [vmem:[#allocation2 + $0x18] sm:$0xff]  }
  0xa2   :  { %1967 = vmatprep.subr.bf16.mxu0 %v9178_v2  ;;  %5889 = vst [vmem:[#allocation2 + $0x40] sm:$0xff] %v5655_v20   ;;  %v458_v8 = vadd.f32 %v454_v17, %v446_v43  ;;  %v459_v3 = vadd.f32 %v455_v21, %v447_v10  ;;  %v399_v34 = vmul.f32 %v6796_v7, %v6833_v23  ;;  %v7051_v43 = vld [vmem:[%s9173_s0 + $0xc] ss:$0 sm:$0xff] }
  0xa3   :  { %v406_v12 = vmul.f32 %v6883_v50, %v6789_v5  ;;  %5896 = vst [vmem:[#allocation2 + $0x78] sm:$0xff] %v5690_v33   ;;  %v5685_v35 = vpack.c.bf16 %v517_v26, %v516_v1  ;;  %v468_v38 = vmax.f32 %v464_v27, 0.0  ;;  %v407_v39 = vmul.f32 %v6883_v50, %v6831_v22 }
  0xa4   :  { %v396_v31 = vmul.f32 %v6796_v7, %v6864_v41  ;;  %v469_v46 = vmax.f32 %v465_v63, 0.0  ;;  %v462_v32 = vadd.f32 %v458_v8, %v6957_v51  ;;  %v463_v47 = vadd.f32 %v459_v3, %v6955_v36 }
  0xa5   :  { %v410_v44 = vadd.f32 %v406_v12, %v398_v0  ;;  %1968 = vmatpush1.bf16.msra.mxu0 %v6241_v30  ;;  %5895 = vst [vmem:[#allocation2 + $0x70] sm:$0xff] %v5685_v35   ;;  %v411_v55 = vadd.f32 %v407_v39, %v399_v34  ;;  %v397_v48 = vmul.f32 %v6796_v7, %v6862_v40  ;;  %v7081_v39 = vld [vmem:[%s9173_s0 + $0xa] ss:$0 sm:$0xff] }
  0xa6   :  { %v404_v18 = vmul.f32 %v6883_v50, %v6907_v60  ;;  %v405_v49 = vmul.f32 %v6883_v50, %v6905_v59  ;;  %1969 = vmatprep.subr.bf16.mxu0 %v9178_v2  ;;  %v5680_v37 = vpack.c.bf16 %v469_v46, %v468_v38  ;;  %v466_v52 = vmax.f32 %v462_v32, 0.0 }
  0xa7   :  { %v467_v56 = vmax.f32 %v463_v47, 0.0  ;;  %v414_v53 = vadd.f32 %v410_v44, %v6941_v29  ;;  %v415_v7 = vadd.f32 %v411_v55, %v6939_v28  ;;  %v548_v50 = vmul.f32 %v6814_v13, %v6791_v6 }
  0xa8   :  { %v408_v58 = vadd.f32 %v404_v18, %v396_v31  ;;  %v409_v61 = vadd.f32 %v405_v49, %v397_v48  ;;  %5894 = vst [vmem:[#allocation2 + $0x68] sm:$0xff] %v5680_v37   ;;  %v549_v42 = vmul.f32 %v6814_v13, %v6833_v23  ;;  %v556_v54 = vmul.f32 %v7032_v19, %v6789_v5  ;;  %v6244_v31 = vld [vmem:[#allocation2 + $0x10] sm:$0xff]  }
  0xa9   :  { %v5675_v57 = vpack.c.bf16 %v467_v56, %v466_v52  ;;  %v418_v24 = vmax.f32 %v414_v53, 0.0  ;;  %1970 = vmatpush1.bf16.msra.mxu0 %v6242_v45  ;;  %v419_v62 = vmax.f32 %v415_v7, 0.0  ;;  %v557_v10 = vmul.f32 %v7032_v19, %v6831_v22 }
  0xaa   :  { %v412_v4 = vadd.f32 %v408_v58, %v6957_v51  ;;  %v413_v9 = vadd.f32 %v409_v61, %v6955_v36  ;;  %1971 = vmatprep.subr.bf16.mxu0 %v9178_v2  ;;  %v560_v14 = vadd.f32 %v556_v54, %v548_v50  ;;  %v546_v15 = vmul.f32 %v6814_v13, %v6864_v41  ;;  %v6245_v50 = vld [vmem:[#allocation2 + $0x8] sm:$0xff]  }
  0xab   :  { %5893 = vst [vmem:[#allocation2 + $0x60] sm:$0xff] %v5675_v57   ;;  %v547_v16 = vmul.f32 %v6814_v13, %v6862_v40  ;;  %v554_v17 = vmul.f32 %v7032_v19, %v6907_v60  ;;  %v5670_v20 = vpack.c.bf16 %v419_v62, %v418_v24  ;;  %v561_v0 = vadd.f32 %v557_v10, %v549_v42 }
  0xac   :  { %v416_v1 = vmax.f32 %v412_v4, 0.0  ;;  %v417_v21 = vmax.f32 %v413_v9, 0.0  ;;  %v564_v33 = vadd.f32 %v560_v14, %v6941_v29  ;;  %v555_v26 = vmul.f32 %v7032_v19, %v6905_v59 }
  0xad   :  { %v558_v27 = vadd.f32 %v554_v17, %v546_v15  ;;  %v698_v63 = vmul.f32 %v7046_v25, %v6791_v6  ;;  %1972 = vmatpush1.bf16.msra.mxu0 %v6243_v11  ;;  %5892 = vst [vmem:[#allocation2 + $0x58] sm:$0xff] %v5670_v20   ;;  %v565_v13 = vadd.f32 %v561_v0, %v6939_v28  ;;  %v6246_v0 = vld [vmem:[#allocation2] sm:$0xff]  }
  0xae   :  { %v5665_v8 = vpack.c.bf16 %v417_v21, %v416_v1  ;;  %v699_v3 = vmul.f32 %v7046_v25, %v6833_v23  ;;  %v706_v34 = vmul.f32 %v7051_v43, %v6789_v5  ;;  %1973 = vmatprep.subr.bf16.mxu0 %v9178_v2  ;;  %v568_v12 = vmax.f32 %v564_v33, 0.0 }
  0xaf   :  { %v559_v30 = vadd.f32 %v555_v26, %v547_v16  ;;  %v562_v35 = vadd.f32 %v558_v27, %v6957_v51  ;;  %v707_v38 = vmul.f32 %v7051_v43, %v6831_v22  ;;  %v569_v46 = vmax.f32 %v565_v13, 0.0 }
  0xb0   :  { %5891 = vst [vmem:[#allocation2 + $0x50] sm:$0xff] %v5665_v8   ;;  %v710_v32 = vadd.f32 %v706_v34, %v698_v63  ;;  %v696_v47 = vmul.f32 %v7046_v25, %v6864_v41  ;;  %v697_v44 = vmul.f32 %v7046_v25, %v6862_v40  ;;  %v704_v49 = vmul.f32 %v7051_v43, %v6907_v60 }
  0xb1   :  { %v563_v55 = vadd.f32 %v559_v30, %v6955_v36  ;;  %v566_v48 = vmax.f32 %v562_v35, 0.0  ;;  %v711_v18 = vadd.f32 %v707_v38, %v699_v3  ;;  %1974 = vmatpush1.bf16.msra.mxu0 %v6244_v31  ;;  %v5700_v37 = vpack.c.bf16 %v569_v46, %v568_v12 }
  0xb2   :  { %v714_v52 = vadd.f32 %v710_v32, %v6941_v29  ;;  %v705_v56 = vmul.f32 %v7051_v43, %v6905_v59  ;;  %v648_v53 = vmul.f32 %v7081_v39, %v6791_v6  ;;  %1975 = vmatprep.subr.bf16.mxu0 %v9178_v2  ;;  %v708_v58 = vadd.f32 %v704_v49, %v696_v47  ;;  %v7132_v47 = vld [vmem:[%s9173_s0 + $0xd] ss:$0 sm:$0xff] }
  0xb3   :  { %v567_v45 = vmax.f32 %v563_v55, 0.0  ;;  %v715_v7 = vadd.f32 %v711_v18, %v6939_v28  ;;  %v649_v61 = vmul.f32 %v7081_v39, %v6833_v23  ;;  %5898 = vst [vmem:[#allocation2 + $0x88] sm:$0xff] %v5700_v37   ;;  %v656_v42 = vmul.f32 %v7046_v25, %v6789_v5 }
  0xb4   :  { %v718_v57 = vmax.f32 %v714_v52, 0.0  ;;  %v709_v24 = vadd.f32 %v705_v56, %v697_v44  ;;  %v657_v54 = vmul.f32 %v7046_v25, %v6831_v22  ;;  %v712_v9 = vadd.f32 %v708_v58, %v6957_v51  ;;  %v6247_v44 = vld [vmem:[#allocation2 + $0x48] sm:$0xff]  }
  0xb5   :  { %v5695_v62 = vpack.c.bf16 %v567_v45, %v566_v48  ;;  %v719_v4 = vmax.f32 %v715_v7, 0.0  ;;  %v646_v10 = vmul.f32 %v7081_v39, %v6864_v41  ;;  %1976 = vmatpush1.bf16.msra.mxu0 %v6245_v50  ;;  %v660_v14 = vadd.f32 %v656_v42, %v648_v53  ;;  %v6248_v42 = vld [vmem:[#allocation2 + $0x40] sm:$0xff]  }
  0xb6   :  { %v713_v11 = vadd.f32 %v709_v24, %v6955_v36  ;;  %v661_v15 = vadd.f32 %v657_v54, %v649_v61  ;;  %v647_v16 = vmul.f32 %v7081_v39, %v6862_v40  ;;  %1977 = vmatprep.subr.bf16.mxu0 %v9178_v2  ;;  %v716_v20 = vmax.f32 %v712_v9, 0.0  ;;  %v7149_v61 = vld [vmem:[%s9173_s0 + $0xf] ss:$0 sm:$0xff] }
  0xb7   :  { %5897 = vst [vmem:[#allocation2 + $0x80] sm:$0xff] %v5695_v62   ;;  %v5730_v17 = vpack.c.bf16 %v719_v4, %v718_v57  ;;  %v654_v1 = vmul.f32 %v7046_v25, %v6907_v60  ;;  %v655_v21 = vmul.f32 %v7046_v25, %v6905_v59  ;;  %v664_v26 = vadd.f32 %v660_v14, %v6941_v29 }
  0xb8   :  { %v717_v33 = vmax.f32 %v713_v11, 0.0  ;;  %v665_v27 = vadd.f32 %v661_v15, %v6939_v28  ;;  %v598_v63 = vmul.f32 %v7032_v19, %v6791_v6  ;;  %v599_v3 = vmul.f32 %v7032_v19, %v6833_v23 }
  0xb9   :  { %5904 = vst [vmem:[#allocation2 + $0xb8] sm:$0xff] %v5730_v17   ;;  %v658_v8 = vadd.f32 %v654_v1, %v646_v10  ;;  %v659_v13 = vadd.f32 %v655_v21, %v647_v16  ;;  %v606_v34 = vmul.f32 %v7081_v39, %v6789_v5  ;;  %1978 = vmatpush1.bf16.msra.mxu0 %v6246_v0  ;;  %v668_v12 = vmax.f32 %v664_v26, 0.0  ;;  %v6251_v10 = vld [vmem:[%s9174_s1] ss:$8 sps:$4 sm:$0xff]   ;;  %v7170_v17 = vld [vmem:[%s9173_s0 + $0x10] ss:$0 sm:$0xff] }
  0xba   :  { %v5725_v25 = vpack.c.bf16 %v717_v33, %v716_v20  ;;  %v669_v30 = vmax.f32 %v665_v27, 0.0  ;;  %v607_v35 = vmul.f32 %v7081_v39, %v6831_v22  ;;  %1991 = vmatprep.subr.bf16.mxu0 %v9178_v2  ;;  %v596_v32 = vmul.f32 %v7032_v19, %v6864_v41  ;;  %v6254_v20 = vld [vmem:[%s9174_s1 + $0x14] ss:$8 sps:$4 sm:$0xff]  }
  0xbb   :  { %v662_v38 = vadd.f32 %v658_v8, %v6957_v51  ;;  %v663_v31 = vadd.f32 %v659_v13, %v6955_v36  ;;  %v610_v46 = vadd.f32 %v606_v34, %v598_v63  ;;  %v597_v18 = vmul.f32 %v7032_v19, %v6862_v40  ;;  %v6252_v8 = vld [vmem:[#allocation2 + $0x78] sm:$0xff]  }
  0xbc   :  { %5903 = vst [vmem:[#allocation2 + $0xb0] sm:$0xff] %v5725_v25   ;;  %v5720_v55 = vpack.c.bf16 %v669_v30, %v668_v12  ;;  %v611_v48 = vadd.f32 %v607_v35, %v599_v3  ;;  %v604_v49 = vmul.f32 %v7081_v39, %v6907_v60  ;;  %v605_v53 = vmul.f32 %v7081_v39, %v6905_v59 }
  0xbd   :  { %v666_v37 = vmax.f32 %v662_v38, 0.0  ;;  %v667_v52 = vmax.f32 %v663_v31, 0.0  ;;  %v614_v56 = vadd.f32 %v610_v46, %v6941_v29  ;;  %1992 = vmatpush2.bf16.msra.mxu0 %v6247_v44  ;;  %v748_v58 = vmul.f32 %v7051_v43, %v6791_v6 }
  0xbe   :  { %5902 = vst [vmem:[#allocation2 + $0xa8] sm:$0xff] %v5720_v55   ;;  %v615_v45 = vadd.f32 %v611_v48, %v6939_v28  ;;  %v608_v7 = vadd.f32 %v604_v49, %v596_v32  ;;  %v749_v19 = vmul.f32 %v7051_v43, %v6833_v23  ;;  %1993 = vmatprep.subr.bf16.mxu0 %v9178_v2  ;;  %v7196_v55 = vld [vmem:[%s9173_s0 + $0xe] ss:$0 sm:$0xff] }
  0xbf   :  { %v5715_v50 = vpack.c.bf16 %v667_v52, %v666_v37  ;;  %v618_v39 = vmax.f32 %v614_v56, 0.0  ;;  %v609_v57 = vadd.f32 %v605_v53, %v597_v18  ;;  %v756_v24 = vmul.f32 %v7132_v47, %v6789_v5  ;;  %v6253_v52 = vld [vmem:[#allocation2 + $0x70] sm:$0xff]  }
  0xc0   :  { %v619_v54 = vmax.f32 %v615_v45, 0.0  ;;  %v612_v62 = vadd.f32 %v608_v7, %v6957_v51  ;;  %v757_v4 = vmul.f32 %v7132_v47, %v6831_v22  ;;  %v746_v9 = vmul.f32 %v7051_v43, %v6864_v41 }
  0xc1   :  { %5901 = vst [vmem:[#allocation2 + $0xa0] sm:$0xff] %v5715_v50   ;;  %v613_v11 = vadd.f32 %v609_v57, %v6955_v36  ;;  %v760_v14 = vadd.f32 %v756_v24, %v748_v58  ;;  %v747_v15 = vmul.f32 %v7051_v43, %v6862_v40  ;;  %v754_v16 = vmul.f32 %v7132_v47, %v6907_v60  ;;  %v6256_v58 = vld [vmem:[%s9174_s1 + $0x10] ss:$8 sps:$4 sm:$0xff]   ;;  %v6259_v24 = vld [vmem:[%s9174_s1 + $0x24] ss:$8 sps:$4 sm:$0xff]  }
  0xc2   :  { %1994 = vmatpush2.bf16.msra.mxu0 %v6248_v42  ;;  %v5710_v1 = vpack.c.bf16 %v619_v54, %v618_v39  ;;  %v616_v21 = vmax.f32 %v612_v62, 0.0  ;;  %v761_v0 = vadd.f32 %v757_v4, %v749_v19  ;;  %v755_v33 = vmul.f32 %v7132_v47, %v6905_v59 }
  0xc3   :  { %2389 = vmatprep.subr.bf16.mxu0 %v9178_v2  ;;  %v617_v43 = vmax.f32 %v613_v11, 0.0  ;;  %v764_v26 = vadd.f32 %v760_v14, %v6941_v29  ;;  %v758_v27 = vadd.f32 %v754_v16, %v746_v9  ;;  %v898_v63 = vmul.f32 %v7149_v61, %v6791_v6 }
  0xc4   :  { %5900 = vst [vmem:[#allocation2 + $0x98] sm:$0xff] %v5710_v1   ;;  %v765_v13 = vadd.f32 %v761_v0, %v6939_v28  ;;  %v759_v3 = vadd.f32 %v755_v33, %v747_v15  ;;  %v899_v34 = vmul.f32 %v7149_v61, %v6833_v23  ;;  %v906_v25 = vmul.f32 %v7170_v17, %v6789_v5  ;;  %v6257_v15 = vld [vmem:[#allocation2 + $0x68] sm:$0xff]  }
  0xc5   :  { %1996 = vmatmul.mubr.bf16.vlgmr.msra.gmra.mxu0 %v6251_v10  ;;  %v5705_v12 = vpack.c.bf16 %v617_v43, %v616_v21  ;;  %v768_v30 = vmax.f32 %v764_v26, 0.0  ;;  %v762_v35 = vadd.f32 %v758_v27, %v6957_v51  ;;  %v907_v38 = vmul.f32 %v7170_v17, %v6831_v22 }
  0xc6   :  { %2390 = vmatpush1.bf16.msra.mxu0 %v6252_v8  ;;  %5228 = vmatprep.mubr.msk.bf16.mxu0 %vm1914_vm0, %v6254_v20  ;;  %v769_v31 = vmax.f32 %v765_v13, 0.0  ;;  %v763_v46 = vadd.f32 %v759_v3, %v6955_v36  ;;  %v910_v32 = vadd.f32 %v906_v25, %v898_v63  ;;  %v896_v44 = vmul.f32 %v7149_v61, %v6864_v41 }
  0xc7   :  { %2391 = vmatprep.subr.bf16.mxu0 %v9178_v2  ;;  %5899 = vst [vmem:[#allocation2 + $0x90] sm:$0xff] %v5705_v12   ;;  %v766_v48 = vmax.f32 %v762_v35, 0.0  ;;  %v911_v18 = vadd.f32 %v907_v38, %v899_v34  ;;  %v897_v49 = vmul.f32 %v7149_v61, %v6862_v40  ;;  %v904_v37 = vmul.f32 %v7170_v17, %v6907_v60  ;;  %v6258_v12 = vld [vmem:[#allocation2 + $0x60] sm:$0xff]   ;;  %v7250_v35 = vld [vmem:[%s9174_s1 + $0x34] ss:$8 sps:$4 sm:$0xff]  }
  0xc8   :  { %v5740_v56 = vpack.c.bf16 %v769_v31, %v768_v30  ;;  %v767_v53 = vmax.f32 %v763_v46, 0.0  ;;  %v914_v45 = vadd.f32 %v910_v32, %v6941_v29  ;;  %v905_v7 = vmul.f32 %v7170_v17, %v6905_v59  ;;  %v7245_v30 = vld [vmem:[%s9174_s1 + $0x20] ss:$8 sps:$4 sm:$0xff]  }
  0xc9   :  { %v915_v19 = vadd.f32 %v911_v18, %v6939_v28  ;;  %v908_v50 = vadd.f32 %v904_v37, %v896_v44  ;;  %v848_v39 = vmul.f32 %v7196_v55, %v6791_v6  ;;  %v849_v57 = vmul.f32 %v7196_v55, %v6833_v23  ;;  %v7258_v44 = vld [vmem:[%s9173_s0 + $0x11] ss:$0 sm:$0xff] }
  0xca   :  { %2392 = vmatpush1.bf16.msra.mxu0 %v6253_v52  ;;  %5906 = vst [vmem:[#allocation2 + $0xc8] sm:$0xff] %v5740_v56   ;;  %v5735_v42 = vpack.c.bf16 %v767_v53, %v766_v48  ;;  %v918_v54 = vmax.f32 %v914_v45, 0.0  ;;  %v909_v62 = vadd.f32 %v905_v7, %v897_v49  ;;  %v856_v4 = vmul.f32 %v7149_v61, %v6789_v5 }
  0xcb   :  { %2393 = vmatprep.subr.bf16.mxu0 %v9178_v2  ;;  %v919_v9 = vmax.f32 %v915_v19, 0.0  ;;  %v912_v10 = vadd.f32 %v908_v50, %v6957_v51  ;;  %v857_v11 = vmul.f32 %v7149_v61, %v6831_v22  ;;  %v846_v14 = vmul.f32 %v7196_v55, %v6864_v41 }
  0xcc   :  { %5905 = vst [vmem:[#allocation2 + $0xc0] sm:$0xff] %v5735_v42   ;;  %v913_v16 = vadd.f32 %v909_v62, %v6955_v36  ;;  %v860_v20 = vadd.f32 %v856_v4, %v848_v39  ;;  %v847_v1 = vmul.f32 %v7196_v55, %v6862_v40  ;;  %v854_v21 = vmul.f32 %v7149_v61, %v6907_v60  ;;  %v6262_v39 = vld [vmem:[#allocation2 + $0x58] sm:$0xff]  }
  0xcd   :  { %2004 = vmatmul.mubr.bf16.gmra.mxu0 %v6256_v58  ;;  %v5770_v0 = vpack.c.bf16 %v919_v9, %v918_v54  ;;  %v916_v33 = vmax.f32 %v912_v10, 0.0  ;;  %v861_v43 = vadd.f32 %v857_v11, %v849_v57  ;;  %v855_v26 = vmul.f32 %v7149_v61, %v6905_v59 }
  0xce   :  { %2394 = vmatpush1.bf16.msra.mxu0 %v6257_v15  ;;  %5229 = vmatprep.mubr.msk.bf16.mxu0 %vm1914_vm0, %v6259_v24  ;;  %v917_v27 = vmax.f32 %v913_v16, 0.0  ;;  %v864_v63 = vadd.f32 %v860_v20, %v6941_v29  ;;  %v858_v8 = vadd.f32 %v854_v21, %v846_v14  ;;  %v798_v13 = vmul.f32 %v7132_v47, %v6791_v6 }
  0xcf   :  { %2395 = vmatprep.subr.bf16.mxu0 %v9178_v2  ;;  %5912 = vst [vmem:[#allocation2 + $0xf8] sm:$0xff] %v5770_v0   ;;  %v865_v3 = vadd.f32 %v861_v43, %v6939_v28  ;;  %v859_v34 = vadd.f32 %v855_v26, %v847_v1  ;;  %v799_v25 = vmul.f32 %v7132_v47, %v6833_v23  ;;  %v7300_v0 = vld [vmem:[%s9173_s0 + $0x14] ss:$0 sm:$0xff]  ;;  %v7305_v43 = vld [vmem:[%s9174_s1 + $0x30] ss:$8 sps:$4 sm:$0xff]  }
  0xd0   :  { %v806_v61 = vmul.f32 %v7196_v55, %v6789_v5  ;;  %v5765_v38 = vpack.c.bf16 %v917_v27, %v916_v33  ;;  %v868_v31 = vmax.f32 %v864_v63, 0.0  ;;  %v862_v46 = vadd.f32 %v858_v8, %v6957_v51  ;;  %v6263_v33 = vld [vmem:[#allocation2 + $0x50] sm:$0xff]  }
  0xd1   :  { %v807_v32 = vmul.f32 %v7196_v55, %v6831_v22  ;;  %v869_v48 = vmax.f32 %v865_v3, 0.0  ;;  %v863_v18 = vadd.f32 %v859_v34, %v6955_v36  ;;  %v796_v37 = vmul.f32 %v7132_v47, %v6864_v41 }
  0xd2   :  { %v810_v49 = vadd.f32 %v806_v61, %v798_v13  ;;  %2396 = vmatpush1.bf16.msra.mxu0 %v6258_v12  ;;  %5911 = vst [vmem:[#allocation2 + $0xf0] sm:$0xff] %v5765_v38   ;;  %v866_v52 = vmax.f32 %v862_v46, 0.0  ;;  %v797_v53 = vmul.f32 %v7132_v47, %v6862_v40  ;;  %v804_v45 = vmul.f32 %v7196_v55, %v6907_v60 }
  0xd3   :  { %v811_v56 = vadd.f32 %v807_v32, %v799_v25  ;;  %2397 = vmatprep.subr.bf16.mxu0 %v9178_v2  ;;  %v5760_v7 = vpack.c.bf16 %v869_v48, %v868_v31  ;;  %v867_v58 = vmax.f32 %v863_v18, 0.0  ;;  %v805_v50 = vmul.f32 %v7196_v55, %v6905_v59  ;;  %v7282_v55 = vld [vmem:[%s9173_s0 + $0x13] ss:$0 sm:$0xff]  ;;  %v7315_v25 = vld [vmem:[%s9174_s1 + $0x44] ss:$8 sps:$4 sm:$0xff]  }
  0xd4   :  { %v814_v19 = vadd.f32 %v810_v49, %v6941_v29  ;;  %v808_v24 = vadd.f32 %v804_v45, %v796_v37  ;;  %v948_v42 = vmul.f32 %v7170_v17, %v6791_v6  ;;  %v949_v47 = vmul.f32 %v7170_v17, %v6833_v23  ;;  %v7329_v49 = vld [vmem:[%s9173_s0 + $0x12] ss:$0 sm:$0xff]  ;;  %v6267_v37 = vld [vmem:[#allocation2 + $0x48] sm:$0xff]  }
  0xd5   :  { %v815_v57 = vadd.f32 %v811_v56, %v6939_v28  ;;  %2012 = vmatmul.mubr.bf16.gmra.mxu0 %v7245_v30  ;;  %5910 = vst [vmem:[#allocation2 + $0xe8] sm:$0xff] %v5760_v7   ;;  %v5755_v54 = vpack.c.bf16 %v867_v58, %v866_v52  ;;  %v809_v4 = vadd.f32 %v805_v50, %v797_v53 }
  0xd6   :  { %v818_v62 = vmax.f32 %v814_v19, 0.0  ;;  %v956_v9 = vmul.f32 %v7258_v44, %v6789_v5  ;;  %2398 = vmatpush1.bf16.msra.mxu0 %v6262_v39  ;;  %5230 = vmatprep.mubr.msk.bf16.mxu0 %vm1914_vm0, %v7250_v35  ;;  %v812_v11 = vadd.f32 %v808_v24, %v6957_v51  ;;  %v957_v14 = vmul.f32 %v7258_v44, %v6831_v22 }
  0xd7   :  { %v819_v10 = vmax.f32 %v815_v57, 0.0  ;;  %v946_v15 = vmul.f32 %v7170_v17, %v6864_v41  ;;  %2399 = vmatprep.subr.bf16.mxu0 %v9178_v2  ;;  %5909 = vst [vmem:[#allocation2 + $0xe0] sm:$0xff] %v5755_v54   ;;  %v813_v16 = vadd.f32 %v809_v4, %v6955_v36  ;;  %v947_v1 = vmul.f32 %v7170_v17, %v6862_v40 }
  0xd8   :  { %v960_v20 = vadd.f32 %v956_v9, %v948_v42  ;;  %v954_v21 = vmul.f32 %v7258_v44, %v6907_v60  ;;  %v816_v27 = vmax.f32 %v812_v11, 0.0  ;;  %v961_v63 = vadd.f32 %v957_v14, %v949_v47  ;;  %v6268_v9 = vld [vmem:[#allocation2 + $0x40] sm:$0xff]  }
  0xd9   :  { %v5750_v26 = vpack.c.bf16 %v819_v10, %v818_v62  ;;  %v955_v17 = vmul.f32 %v7258_v44, %v6905_v59  ;;  %v817_v8 = vmax.f32 %v813_v16, 0.0  ;;  %v1098_v34 = vmul.f32 %v7282_v55, %v6791_v6  ;;  %v7353_v10 = vld [vmem:[%s9174_s1 + $0x40] ss:$8 sps:$4 sm:$0xff]  }
  0xda   :  { %v964_v13 = vadd.f32 %v960_v20, %v6941_v29  ;;  %v958_v3 = vadd.f32 %v954_v21, %v946_v15  ;;  %2400 = vmatpush1.bf16.msra.mxu0 %v6263_v33  ;;  %v965_v61 = vadd.f32 %v961_v63, %v6939_v28  ;;  %v1099_v38 = vmul.f32 %v7282_v55, %v6833_v23 }
  0xdb   :  { %5908 = vst [vmem:[#allocation2 + $0xd8] sm:$0xff] %v5750_v26   ;;  %v959_v12 = vadd.f32 %v955_v17, %v947_v1  ;;  %v1106_v31 = vmul.f32 %v7300_v0, %v6789_v5  ;;  %2401 = vmatprep.subr.bf16.mxu0 %v9178_v2  ;;  %v5745_v46 = vpack.c.bf16 %v817_v8, %v816_v27  ;;  %v7365_v26 = vld [vmem:[%s9174_s1 + $0x54] ss:$8 sps:$4 sm:$0xff]  }
  0xdc   :  { %v968_v32 = vmax.f32 %v964_v13, 0.0  ;;  %v962_v48 = vadd.f32 %v958_v3, %v6957_v51  ;;  %v1107_v18 = vmul.f32 %v7300_v0, %v6831_v22  ;;  %v969_v52 = vmax.f32 %v965_v61, 0.0 }
  0xdd   :  { %v963_v56 = vadd.f32 %v959_v12, %v6955_v36  ;;  %v1110_v53 = vadd.f32 %v1106_v31, %v1098_v34  ;;  %v1096_v45 = vmul.f32 %v7282_v55, %v6864_v41  ;;  %2020 = vmatmul.mubr.bf16.gmra.mxu0 %v7305_v43  ;;  %5907 = vst [vmem:[#allocation2 + $0xd0] sm:$0xff] %v5745_v46   ;;  %v6272_v12 = vld [vmem:[#allocation2 + $0x88] sm:$0xff]  }
  0xde   :  { %v966_v7 = vmax.f32 %v962_v48, 0.0  ;;  %v1111_v58 = vadd.f32 %v1107_v18, %v1099_v38  ;;  %v1097_v19 = vmul.f32 %v7282_v55, %v6862_v40  ;;  %v1104_v50 = vmul.f32 %v7300_v0, %v6907_v60  ;;  %2402 = vmatpush1.bf16.msra.mxu0 %v6267_v37  ;;  %5231 = vmatprep.mubr.msk.bf16.mxu0 %vm1914_vm0, %v7315_v25 }
  0xdf   :  { %v5780_v39 = vpack.c.bf16 %v969_v52, %v968_v32  ;;  %v967_v57 = vmax.f32 %v963_v56, 0.0  ;;  %v1114_v24 = vadd.f32 %v1110_v53, %v6941_v29  ;;  %v1105_v42 = vmul.f32 %v7300_v0, %v6905_v59  ;;  %2403 = vmatprep.subr.bf16.mxu0 %v9178_v2 }
  0xe0   :  { %v1115_v47 = vadd.f32 %v1111_v58, %v6939_v28  ;;  %v1108_v54 = vadd.f32 %v1104_v50, %v1096_v45  ;;  %v1048_v62 = vmul.f32 %v7329_v49, %v6791_v6  ;;  %v1049_v4 = vmul.f32 %v7329_v49, %v6833_v23  ;;  %v7396_v58 = vld [vmem:[%s9174_s1 + $0x50] ss:$8 sps:$4 sm:$0xff]  }
  0xe1   :  { %5914 = vst [vmem:[#allocation2 + $0x108] sm:$0xff] %v5780_v39   ;;  %v5775_v11 = vpack.c.bf16 %v967_v57, %v966_v7  ;;  %v1118_v14 = vmax.f32 %v1114_v24, 0.0  ;;  %v1109_v15 = vadd.f32 %v1105_v42, %v1097_v19  ;;  %v1056_v16 = vmul.f32 %v7282_v55, %v6789_v5  ;;  %v5144_v7 = vld [vmem:[%s9173_s0 + $0x15] ss:$0 sm:$0xff]  ;;  %v6273_v24 = vld [vmem:[#allocation2 + $0x80] sm:$0xff]  }
  0xe2   :  { %v1119_v20 = vmax.f32 %v1115_v47, 0.0  ;;  %v1112_v1 = vadd.f32 %v1108_v54, %v6957_v51  ;;  %v1057_v21 = vmul.f32 %v7282_v55, %v6831_v22  ;;  %v1046_v33 = vmul.f32 %v7329_v49, %v6864_v41  ;;  %2404 = vmatpush1.bf16.msra.mxu0 %v6268_v9 }
  0xe3   :  { %5913 = vst [vmem:[#allocation2 + $0x100] sm:$0xff] %v5775_v11   ;;  %v1113_v27 = vadd.f32 %v1109_v15, %v6955_v36  ;;  %v1060_v63 = vadd.f32 %v1056_v16, %v1048_v62  ;;  %v1047_v17 = vmul.f32 %v7329_v49, %v6862_v40  ;;  %v1054_v8 = vmul.f32 %v7282_v55, %v6907_v60  ;;  %v6277_v15 = vld [vmem:[%s9174_s1 + $0x64] ss:$8 sps:$4 sm:$0xff]  }
  0xe4   :  { %2417 = vmatprep.subr.bf16.mxu0 %v9178_v2  ;;  %v5810_v13 = vpack.c.bf16 %v1119_v20, %v1118_v14  ;;  %v1116_v3 = vmax.f32 %v1112_v1, 0.0  ;;  %v1061_v34 = vadd.f32 %v1057_v21, %v1049_v4  ;;  %v1055_v61 = vmul.f32 %v7282_v55, %v6905_v59 }
  0xe5   :  { %v1117_v38 = vmax.f32 %v1113_v27, 0.0  ;;  %v1064_v31 = vadd.f32 %v1060_v63, %v6941_v29  ;;  %v1058_v46 = vadd.f32 %v1054_v8, %v1046_v33  ;;  %v998_v32 = vmul.f32 %v7258_v44, %v6791_v6  ;;  %2028 = vmatmul.mubr.bf16.gmra.mxu0 %v7353_v10  ;;  %v7420_v63 = vld [vmem:[%s9173_s0 + $0x17] ss:$0 sm:$0xff] }
  0xe6   :  { %5920 = vst [vmem:[#allocation2 + $0x138] sm:$0xff] %v5810_v13   ;;  %v1065_v48 = vadd.f32 %v1061_v34, %v6939_v28  ;;  %v1059_v18 = vadd.f32 %v1055_v61, %v1047_v17  ;;  %v999_v37 = vmul.f32 %v7258_v44, %v6833_v23  ;;  %v1006_v55 = vmul.f32 %v7329_v49, %v6789_v5 }
  0xe7   :  { %2418 = vmatpush2.bf16.msra.mxu0 %v6272_v12  ;;  %5232 = vmatprep.mubr.msk.bf16.mxu0 %vm1914_vm0, %v7365_v26  ;;  %v5805_v52 = vpack.c.bf16 %v1117_v38, %v1116_v3  ;;  %v1068_v56 = vmax.f32 %v1064_v31, 0.0  ;;  %v1062_v53 = vadd.f32 %v1058_v46, %v6957_v51  ;;  %v1007_v45 = vmul.f32 %v7329_v49, %v6831_v22  ;;  %v7434_v31 = vld [vmem:[%s9173_s0 + $0x18] ss:$0 sm:$0xff] }
  0xe8   :  { %2419 = vmatprep.subr.bf16.mxu0 %v9178_v2  ;;  %v1069_v19 = vmax.f32 %v1065_v48, 0.0  ;;  %v1063_v50 = vadd.f32 %v1059_v18, %v6955_v36  ;;  %v1010_v39 = vadd.f32 %v1006_v55, %v998_v32  ;;  %v996_v57 = vmul.f32 %v7258_v44, %v6864_v41 }
  0xe9   :  { %5919 = vst [vmem:[#allocation2 + $0x130] sm:$0xff] %v5805_v52   ;;  %v1066_v42 = vmax.f32 %v1062_v53, 0.0  ;;  %v1011_v47 = vadd.f32 %v1007_v45, %v999_v37  ;;  %v997_v54 = vmul.f32 %v7258_v44, %v6862_v40  ;;  %v1004_v62 = vmul.f32 %v7329_v49, %v6907_v60 }
  0xea   :  { %v5800_v4 = vpack.c.bf16 %v1069_v19, %v1068_v56  ;;  %v1067_v9 = vmax.f32 %v1063_v50, 0.0  ;;  %v1014_v11 = vadd.f32 %v1010_v39, %v6941_v29  ;;  %v1005_v14 = vmul.f32 %v7329_v49, %v6905_v59  ;;  %v6279_v50 = vld [vmem:[%s9174_s1 + $0x60] ss:$8 sps:$4 sm:$0xff]   ;;  %v6280_v39 = vld [vmem:[%s9174_s1 + $0x74] ss:$8 sps:$4 sm:$0xff]  }
  0xeb   :  { %2420 = vmatpush2.bf16.msra.mxu0 %v6273_v24  ;;  %v1015_v16 = vadd.f32 %v1011_v47, %v6939_v28  ;;  %v1008_v20 = vadd.f32 %v1004_v62, %v996_v57  ;;  %v1148_v44 = vmul.f32 %v7300_v0, %v6791_v6  ;;  %v1149_v1 = vmul.f32 %v7300_v0, %v6833_v23 }
  0xec   :  { %5918 = vst [vmem:[#allocation2 + $0x128] sm:$0xff] %v5800_v4   ;;  %v5795_v21 = vpack.c.bf16 %v1067_v9, %v1066_v42  ;;  %v1018_v33 = vmax.f32 %v1014_v11, 0.0  ;;  %v1009_v27 = vadd.f32 %v1005_v14, %v997_v54  ;;  %v1156_v49 = vmul.f32 %v5144_v7, %v6789_v5 }
  0xed   :  { %v1019_v17 = vmax.f32 %v1015_v16, 0.0  ;;  %v1012_v8 = vadd.f32 %v1008_v20, %v6957_v51  ;;  %v1157_v13 = vmul.f32 %v5144_v7, %v6831_v22  ;;  %v1146_v3 = vmul.f32 %v7300_v0, %v6864_v41  ;;  %2036 = vmatmul.mubr.bf16.gmra.mxu0 %v7396_v58 }
  0xee   :  { %5917 = vst [vmem:[#allocation2 + $0x120] sm:$0xff] %v5795_v21   ;;  %v1013_v34 = vadd.f32 %v1009_v27, %v6955_v36  ;;  %v1160_v61 = vadd.f32 %v1156_v49, %v1148_v44  ;;  %v1147_v12 = vmul.f32 %v7300_v0, %v6862_v40  ;;  %v1154_v38 = vmul.f32 %v5144_v7, %v6907_v60 }
  0xef   :  { %5233 = vmatprep.mubr.msk.bf16.mxu0 %vm1914_vm0, %v6277_v15  ;;  %v5790_v46 = vpack.c.bf16 %v1019_v17, %v1018_v33  ;;  %v1016_v32 = vmax.f32 %v1012_v8, 0.0  ;;  %v1161_v48 = vadd.f32 %v1157_v13, %v1149_v1  ;;  %v1155_v18 = vmul.f32 %v5144_v7, %v6905_v59  ;;  %v7449_v7 = vld [vmem:[%s9173_s0 + $0x16] ss:$0 sm:$0xff] }
  0xf0   :  { %v1017_v37 = vmax.f32 %v1013_v34, 0.0  ;;  %v1164_v55 = vadd.f32 %v1160_v61, %v6941_v29  ;;  %v1158_v52 = vadd.f32 %v1154_v38, %v1146_v3  ;;  %v1298_v0 = vmul.f32 %v7420_v63, %v6791_v6  ;;  %v5149_v61 = vld [vmem:[%s9173_s0 + $0x15] ss:$0 sm:$0xff] }
  0xf1   :  { %5916 = vst [vmem:[#allocation2 + $0x118] sm:$0xff] %v5790_v46   ;;  %v1165_v56 = vadd.f32 %v1161_v48, %v6939_v28  ;;  %v1159_v53 = vadd.f32 %v1155_v18, %v1147_v12  ;;  %v1299_v45 = vmul.f32 %v7420_v63, %v6833_v23  ;;  %v1306_v19 = vmul.f32 %v7434_v31, %v6789_v5 }
  0xf2   :  { %v5785_v57 = vpack.c.bf16 %v1017_v37, %v1016_v32  ;;  %v1168_v24 = vmax.f32 %v1164_v55, 0.0  ;;  %v1162_v42 = vadd.f32 %v1158_v52, %v6957_v51  ;;  %v1307_v47 = vmul.f32 %v7434_v31, %v6831_v22  ;;  %v7494_v52 = vld [vmem:[%s9174_s1 + $0x70] ss:$8 sps:$4 sm:$0xff]  }
  0xf3   :  { %v1169_v54 = vmax.f32 %v1165_v56, 0.0  ;;  %v1163_v62 = vadd.f32 %v1159_v53, %v6955_v36  ;;  %v1310_v4 = vadd.f32 %v1306_v19, %v1298_v0  ;;  %v1296_v9 = vmul.f32 %v7420_v63, %v6864_v41  ;;  %v7499_v0 = vld [vmem:[%s9174_s1 + $0x84] ss:$8 sps:$4 sm:$0xff]  }
  0xf4   :  { %5915 = vst [vmem:[#allocation2 + $0x110] sm:$0xff] %v5785_v57   ;;  %v1166_v11 = vmax.f32 %v1162_v42, 0.0  ;;  %v1311_v14 = vadd.f32 %v1307_v47, %v1299_v45  ;;  %v1297_v15 = vmul.f32 %v7420_v63, %v6862_v40  ;;  %v1304_v16 = vmul.f32 %v7434_v31, %v6907_v60 }
  0xf5   :  { %v5820_v20 = vpack.c.bf16 %v1169_v54, %v1168_v24  ;;  %v1167_v44 = vmax.f32 %v1163_v62, 0.0  ;;  %v1314_v1 = vadd.f32 %v1310_v4, %v6941_v29  ;;  %v1305_v21 = vmul.f32 %v7434_v31, %v6905_v59  ;;  %2044 = vmatmul.mubr.bf16.gmra.mxu0 %v6279_v50 }
  0xf6   :  { %v1315_v33 = vadd.f32 %v1311_v14, %v6939_v28  ;;  %v1308_v27 = vadd.f32 %v1304_v16, %v1296_v9  ;;  %v1248_v49 = vmul.f32 %v7449_v7, %v6791_v6  ;;  %v1249_v17 = vmul.f32 %v7449_v7, %v6833_v23  ;;  %5234 = vmatprep.mubr.msk.bf16.mxu0 %vm1914_vm0, %v6280_v39  ;;  %v7515_v14 = vld [vmem:[%s9173_s0 + $0x19] ss:$0 sm:$0xff] }
  0xf7   :  { %5922 = vst [vmem:[#allocation2 + $0x148] sm:$0xff] %v5820_v20   ;;  %v5815_v8 = vpack.c.bf16 %v1167_v44, %v1166_v11  ;;  %v1318_v13 = vmax.f32 %v1314_v1, 0.0  ;;  %v1309_v3 = vadd.f32 %v1305_v21, %v1297_v15  ;;  %v1256_v34 = vmul.f32 %v7420_v63, %v6789_v5 }
  0xf8   :  { %v1319_v12 = vmax.f32 %v1315_v33, 0.0  ;;  %v1312_v38 = vadd.f32 %v1308_v27, %v6957_v51  ;;  %v1257_v46 = vmul.f32 %v7420_v63, %v6831_v22  ;;  %v1246_v32 = vmul.f32 %v7449_v7, %v6864_v41 }
  0xf9   :  { %5921 = vst [vmem:[#allocation2 + $0x140] sm:$0xff] %v5815_v8   ;;  %v1313_v48 = vadd.f32 %v1309_v3, %v6955_v36  ;;  %v1260_v18 = vadd.f32 %v1256_v34, %v1248_v49  ;;  %v1247_v37 = vmul.f32 %v7449_v7, %v6862_v40  ;;  %v1254_v55 = vmul.f32 %v7420_v63, %v6907_v60 }
  0xfa   :  { %v5850_v56 = vpack.c.bf16 %v1319_v12, %v1318_v13  ;;  %v1316_v53 = vmax.f32 %v1312_v38, 0.0  ;;  %v1261_v45 = vadd.f32 %v1257_v46, %v1249_v17  ;;  %v1255_v19 = vmul.f32 %v7420_v63, %v6905_v59  ;;  %v7541_v46 = vld [vmem:[%s9174_s1 + $0x94] ss:$8 sps:$4 sm:$0xff]  }
  0xfb   :  { %v1317_v50 = vmax.f32 %v1313_v48, 0.0  ;;  %v1264_v39 = vadd.f32 %v1260_v18, %v6941_v29  ;;  %v1258_v57 = vadd.f32 %v1254_v55, %v1246_v32  ;;  %v1198_v24 = vmul.f32 %v5149_v61, %v6791_v6 }
  0xfc   :  { %5928 = vst [vmem:[#allocation2 + $0x178] sm:$0xff] %v5850_v56   ;;  %v1265_v42 = vadd.f32 %v1261_v45, %v6939_v28  ;;  %v1259_v47 = vadd.f32 %v1255_v19, %v1247_v37  ;;  %v1199_v54 = vmul.f32 %v5149_v61, %v6833_v23  ;;  %v1206_v62 = vmul.f32 %v7449_v7, %v6789_v5 }
  0xfd   :  { %v5845_v4 = vpack.c.bf16 %v1317_v50, %v1316_v53  ;;  %v1268_v9 = vmax.f32 %v1264_v39, 0.0  ;;  %v1262_v11 = vadd.f32 %v1258_v57, %v6957_v51  ;;  %v1207_v63 = vmul.f32 %v7449_v7, %v6831_v22  ;;  %2052 = vmatmul.mubr.bf16.gmra.mxu0 %v7494_v52  ;;  %v5174_v57 = vld [vmem:[%s9173_s0 + $0x1a] ss:$0 sm:$0xff] }
  0xfe   :  { %v1269_v15 = vmax.f32 %v1265_v42, 0.0  ;;  %v1263_v16 = vadd.f32 %v1259_v47, %v6955_v36  ;;  %v1210_v20 = vadd.f32 %v1206_v62, %v1198_v24  ;;  %v1196_v44 = vmul.f32 %v5149_v61, %v6864_v41  ;;  %5235 = vmatprep.mubr.msk.bf16.mxu0 %vm1914_vm0, %v7499_v0 }
  0xff   :  { %5927 = vst [vmem:[#allocation2 + $0x170] sm:$0xff] %v5845_v4   ;;  %v1266_v1 = vmax.f32 %v1262_v11, 0.0  ;;  %v1211_v21 = vadd.f32 %v1207_v63, %v1199_v54  ;;  %v1197_v33 = vmul.f32 %v5149_v61, %v6862_v40  ;;  %v1204_v27 = vmul.f32 %v7449_v7, %v6907_v60  ;;  %v7536_v61 = vld [vmem:[%s9174_s1 + $0x80] ss:$8 sps:$4 sm:$0xff]  }
 0x100   :  { %v5840_v49 = vpack.c.bf16 %v1269_v15, %v1268_v9  ;;  %v1267_v17 = vmax.f32 %v1263_v16, 0.0  ;;  %v1214_v8 = vadd.f32 %v1210_v20, %v6941_v29  ;;  %v1205_v13 = vmul.f32 %v7449_v7, %v6905_v59  ;;  %v7573_v20 = vld [vmem:[%s9174_s1 + $0x90] ss:$8 sps:$4 sm:$0xff]  }
 0x101   :  { %v1215_v3 = vadd.f32 %v1211_v21, %v6939_v28  ;;  %v1208_v34 = vadd.f32 %v1204_v27, %v1196_v44  ;;  %v1348_v12 = vmul.f32 %v7434_v31, %v6791_v6  ;;  %v1349_v38 = vmul.f32 %v7434_v31, %v6833_v23  ;;  %9279 = vst [vmem:[#allocation7_spill] sm:$0xff] %v7573_v20  ;;  %v5180_v27 = vld [vmem:[%s9173_s0 + $0x1b] ss:$0 sm:$0xff] }
 0x102   :  { %5926 = vst [vmem:[#allocation2 + $0x168] sm:$0xff] %v5840_v49   ;;  %v5835_v7 = vpack.c.bf16 %v1267_v17, %v1266_v1  ;;  %v1218_v32 = vmax.f32 %v1214_v8, 0.0  ;;  %v1209_v48 = vadd.f32 %v1205_v13, %v1197_v33  ;;  %v1356_v18 = vmul.f32 %v7515_v14, %v6789_v5  ;;  %v7583_v49 = vld [vmem:[%s9174_s1 + $0xa4] ss:$8 sps:$4 sm:$0xff]  }
 0x103   :  { %v1219_v37 = vmax.f32 %v1215_v3, 0.0  ;;  %v1212_v55 = vadd.f32 %v1208_v34, %v6957_v51  ;;  %v1357_v56 = vmul.f32 %v7515_v14, %v6831_v22  ;;  %v1346_v53 = vmul.f32 %v7434_v31, %v6864_v41  ;;  %9280 = vst [vmem:[#allocation8_spill] sm:$0xff] %v7583_v49 }
 0x104   :  { %5925 = vst [vmem:[#allocation2 + $0x160] sm:$0xff] %v5835_v7   ;;  %v1213_v45 = vadd.f32 %v1209_v48, %v6955_v36  ;;  %v1360_v19 = vadd.f32 %v1356_v18, %v1348_v12  ;;  %v1347_v50 = vmul.f32 %v7434_v31, %v6862_v40  ;;  %v1354_v39 = vmul.f32 %v7515_v14, %v6907_v60 }
 0x105   :  { %v5830_v24 = vpack.c.bf16 %v1219_v37, %v1218_v32  ;;  %v1216_v42 = vmax.f32 %v1212_v55, 0.0  ;;  %v1361_v47 = vadd.f32 %v1357_v56, %v1349_v38  ;;  %v1355_v54 = vmul.f32 %v7515_v14, %v6905_v59  ;;  %2060 = vmatmul.mubr.bf16.gmra.mxu0 %v7536_v61 }
 0x106   :  { %v1217_v62 = vmax.f32 %v1213_v45, 0.0  ;;  %v1364_v4 = vadd.f32 %v1360_v19, %v6941_v29  ;;  %v1358_v9 = vadd.f32 %v1354_v39, %v1346_v53  ;;  %v1398_v31 = vmul.f32 %v7515_v14, %v6791_v6  ;;  %5236 = vmatprep.mubr.msk.bf16.mxu0 %vm1914_vm0, %v7541_v46 }
 0x107   :  { %5924 = vst [vmem:[#allocation2 + $0x158] sm:$0xff] %v5830_v24   ;;  %v1365_v11 = vadd.f32 %v1361_v47, %v6939_v28  ;;  %v1359_v63 = vadd.f32 %v1355_v54, %v1347_v50  ;;  %v1399_v15 = vmul.f32 %v7515_v14, %v6833_v23  ;;  %v1406_v16 = vmul.f32 %v5174_v57, %v6789_v5 }
 0x108   :  { %v5825_v44 = vpack.c.bf16 %v1217_v62, %v1216_v42  ;;  %v1368_v1 = vmax.f32 %v1364_v4, 0.0  ;;  %v1362_v21 = vadd.f32 %v1358_v9, %v6957_v51  ;;  %v1407_v33 = vmul.f32 %v5174_v57, %v6831_v22 }
 0x109   :  { %v1369_v17 = vmax.f32 %v1365_v11, 0.0  ;;  %v1363_v8 = vadd.f32 %v1359_v63, %v6955_v36  ;;  %v1410_v13 = vadd.f32 %v1406_v16, %v1398_v31  ;;  %v1396_v3 = vmul.f32 %v7515_v14, %v6864_v41 }
 0x10a   :  { %5923 = vst [vmem:[#allocation2 + $0x150] sm:$0xff] %v5825_v44   ;;  %v1366_v34 = vmax.f32 %v1362_v21, 0.0  ;;  %v1411_v12 = vadd.f32 %v1407_v33, %v1399_v15  ;;  %v1397_v38 = vmul.f32 %v7515_v14, %v6862_v40  ;;  %v1404_v7 = vmul.f32 %v5174_v57, %v6907_v60  ;;  %v7611_v15 = vld [vmem:[%s9174_s1 + $0xa0] ss:$8 sps:$4 sm:$0xff]  }
 0x10b   :  { %v5860_v32 = vpack.c.bf16 %v1369_v17, %v1368_v1  ;;  %v1367_v48 = vmax.f32 %v1363_v8, 0.0  ;;  %v1414_v18 = vadd.f32 %v1410_v13, %v6941_v29  ;;  %v1405_v37 = vmul.f32 %v5174_v57, %v6905_v59  ;;  %9281 = vst [vmem:[#allocation9_spill] sm:$0xff] %v7611_v15  ;;  %v7627_v17 = vld [vmem:[%s9174_s1 + $0xb0] ss:$8 sps:$4 sm:$0xff]   ;;  %v7645_v8 = vld [vmem:[%s9174_s1 + $0xd4] ss:$8 sps:$4 sm:$0xff]  }
 0x10c   :  { %v1415_v55 = vadd.f32 %v1411_v12, %v6939_v28  ;;  %v1408_v56 = vadd.f32 %v1404_v7, %v1396_v3  ;;  %v1448_v53 = vmul.f32 %v5174_v57, %v6791_v6  ;;  %v1449_v45 = vmul.f32 %v5174_v57, %v6833_v23  ;;  %9283 = vst [vmem:[#allocation11_spill] sm:$0xff] %v7627_v17  ;;  %v7653_v13 = vld [vmem:[%s9174_s1 + $0xd0] ss:$8 sps:$4 sm:$0xff]   ;;  %v7658_v3 = vld [vmem:[%s9174_s1 + $0xe4] ss:$8 sps:$4 sm:$0xff]   ;;  %v7665_v12 = vpop.permute.xlu1 %1707 }
 0x10d   :  { %5930 = vst [vmem:[#allocation2 + $0x188] sm:$0xff] %v5860_v32   ;;  %v5855_v19 = vpack.c.bf16 %v1367_v48, %v1366_v34  ;;  %v1418_v50 = vmax.f32 %v1414_v18, 0.0  ;;  %v1409_v39 = vadd.f32 %v1405_v37, %v1397_v38  ;;  %v1456_v14 = vmul.f32 %v5180_v27, %v6789_v5  ;;  %2068 = vmatmul.mubr.bf16.gmra.mxu0 %v7573_v20  ;;  %v7660_v34 = vpop.permute.xlu0 %1702  ;;  %v7670_v38 = vld [vmem:[%s9174_s1 + $0xe0] ss:$8 sps:$4 sm:$0xff]   ;;  %v7675_v7 = vld [vmem:[%s9174_s1 + $0xf4] ss:$8 sps:$4 sm:$0xff]  }
 0x10e   :  { %v1419_v24 = vmax.f32 %v1415_v55, 0.0  ;;  %v1412_v42 = vadd.f32 %v1408_v56, %v6957_v51  ;;  %v1457_v47 = vmul.f32 %v5180_v27, %v6831_v22  ;;  %v1446_v54 = vmul.f32 %v5174_v57, %v6864_v41  ;;  %5237 = vmatprep.mubr.msk.bf16.mxu0 %vm1914_vm0, %v7583_v49  ;;  %9286 = vst [vmem:[#allocation14_spill] sm:$0xff] %v7645_v8  ;;  %v7689_v37 = vld [vmem:[%s9174_s1 + $0xf0] ss:$8 sps:$4 sm:$0xff]   ;;  %v7697_v56 = vld [vmem:[%s9174_s1 + $0x4] ss:$8 sps:$4 sm:$0xff]  }
 0x10f   :  { %5929 = vst [vmem:[#allocation2 + $0x180] sm:$0xff] %v5855_v19   ;;  %v1413_v6 = vadd.f32 %v1409_v39, %v6955_v36  ;;  %v1460_v23 = vadd.f32 %v1456_v14, %v1448_v53  ;;  %v1447_v62 = vmul.f32 %v5174_v57, %v6862_v40  ;;  %v1454_v5 = vmul.f32 %v5180_v27, %v6907_v60  ;;  %v7617_v60 = vld [vmem:[%s9174_s1 + $0xb4] ss:$8 sps:$4 sm:$0xff]  }
 0x110   :  { %v5870_v4 = vpack.c.bf16 %v1419_v24, %v1418_v50  ;;  %v1416_v9 = vmax.f32 %v1412_v42, 0.0  ;;  %v1461_v31 = vadd.f32 %v1457_v47, %v1449_v45  ;;  %v1455_v11 = vmul.f32 %v5180_v27, %v6905_v59  ;;  %9282 = vst [vmem:[#allocation10_spill] sm:$0xff] %v7617_v60  ;;  %9287 = vst [vmem:[#allocation15_spill] sm:$0xff] %v7653_v13  ;;  %v7679_v48 = vpop.permute.xlu1 %1627  ;;  %v7710_v50 = vld [vmem:[%s9174_s1] ss:$8 sps:$4 sm:$0xff]  }
 0x111   :  { %v1417_v63 = vmax.f32 %v1413_v6, 0.0  ;;  %v1464_v22 = vadd.f32 %v1460_v23, %v6941_v29  ;;  %v1458_v41 = vadd.f32 %v1454_v5, %v1446_v54  ;;  %9288 = vst [vmem:[#allocation16_spill] sm:$0xff] %v7658_v3  ;;  %9289 = vst [vmem:[#allocation17_spill] sm:$0xff] %v7660_v34  ;;  %v7677_v32 = vpop.permute.xlu0 %1622  ;;  %v7716_v39 = vld [vmem:[%s9174_s1 + $0x14] ss:$8 sps:$4 sm:$0xff]  }
 0x112   :  { %5932 = vst [vmem:[#allocation2 + $0x198] sm:$0xff] %v5870_v4   ;;  %v1465_v16 = vadd.f32 %v1461_v31, %v6939_v28  ;;  %v1459_v40 = vadd.f32 %v1455_v11, %v1447_v62  ;;  %9290 = vst [vmem:[#allocation18_spill] sm:$0xff] %v7670_v38  ;;  %v7729_v47 = vld [vmem:[%s9174_s1 + $0x10] ss:$8 sps:$4 sm:$0xff]   ;;  %v7735_v54 = vld [vmem:[%s9174_s1 + $0x24] ss:$8 sps:$4 sm:$0xff]  }
 0x113   :  { %v5865_v57 = vpack.c.bf16 %v1417_v63, %v1416_v9  ;;  %v1468_v59 = vmax.f32 %v1464_v22, 0.0  ;;  %v1462_v44 = vadd.f32 %v1458_v41, %v6957_v51  ;;  %v7640_v51 = vld [vmem:[%s9174_s1 + $0xc0] ss:$8 sps:$4 sm:$0xff]   ;;  %9291 = vst [vmem:[#allocation19_spill] sm:$0xff] %v7675_v7  ;;  %9292 = vst [vmem:[#allocation20_spill] sm:$0xff] %v7677_v32 }
 0x114   :  { %v1469_v29 = vmax.f32 %v1465_v16, 0.0  ;;  %v1463_v1 = vadd.f32 %v1459_v40, %v6955_v36  ;;  %v7632_v36 = vld [vmem:[%s9174_s1 + $0xc4] ss:$8 sps:$4 sm:$0xff]   ;;  %9285 = vst [vmem:[#allocation13_spill] sm:$0xff] %v7640_v51  ;;  %9293 = vst [vmem:[#allocation21_spill] sm:$0xff] %v7679_v48  ;;  %v7691_v55 = vpop.permute.xlu1 %1697 }
 0x115   :  { %5931 = vst [vmem:[#allocation2 + $0x190] sm:$0xff] %v5865_v57   ;;  %v1466_v21 = vmax.f32 %v1462_v44, 0.0  ;;  %2076 = vmatmul.mubr.bf16.gmra.mxu0 %v7611_v15  ;;  %9284 = vst [vmem:[#allocation12_spill] sm:$0xff] %v7632_v36  ;;  %v7684_v18 = vpop.permute.xlu0 %1692 }
 0x116   :  { %v5880_v33 = vpack.c.bf16 %v1469_v29, %v1468_v59  ;;  %v1467_v27 = vmax.f32 %v1463_v1, 0.0  ;;  %5238 = vmatprep.mubr.msk.bf16.mxu0 %vm1914_vm0, %v7617_v60  ;;  %9294 = vst [vmem:[#allocation22_spill] sm:$0xff] %v7689_v37  ;;  %9295 = vst [vmem:[#allocation23_spill] sm:$0xff] %v7691_v55 }
 0x117   :  { %9296 = vst [vmem:[#allocation24_spill] sm:$0xff] %v7697_v56  ;;  %9299 = vst [vmem:[#allocation27_spill] sm:$0xff] %v7710_v50 }
 0x118   :  { %5934 = vst [vmem:[#allocation2 + $0x1a8] sm:$0xff] %v5880_v33   ;;  %v5875_v28 = vpack.c.bf16 %v1467_v27, %v1466_v21  ;;  %v7703_v45 = vpop.permute.xlu1 %1617  ;;  %9300 = vst [vmem:[#allocation28_spill] sm:$0xff] %v7716_v39 }
 0x119   :  { %v7701_v53 = vpop.permute.xlu0 %1612  ;;  %9298 = vst [vmem:[#allocation26_spill] sm:$0xff] %v7703_v45  ;;  %9301 = vst [vmem:[#allocation29_spill] sm:$0xff] %v7729_v47 }
 0x11a   :  { %5933 = vst [vmem:[#allocation2 + $0x1a0] sm:$0xff] %v5875_v28   ;;  %9297 = vst [vmem:[#allocation25_spill] sm:$0xff] %v7701_v53 }
 0x11b   :  { %9302 = vst [vmem:[#allocation30_spill] sm:$0xff] %v7735_v54 }
 0x11c   :  { %v7720_v14 = vpop.permute.xlu1 %1687 }
 0x11d   :  { %2084 = vmatmul.mubr.bf16.gmra.mxu0 %v7627_v17  ;;  %v7705_v19 = vpop.permute.xlu0 %1682 }
 0x11e   :  { %5239 = vmatprep.mubr.msk.bf16.mxu0 %vm1914_vm0, %v7632_v36 }
 0x120   :  { %v7724_v42 = vpop.permute.xlu1 %1607 }
 0x121   :  { %v7722_v24 = vpop.permute.xlu0 %1602 }
 0x124   :  { %v7741_v23 = vpop.permute.xlu1 %1677 }
 0x125   :  { %2092 = vmatmul.mubr.bf16.gmra.mxu0 %v7640_v51  ;;  %v7739_v6 = vpop.permute.xlu0 %1672 }
 0x126   :  { %5240 = vmatprep.mubr.msk.bf16.mxu0 %vm1914_vm0, %v7645_v8 }
 0x128   :  { %v7748_v5 = vpop.permute.xlu1 %1597 }
 0x129   :  { %v7746_v62 = vpop.permute.xlu0 %1592 }
 0x12c   :  { %v7755_v9 = vpop.permute.xlu1 %1667 }
 0x12d   :  { %2100 = vmatmul.mubr.bf16.gmra.mxu0 %v7653_v13  ;;  %v7750_v4 = vpop.permute.xlu0 %1662  ;;  %9304 = vst [vmem:[#allocation32_spill] sm:$0xff] %v7755_v9 }
 0x12e   :  { %5241 = vmatprep.mubr.msk.bf16.mxu0 %vm1914_vm0, %v7658_v3  ;;  %9303 = vst [vmem:[#allocation31_spill] sm:$0xff] %v7750_v4 }
 0x130   :  { %v7759_v11 = vpop.permute.xlu1 %1587 }
 0x131   :  { %v7757_v31 = vpop.permute.xlu0 %1582 }
 0x135   :  { %2108 = vmatmul.mubr.bf16.gmra.mxu0 %v7670_v38 }
 0x136   :  { %5242 = vmatprep.mubr.msk.bf16.mxu0 %vm1914_vm0, %v7675_v7 }
 0x13d   :  { %2116 = vmatmul.mubr.bf16.gmra.mxu0 %v7689_v37 }
 0x13e   :  { %5261 = vmatprep.mubr.msk.bf16.mxu0 %vm1914_vm0, %v7697_v56 }
 0x145   :  { %2422 = vmatmul.mubr.bf16.vlgmr.msra.gmra.mxu0 %v7710_v50 }
 0x146   :  { %5262 = vmatprep.mubr.msk.bf16.mxu0 %vm1914_vm0, %v7716_v39 }
 0x14d   :  { %2430 = vmatmul.mubr.bf16.gmra.mxu0 %v7729_v47 }
 0x14e   :  { %5263 = vmatprep.mubr.msk.bf16.mxu0 %vm1914_vm0, %v7735_v54 }
 0x155   :  { %2438 = vmatmul.mubr.bf16.gmra.mxu0 %v7245_v30  ;;  %v7764_v30 = vpop.permute.xlu0 %1652 }
 0x156   :  { %5264 = vmatprep.mubr.msk.bf16.mxu0 %vm1914_vm0, %v7250_v35  ;;  %9305 = vst [vmem:[#allocation33_spill] sm:$0xff] %v7764_v30  ;;  %v7766_v35 = vpop.permute.xlu1 %1657 }
 0x157   :  { %9306 = vst [vmem:[#allocation34_spill] sm:$0xff] %v7766_v35 }
 0x15d   :  { %2446 = vmatmul.mubr.bf16.gmra.mxu0 %v7305_v43  ;;  %v7769_v43 = vpop.permute.xlu0 %1572 }
 0x15e   :  { %5265 = vmatprep.mubr.msk.bf16.mxu0 %vm1914_vm0, %v7315_v25  ;;  %v7771_v25 = vpop.permute.xlu1 %1577 }
 0x161   :  { %v7773_v63 = vpop.permute.xlu0 %1642 }
 0x162   :  { %9307 = vst [vmem:[#allocation35_spill] sm:$0xff] %v7773_v63  ;;  %v7775_v22 = vpop.permute.xlu1 %1647 }
 0x163   :  { %9308 = vst [vmem:[#allocation36_spill] sm:$0xff] %v7775_v22 }
 0x165   :  { %2454 = vmatmul.mubr.bf16.gmra.mxu0 %v7353_v10  ;;  %v7777_v41 = vpop.permute.xlu0 %1562 }
 0x166   :  { %5266 = vmatprep.mubr.msk.bf16.mxu0 %vm1914_vm0, %v7365_v26  ;;  %v7779_v10 = vpop.permute.xlu1 %1567 }
 0x169   :  { %v7781_v16 = vpop.permute.xlu0 %1632 }
 0x16a   :  { %9309 = vst [vmem:[#allocation37_spill] sm:$0xff] %v7781_v16  ;;  %v7783_v26 = vpop.permute.xlu1 %1637 }
 0x16b   :  { %9310 = vst [vmem:[#allocation38_spill] sm:$0xff] %v7783_v26 }
 0x16d   :  { %2462 = vmatmul.mubr.bf16.gmra.mxu0 %v7396_v58  ;;  %v7785_v57 = vpop.permute.xlu0 %1552 }
 0x16e   :  { %v7788_v44 = vpop.permute.xlu1 %1557 }
 0x185   :  { %v1997_v40 = vpop.f32.mrf.mxu0 }
 0x186   :  { %v1998_v59 = vadd.f32 %v1997_v40, %v7785_v57 }
 0x187   :  { %v1999_v58 = vpop.f32.mrf.mxu0 }
 0x188   :  { %v2124_v33 = vmax.f32 %v1998_v59, 0.0 }
 0x189   :  { %v2000_v29 = vpop.f32.mrf.mxu0 }
 0x18a   :  { %v2001_v1 = vadd.f32 %v2000_v29, %v7788_v44 }
 0x18b   :  { %v2002_v21 = vpop.f32.mrf.mxu0 }
 0x18c   :  { %v2125_v27 = vmax.f32 %v2001_v1, 0.0 }
 0x18d   :  { %v2005_v28 = vpop.f32.mrf.mxu0 }
 0x18e   :  { %v7791_v2 = vpack.c.bf16 %v2125_v27, %v2124_v33  ;;  %v2006_v47 = vadd.f32 %v2005_v28, %v7777_v41 }
 0x18f   :  { %v2007_v54 = vpop.f32.mrf.mxu0 }
 0x190   :  { %v2126_v56 = vmax.f32 %v2006_v47, 0.0 }
 0x191   :  { %v2008_v39 = vpop.f32.mrf.mxu0 }
 0x192   :  { %v2009_v50 = vadd.f32 %v2008_v39, %v7779_v10 }
 0x193   :  { %v2010_v58 = vpop.f32.mrf.mxu0 }
 0x194   :  { %v2127_v40 = vmax.f32 %v2009_v50, 0.0 }
 0x195   :  { %v2013_v37 = vpop.f32.mrf.mxu0 }
 0x196   :  { %v7795_v7 = vpack.c.bf16 %v2127_v40, %v2126_v56  ;;  %v2014_v29 = vadd.f32 %v2013_v37, %v7769_v43 }
 0x197   :  { %v2015_v38 = vpop.f32.mrf.mxu0 }
 0x198   :  { %v2128_v33 = vmax.f32 %v2014_v29, 0.0  ;;  %v6309_v29 = vld [vmem:[%s9175_s2 + $0x4] ss:$8 sps:$4 sm:$0xff]  }
 0x199   :  { %v2016_v59 = vpop.f32.mrf.mxu0  ;;  %2260 = vmatprep.mubr.bf16.mxu1 %v6309_v29 }
 0x19a   :  { %v2017_v1 = vadd.f32 %v2016_v59, %v7771_v25 }
 0x19b   :  { %v2018_v21 = vpop.f32.mrf.mxu0 }
 0x19c   :  { %v2129_v54 = vmax.f32 %v2017_v1, 0.0 }
 0x19d   :  { %v2021_v27 = vpop.f32.mrf.mxu0 }
 0x19e   :  { %v7799_v28 = vpack.c.bf16 %v2129_v54, %v2128_v33  ;;  %v2022_v39 = vadd.f32 %v2021_v27, %v7757_v31 }
 0x19f   :  { %v2023_v3 = vpop.f32.mrf.mxu0 }
 0x1a0   :  { %v2130_v58 = vmax.f32 %v2022_v39, 0.0 }
 0x1a1   :  { %v2024_v47 = vpop.f32.mrf.mxu0 }
 0x1a2   :  { %v2025_v50 = vadd.f32 %v2024_v47, %v7759_v11 }
 0x1a3   :  { %v2026_v56 = vpop.f32.mrf.mxu0 }
 0x1a4   :  { %v2131_v38 = vmax.f32 %v2025_v50, 0.0 }
 0x1a5   :  { %v2029_v40 = vpop.f32.mrf.mxu0 }
 0x1a6   :  { %v7803_v37 = vpack.c.bf16 %v2131_v38, %v2130_v58  ;;  %v2030_v59 = vadd.f32 %v2029_v40, %v7746_v62 }
 0x1a7   :  { %v2031_v13 = vpop.f32.mrf.mxu0 }
 0x1a8   :  { %v2132_v33 = vmax.f32 %v2030_v59, 0.0 }
 0x1a9   :  { %v2032_v1 = vpop.f32.mrf.mxu0 }
 0x1aa   :  { %v2033_v3 = vadd.f32 %v2032_v1, %v7748_v5 }
 0x1ab   :  { %v2034_v21 = vpop.f32.mrf.mxu0 }
 0x1ac   :  { %v2133_v54 = vmax.f32 %v2033_v3, 0.0 }
 0x1ad   :  { %v2037_v27 = vpop.f32.mrf.mxu0 }
 0x1ae   :  { %v7810_v39 = vpack.c.bf16 %v2133_v54, %v2132_v33  ;;  %v2038_v50 = vadd.f32 %v2037_v27, %v7722_v24 }
 0x1af   :  { %v2039_v47 = vpop.f32.mrf.mxu0 }
 0x1b0   :  { %v2134_v38 = vmax.f32 %v2038_v50, 0.0 }
 0x1b1   :  { %v2040_v13 = vpop.f32.mrf.mxu0 }
 0x1b2   :  { %v2041_v56 = vadd.f32 %v2040_v13, %v7724_v42 }
 0x1b3   :  { %v2042_v58 = vpop.f32.mrf.mxu0 }
 0x1b4   :  { %v2135_v40 = vmax.f32 %v2041_v56, 0.0 }
 0x1b5   :  { %v2045_v8 = vpop.f32.mrf.mxu0 }
 0x1b6   :  { %v7814_v51 = vpack.c.bf16 %v2135_v40, %v2134_v38  ;;  %v2046_v29 = vadd.f32 %v2045_v8, %v7701_v53 }
 0x1b7   :  { %v2047_v1 = vpop.f32.mrf.mxu0 }
 0x1b8   :  { %v2136_v33 = vmax.f32 %v2046_v29, 0.0 }
 0x1b9   :  { %v2048_v59 = vpop.f32.mrf.mxu0 }
 0x1ba   :  { %v2049_v3 = vadd.f32 %v2048_v59, %v7703_v45 }
 0x1bb   :  { %v2050_v21 = vpop.f32.mrf.mxu0 }
 0x1bc   :  { %v2137_v54 = vmax.f32 %v2049_v3, 0.0 }
 0x1bd   :  { %v2053_v47 = vpop.f32.mrf.mxu0 }
 0x1be   :  { %v7818_v27 = vpack.c.bf16 %v2137_v54, %v2136_v33  ;;  %v2054_v13 = vadd.f32 %v2053_v47, %v7677_v32 }
 0x1bf   :  { %v2055_v36 = vpop.f32.mrf.mxu0 }
 0x1c0   :  { %v2138_v38 = vmax.f32 %v2054_v13, 0.0 }
 0x1c1   :  { %v2056_v50 = vpop.f32.mrf.mxu0 }
 0x1c2   :  { %v2057_v56 = vadd.f32 %v2056_v50, %v7679_v48 }
 0x1c3   :  { %v2058_v58 = vpop.f32.mrf.mxu0 }
 0x1c4   :  { %v2139_v40 = vmax.f32 %v2057_v56, 0.0 }
 0x1c5   :  { %v2061_v1 = vpop.f32.mrf.mxu0 }
 0x1c6   :  { %v2163_v8 = vpack.c.bf16 %v2139_v40, %v2138_v38  ;;  %v2062_v59 = vadd.f32 %v2061_v1, %v7781_v16 }
 0x1c7   :  { %v2063_v53 = vpop.f32.mrf.mxu0 }
 0x1c8   :  { %v2140_v33 = vmax.f32 %v2062_v59, 0.0 }
 0x1c9   :  { %v2064_v21 = vpop.f32.mrf.mxu0 }
 0x1ca   :  { %v2065_v29 = vadd.f32 %v2064_v21, %v7783_v26 }
 0x1cb   :  { %v2066_v3 = vpop.f32.mrf.mxu0 }
 0x1cc   :  { %v2141_v54 = vmax.f32 %v2065_v29, 0.0 }
 0x1cd   :  { %v2069_v36 = vpop.f32.mrf.mxu0 }
 0x1ce   :  { %v7824_v45 = vpack.c.bf16 %v2141_v54, %v2140_v33  ;;  %v2070_v50 = vadd.f32 %v2069_v36, %v7773_v63 }
 0x1cf   :  { %v2071_v47 = vpop.f32.mrf.mxu0 }
 0x1d0   :  { %v2142_v38 = vmax.f32 %v2070_v50, 0.0 }
 0x1d1   :  { %v2072_v58 = vpop.f32.mrf.mxu0 }
 0x1d2   :  { %v2073_v13 = vadd.f32 %v2072_v58, %v7775_v22 }
 0x1d3   :  { %v2074_v56 = vpop.f32.mrf.mxu0 }
 0x1d4   :  { %v2143_v53 = vmax.f32 %v2073_v13, 0.0 }
 0x1d5   :  { %v7828_v40 = vpop.f32.mrf.mxu0 }
 0x1d6   :  { %v7830_v1 = vpack.c.bf16 %v2143_v53, %v2142_v38 }
 0x1d7   :  { %v2079_v21 = vpop.f32.mrf.mxu0 }
 0x1d9   :  { %v2080_v3 = vpop.f32.mrf.mxu0 }
 0x1db   :  { %v2082_v59 = vpop.f32.mrf.mxu0 }
 0x1dd   :  { %v2085_v29 = vpop.f32.mrf.mxu0 }
 0x1df   :  { %v2087_v26 = vpop.f32.mrf.mxu0 }
 0x1e1   :  { %v2088_v33 = vpop.f32.mrf.mxu0 }
 0x1e3   :  { %v2090_v54 = vpop.f32.mrf.mxu0 }
 0x1e5   :  { %v2093_v47 = vpop.f32.mrf.mxu0 }
 0x1e7   :  { %v2095_v16 = vpop.f32.mrf.mxu0 }
 0x1e9   :  { %v2096_v36 = vpop.f32.mrf.mxu0 }
 0x1eb   :  { %v2098_v63 = vpop.f32.mrf.mxu0 }
 0x1ed   :  { %v2101_v48 = vpop.f32.mrf.mxu0 }
 0x1ef   :  { %v2103_v58 = vpop.f32.mrf.mxu0 }
 0x1f1   :  { %v2104_v56 = vpop.f32.mrf.mxu0 }
 0x1f2   :  { %v2105_v58 = vadd.f32 %v2104_v56, %v7720_v14  ;;  %v2094_v56 = vadd.f32 %v2093_v47, %v7739_v6 }
 0x1f3   :  { %v2106_v50 = vpop.f32.mrf.mxu0 }
 0x1f5   :  { %v2109_v13 = vpop.f32.mrf.mxu0 }
 0x1f6   :  { %v2110_v54 = vadd.f32 %v2109_v13, %v7684_v18 }
 0x1f7   :  { %v2111_v22 = vpop.f32.mrf.mxu0 }
 0x1f8   :  { %v2152_v49 = vmax.f32 %v2110_v54, 0.0 }
 0x1f9   :  { %v2112_v32 = vpop.f32.mrf.mxu0 }
 0x1fa   :  { %v2113_v59 = vadd.f32 %v2112_v32, %v7691_v55  ;;  %v2097_v32 = vadd.f32 %v2096_v36, %v7741_v23 }
 0x1fb   :  { %v2114_v38 = vpop.f32.mrf.mxu0 }
 0x1fc   :  { %v2153_v60 = vmax.f32 %v2113_v59, 0.0  ;;  %v2102_v38 = vadd.f32 %v2101_v48, %v7705_v19  ;;  %v2089_v48 = vadd.f32 %v2088_v33, %v7755_v9 }
 0x1fd   :  { %v2117_v53 = vpop.f32.mrf.mxu0 }
 0x1fe   :  { %v2118_v26 = vadd.f32 %v2117_v53, %v7660_v34  ;;  %v2151_v53 = vmax.f32 %v2105_v58, 0.0  ;;  %v2170_v34 = vpack.c.bf16 %v2153_v60, %v2152_v49  ;;  %v2150_v59 = vmax.f32 %v2102_v38, 0.0 }
 0x1ff   :  { %v2119_v21 = vpop.f32.mrf.mxu0  ;;  %v2086_v60 = vadd.f32 %v2085_v29, %v7750_v4  ;;  %v2081_v58 = vadd.f32 %v2080_v3, %v7766_v35 }
 0x200   :  { %v2154_v50 = vmax.f32 %v2118_v26, 0.0 }
 0x201   :  { %v2120_v17 = vpop.f32.mrf.mxu0  ;;  %v2146_v38 = vmax.f32 %v2086_v60, 0.0 }
 0x202   :  { %v2121_v16 = vadd.f32 %v2120_v17, %v7665_v12 }
 0x203   :  { %v2122_v63 = vpop.f32.mrf.mxu0 }
 0x204   :  { %v2155_v15 = vmax.f32 %v2121_v16, 0.0 }
 0x205   :  { %v2423_v22 = vpop.f32.mrf.mxu0 }
 0x206   :  { %v2171_v21 = vpack.c.bf16 %v2155_v15, %v2154_v50  ;;  %v2424_v13 = vadd.f32 %v2423_v22, %v7785_v57  ;;  %v2149_v15 = vmax.f32 %v2097_v32, 0.0  ;;  %v2145_v32 = vmax.f32 %v2081_v58, 0.0 }
 0x207   :  { %v2425_v20 = vpop.f32.mrf.mxu0 }
 0x208   :  { %5935 = vmatprep.subr.bf16.mxu1 %v2171_v21  ;;  %v2169_v20 = vpack.c.bf16 %v2151_v53, %v2150_v59  ;;  %v2550_v16 = vmax.f32 %v2424_v13, 0.0 }
 0x209   :  { %5936 = vmatpush3.bf16.msra.mxu1 %v2163_v8  ;;  %v2426_v17 = vpop.f32.mrf.mxu0  ;;  %v2148_v8 = vmax.f32 %v2094_v56, 0.0 }
 0x20a   :  { %v2427_v26 = vadd.f32 %v2426_v17, %v7788_v44  ;;  %5937 = vmatprep.subr.bf16.mxu1 %v2170_v34  ;;  %v2147_v34 = vmax.f32 %v2089_v48, 0.0 }
 0x20b   :  { %v2428_v54 = vpop.f32.mrf.mxu0  ;;  %v2168_v50 = vpack.c.bf16 %v2149_v15, %v2148_v8 }
 0x20c   :  { %v2551_v36 = vmax.f32 %v2427_v26, 0.0  ;;  %v2167_v53 = vpack.c.bf16 %v2147_v34, %v2146_v38 }
 0x20d   :  { %5938 = vmatpush3.bf16.msra.mxu1 %v7818_v27  ;;  %v2431_v49 = vpop.f32.mrf.mxu0  ;;  %v2078_v27 = vadd.f32 %v7828_v40, %v7764_v30 }
 0x20e   :  { %v7845_v63 = vpack.c.bf16 %v2551_v36, %v2550_v16  ;;  %5939 = vmatprep.subr.bf16.mxu1 %v2169_v20  ;;  %v2432_v33 = vadd.f32 %v2431_v49, %v7777_v41 }
 0x20f   :  { %v2433_v47 = vpop.f32.mrf.mxu0  ;;  %v2144_v56 = vmax.f32 %v2078_v27, 0.0  ;;  %v6450_v27 = vld [vmem:[#allocation2 + $0x78] sm:$0xff]  }
 0x210   :  { %v2552_v13 = vmax.f32 %v2432_v33, 0.0  ;;  %v9311_v33 = vmov 0  }
 0x211   :  { %5940 = vmatpush3.bf16.msra.mxu1 %v7814_v51  ;;  %v2434_v22 = vpop.f32.mrf.mxu0  ;;  %v2166_v26 = vpack.c.bf16 %v2145_v32, %v2144_v56 }
 0x212   :  { %v2435_v29 = vadd.f32 %v2434_v22, %v7779_v10  ;;  %5941 = vmatprep.subr.bf16.mxu1 %v2168_v50  ;;  %v6310_v50 = vld [vmem:[%s9175_s2 + $0x14] ss:$8 sps:$4 sm:$0xff]  }
 0x213   :  { %v2436_v21 = vpop.f32.mrf.mxu0 }
 0x214   :  { %v2553_v17 = vmax.f32 %v2435_v29, 0.0 }
 0x215   :  { %5942 = vmatpush3.bf16.msra.mxu1 %v7810_v39  ;;  %v2439_v3 = vpop.f32.mrf.mxu0 }
 0x216   :  { %v7854_v59 = vpack.c.bf16 %v2553_v17, %v2552_v13  ;;  %5943 = vmatprep.subr.bf16.mxu1 %v2167_v53  ;;  %v2440_v40 = vadd.f32 %v2439_v3, %v7769_v43  ;;  %v6312_v53 = vld [vmem:[%s9175_s2 + $0x10] ss:$8 sps:$4 sm:$0xff]   ;;  %v6313_v3 = vld [vmem:[%s9175_s2 + $0x24] ss:$8 sps:$4 sm:$0xff]  }
 0x217   :  { %v2441_v51 = vpop.f32.mrf.mxu0  ;;  %v6451_v13 = vld [vmem:[#allocation2 + $0x70] sm:$0xff]  }
 0x218   :  { %v2554_v20 = vmax.f32 %v2440_v40, 0.0  ;;  %v6452_v40 = vld [vmem:[#allocation2 + $0x68] sm:$0xff]  }
 0x219   :  { %5944 = vmatpush3.bf16.msra.mxu1 %v7803_v37  ;;  %v2442_v48 = vpop.f32.mrf.mxu0 }
 0x21a   :  { %v2443_v54 = vadd.f32 %v2442_v48, %v7771_v25  ;;  %5945 = vmatprep.subr.bf16.mxu1 %v2166_v26 }
 0x21b   :  { %v2444_v15 = vpop.f32.mrf.mxu0 }
 0x21c   :  { %v2555_v16 = vmax.f32 %v2443_v54, 0.0 }
 0x21d   :  { %5946 = vmatpush3.bf16.msra.mxu1 %v7799_v28  ;;  %v2447_v39 = vpop.f32.mrf.mxu0  ;;  %v6307_v28 = vld [vmem:[%s9175_s2] ss:$8 sps:$4 sm:$0xff]  }
 0x21e   :  { %v7860_v36 = vpack.c.bf16 %v2555_v16, %v2554_v20  ;;  %5947 = vmatprep.subr.bf16.mxu1 %v7830_v1  ;;  %v2448_v60 = vadd.f32 %v2447_v39, %v7757_v31  ;;  %v6315_v39 = vld [vmem:[%s9175_s2 + $0x20] ss:$8 sps:$4 sm:$0xff]  }
 0x21f   :  { %v2449_v49 = vpop.f32.mrf.mxu0 }
 0x220   :  { %v2556_v58 = vmax.f32 %v2448_v60, 0.0  ;;  %v6453_v49 = vld [vmem:[#allocation2 + $0x60] sm:$0xff]   ;;  %v6316_v60 = vld [vmem:[%s9175_s2 + $0x34] ss:$8 sps:$4 sm:$0xff]  }
 0x221   :  { %5948 = vmatpush3.bf16.msra.mxu1 %v7795_v7  ;;  %v2450_v37 = vpop.f32.mrf.mxu0 }
 0x222   :  { %v2451_v8 = vadd.f32 %v2450_v37, %v7759_v11  ;;  %5949 = vmatprep.subr.bf16.mxu1 %v7824_v45 }
 0x223   :  { %v2452_v47 = vpop.f32.mrf.mxu0 }
 0x224   :  { %v2557_v34 = vmax.f32 %v2451_v8, 0.0  ;;  %v6454_v8 = vld [vmem:[#allocation2 + $0x58] sm:$0xff]  }
 0x225   :  { %5950 = vmatpush3.bf16.msra.mxu1 %v7791_v2  ;;  %v2455_v1 = vpop.f32.mrf.mxu0  ;;  %v6318_v47 = vld [vmem:[%s9175_s2 + $0x30] ss:$8 sps:$4 sm:$0xff]  }
 0x226   :  { %v7874_v7 = vpack.c.bf16 %v2557_v34, %v2556_v58  ;;  %6215 = vmatprep.subr.bf16.mxu1 %v9311_v33  ;;  %v2456_v45 = vadd.f32 %v2455_v1, %v7746_v62  ;;  %v6455_v58 = vld [vmem:[#allocation2 + $0x50] sm:$0xff]   ;;  %v6456_v34 = vld [vmem:[#allocation2 + $0x48] sm:$0xff]   ;;  %v6458_v1 = vld [vmem:[#allocation2 + $0x40] sm:$0xff]  }
 0x227   :  { %v2457_v22 = vpop.f32.mrf.mxu0 }
 0x228   :  { %2261 = vmatmul.mubr.bf16.vlgmr.msra.gmra.mxu1 %v6307_v28  ;;  %v2558_v21 = vmax.f32 %v2456_v45, 0.0  ;;  %v7909_v28 = vld [vmem:[%s9174_s1 + $0x64] ss:$8 sps:$4 sm:$0xff]   ;;  %v6319_v45 = vld [vmem:[#allocation2 + $0xb8] sm:$0xff]  }
 0x229   :  { %6225 = vmatpush1.bf16.msra.mxu1 %v6450_v27  ;;  %v2458_v38 = vpop.f32.mrf.mxu0  ;;  %2268 = vmatprep.mubr.bf16.mxu1 %v6310_v50  ;;  %9312 = vst [vmem:[#allocation39_spill] sm:$0xff] %v7909_v28  ;;  %v6459_v50 = vld [vmem:[#allocation2 + $0x88] sm:$0xff]   ;;  %v6460_v22 = vld [vmem:[#allocation2 + $0x80] sm:$0xff]  }
 0x22a   :  { %v2459_v29 = vadd.f32 %v2458_v38, %v7748_v5  ;;  %6216 = vmatprep.subr.bf16.mxu1 %v9311_v33  ;;  %v7920_v27 = vld [vmem:[%s9174_s1 + $0x60] ss:$8 sps:$4 sm:$0xff]   ;;  %v7926_v38 = vld [vmem:[%s9174_s1 + $0x74] ss:$8 sps:$4 sm:$0xff]  }
 0x22b   :  { %v2460_v2 = vpop.f32.mrf.mxu0  ;;  %9313 = vst [vmem:[#allocation40_spill] sm:$0xff] %v7920_v27  ;;  %9314 = vst [vmem:[#allocation41_spill] sm:$0xff] %v7926_v38 }
 0x22c   :  { %v2559_v32 = vmax.f32 %v2459_v29, 0.0  ;;  %v6320_v29 = vld [vmem:[#allocation2 + $0xb0] sm:$0xff]   ;;  %v6321_v2 = vld [vmem:[#allocation2 + $0xa8] sm:$0xff]  }
 0x22d   :  { %6226 = vmatpush1.bf16.msra.mxu1 %v6451_v13  ;;  %v2463_v17 = vpop.f32.mrf.mxu0  ;;  %v9316_v13 = vld [vmem:[#allocation8_spill] sm:$0xff] }
 0x22e   :  { %v7886_v56 = vpack.c.bf16 %v2559_v32, %v2558_v21  ;;  %6217 = vmatprep.subr.bf16.mxu1 %v9311_v33  ;;  %v2464_v26 = vadd.f32 %v2463_v17, %v7722_v24  ;;  %v6322_v21 = vld [vmem:[#allocation2 + $0xa0] sm:$0xff]   ;;  %v6323_v32 = vld [vmem:[#allocation2 + $0x98] sm:$0xff]  }
 0x22f   :  { %v2465_v51 = vpop.f32.mrf.mxu0  ;;  %v9317_v17 = vld [vmem:[#allocation9_spill] sm:$0xff] }
 0x230   :  { %2269 = vmatmul.mubr.bf16.gmra.mxu1 %v6312_v53  ;;  %v2560_v20 = vmax.f32 %v2464_v26, 0.0  ;;  %v9315_v53 = vld [vmem:[#allocation7_spill] sm:$0xff]  ;;  %v6328_v51 = vld [vmem:[#allocation2 + $0xc0] sm:$0xff]  }
 0x231   :  { %6227 = vmatpush1.bf16.msra.mxu1 %v6452_v40  ;;  %v2466_v48 = vpop.f32.mrf.mxu0  ;;  %2276 = vmatprep.mubr.bf16.mxu1 %v6313_v3  ;;  %v9318_v3 = vld [vmem:[#allocation10_spill] sm:$0xff]  ;;  %v9319_v26 = vld [vmem:[#allocation11_spill] sm:$0xff]  ;;  %v9320_v40 = vld [vmem:[#allocation12_spill] sm:$0xff] }
 0x232   :  { %v2467_v54 = vadd.f32 %v2466_v48, %v7724_v42  ;;  %6218 = vmatprep.subr.bf16.mxu1 %v9311_v33  ;;  %v9321_v48 = vld [vmem:[#allocation13_spill] sm:$0xff] }
 0x233   :  { %v2468_v15 = vpop.f32.mrf.mxu0 }
 0x234   :  { %v2561_v16 = vmax.f32 %v2467_v54, 0.0  ;;  %v9322_v54 = vld [vmem:[#allocation14_spill] sm:$0xff]  ;;  %v9323_v15 = vld [vmem:[#allocation15_spill] sm:$0xff] }
 0x235   :  { %6228 = vmatpush1.bf16.msra.mxu1 %v6453_v49  ;;  %v9327_v49 = vld [vmem:[#allocation22_spill] sm:$0xff] }
 0x236   :  { %v7898_v37 = vpack.c.bf16 %v2561_v16, %v2560_v20  ;;  %6219 = vmatprep.subr.bf16.mxu1 %v9311_v33  ;;  %v9324_v20 = vld [vmem:[#allocation16_spill] sm:$0xff]  ;;  %v9325_v16 = vld [vmem:[#allocation18_spill] sm:$0xff] }
 0x238   :  { %2277 = vmatmul.mubr.bf16.gmra.mxu1 %v6315_v39  ;;  %v9326_v39 = vld [vmem:[#allocation19_spill] sm:$0xff] }
 0x239   :  { %6229 = vmatpush1.bf16.msra.mxu1 %v6454_v8  ;;  %2284 = vmatprep.mubr.bf16.mxu1 %v6316_v60  ;;  %v9328_v60 = vld [vmem:[#allocation24_spill] sm:$0xff]  ;;  %v9329_v8 = vld [vmem:[#allocation27_spill] sm:$0xff] }
 0x23a   :  { %6220 = vmatprep.subr.bf16.mxu1 %v9311_v33 }
 0x23d   :  { %6230 = vmatpush1.bf16.msra.mxu1 %v6455_v58  ;;  %v9331_v58 = vld [vmem:[#allocation29_spill] sm:$0xff] }
 0x23e   :  { %6221 = vmatprep.subr.bf16.mxu1 %v9311_v33 }
 0x240   :  { %2285 = vmatmul.mubr.bf16.gmra.mxu1 %v6318_v47  ;;  %v9330_v47 = vld [vmem:[#allocation28_spill] sm:$0xff] }
 0x241   :  { %6231 = vmatpush1.bf16.msra.mxu1 %v6456_v34  ;;  %5267 = vmatprep.mubr.msk.bf16.mxu1 %vm1914_vm0, %v7909_v28  ;;  %v9332_v34 = vld [vmem:[#allocation30_spill] sm:$0xff] }
 0x242   :  { %6222 = vmatprep.subr.bf16.mxu1 %v9311_v33 }
 0x245   :  { %6232 = vmatpush1.bf16.msra.mxu1 %v6458_v1  ;;  %v7975_v1 = vld [vmem:[%s9174_s1 + $0x20] ss:$8 sps:$4 sm:$0xff]  }
 0x246   :  { %6223 = vmatprep.subr.bf16.mxu1 %v9311_v33  ;;  %9333 = vst [vmem:[#allocation7_spill] sm:$0xff] %v7975_v1 }
 0x249   :  { %6233 = vmatpush2.bf16.msra.mxu1 %v6459_v50  ;;  %v7981_v50 = vld [vmem:[%s9174_s1 + $0x34] ss:$8 sps:$4 sm:$0xff]  }
 0x24a   :  { %6224 = vmatprep.subr.bf16.mxu1 %v9311_v33  ;;  %9334 = vst [vmem:[#allocation8_spill] sm:$0xff] %v7981_v50 }
 0x24d   :  { %6234 = vmatpush2.bf16.msra.mxu1 %v6460_v22  ;;  %v7988_v22 = vld [vmem:[%s9174_s1 + $0x30] ss:$8 sps:$4 sm:$0xff]  }
 0x24e   :  { %2816 = vmatprep.subr.bf16.mxu1 %v9311_v33  ;;  %9335 = vst [vmem:[#allocation9_spill] sm:$0xff] %v7988_v22 }
 0x250   :  { %2470 = vmatmul.mubr.bf16.vlgmr.msra.gmra.mxu1 %v7920_v27 }
 0x251   :  { %2817 = vmatpush1.bf16.msra.mxu1 %v6319_v45  ;;  %5268 = vmatprep.mubr.msk.bf16.mxu1 %vm1914_vm0, %v7926_v38  ;;  %v7994_v45 = vld [vmem:[%s9174_s1 + $0x44] ss:$8 sps:$4 sm:$0xff]  }
 0x252   :  { %2818 = vmatprep.subr.bf16.mxu1 %v9311_v33  ;;  %9336 = vst [vmem:[#allocation10_spill] sm:$0xff] %v7994_v45 }
 0x255   :  { %2819 = vmatpush1.bf16.msra.mxu1 %v6320_v29  ;;  %v8001_v29 = vld [vmem:[%s9174_s1 + $0x40] ss:$8 sps:$4 sm:$0xff]  }
 0x256   :  { %2820 = vmatprep.subr.bf16.mxu1 %v9311_v33  ;;  %9337 = vst [vmem:[#allocation11_spill] sm:$0xff] %v8001_v29 }
 0x258   :  { %2478 = vmatmul.mubr.bf16.gmra.mxu1 %v7494_v52  ;;  %v6324_v52 = vld [vmem:[#allocation2 + $0x90] sm:$0xff]  }
 0x259   :  { %2821 = vmatpush1.bf16.msra.mxu1 %v6321_v2  ;;  %5269 = vmatprep.mubr.msk.bf16.mxu1 %vm1914_vm0, %v7499_v0  ;;  %v6325_v0 = vld [vmem:[#allocation2 + $0x88] sm:$0xff]   ;;  %v8007_v2 = vld [vmem:[%s9174_s1 + $0x54] ss:$8 sps:$4 sm:$0xff]  }
 0x25a   :  { %2822 = vmatprep.subr.bf16.mxu1 %v9311_v33  ;;  %9338 = vst [vmem:[#allocation12_spill] sm:$0xff] %v8007_v2 }
 0x25d   :  { %2823 = vmatpush1.bf16.msra.mxu1 %v6322_v21  ;;  %v8014_v21 = vld [vmem:[%s9174_s1 + $0x50] ss:$8 sps:$4 sm:$0xff]  }
 0x25e   :  { %2824 = vmatprep.subr.bf16.mxu1 %v9311_v33  ;;  %9339 = vst [vmem:[#allocation13_spill] sm:$0xff] %v8014_v21 }
 0x260   :  { %2486 = vmatmul.mubr.bf16.gmra.mxu1 %v7536_v61  ;;  %v6326_v61 = vld [vmem:[#allocation2 + $0x80] sm:$0xff]  }
 0x261   :  { %2825 = vmatpush1.bf16.msra.mxu1 %v6323_v32  ;;  %5270 = vmatprep.mubr.msk.bf16.mxu1 %vm1914_vm0, %v7541_v46  ;;  %v6327_v46 = vld [vmem:[#allocation2 + $0xc8] sm:$0xff]   ;;  %v8025_v32 = vld [vmem:[%s9174_s1 + $0x70] ss:$8 sps:$4 sm:$0xff]  }
 0x262   :  { %2826 = vmatprep.subr.bf16.mxu1 %v9311_v33  ;;  %9340 = vst [vmem:[#allocation14_spill] sm:$0xff] %v8025_v32 }
 0x265   :  { %2827 = vmatpush1.bf16.msra.mxu1 %v6324_v52  ;;  %v8031_v52 = vld [vmem:[%s9174_s1 + $0x84] ss:$8 sps:$4 sm:$0xff]  }
 0x266   :  { %2828 = vmatprep.subr.bf16.mxu1 %v9311_v33  ;;  %9341 = vst [vmem:[#allocation15_spill] sm:$0xff] %v8031_v52 }
 0x268   :  { %2494 = vmatmul.mubr.bf16.gmra.mxu1 %v9315_v53 }
 0x269   :  { %2829 = vmatpush1.bf16.msra.mxu1 %v6325_v0  ;;  %5271 = vmatprep.mubr.msk.bf16.mxu1 %vm1914_vm0, %v9316_v13  ;;  %v8038_v0 = vld [vmem:[%s9174_s1 + $0x80] ss:$8 sps:$4 sm:$0xff]  }
 0x26a   :  { %2830 = vmatprep.subr.bf16.mxu1 %v9311_v33  ;;  %9342 = vst [vmem:[#allocation16_spill] sm:$0xff] %v8038_v0 }
 0x26d   :  { %2831 = vmatpush1.bf16.msra.mxu1 %v6326_v61  ;;  %v8044_v61 = vld [vmem:[%s9174_s1 + $0x94] ss:$8 sps:$4 sm:$0xff]  }
 0x26e   :  { %2844 = vmatprep.subr.bf16.mxu1 %v9311_v33  ;;  %9343 = vst [vmem:[#allocation18_spill] sm:$0xff] %v8044_v61 }
 0x270   :  { %2502 = vmatmul.mubr.bf16.gmra.mxu1 %v9317_v17 }
 0x271   :  { %2845 = vmatpush2.bf16.msra.mxu1 %v6327_v46  ;;  %5272 = vmatprep.mubr.msk.bf16.mxu1 %vm1914_vm0, %v9318_v3 }
 0x272   :  { %2846 = vmatprep.subr.bf16.mxu1 %v9311_v33 }
 0x275   :  { %2847 = vmatpush2.bf16.msra.mxu1 %v6328_v51 }
 0x278   :  { %2510 = vmatmul.mubr.bf16.gmra.mxu1 %v9319_v26 }
 0x279   :  { %5273 = vmatprep.mubr.msk.bf16.mxu1 %vm1914_vm0, %v9320_v40 }
 0x280   :  { %2518 = vmatmul.mubr.bf16.gmra.mxu1 %v9321_v48 }
 0x281   :  { %5274 = vmatprep.mubr.msk.bf16.mxu1 %vm1914_vm0, %v9322_v54 }
 0x288   :  { %2526 = vmatmul.mubr.bf16.gmra.mxu1 %v9323_v15 }
 0x289   :  { %5275 = vmatprep.mubr.msk.bf16.mxu1 %vm1914_vm0, %v9324_v20 }
 0x290   :  { %2534 = vmatmul.mubr.bf16.gmra.mxu1 %v9325_v16 }
 0x291   :  { %5276 = vmatprep.mubr.msk.bf16.mxu1 %vm1914_vm0, %v9326_v39 }
 0x298   :  { %2542 = vmatmul.mubr.bf16.gmra.mxu1 %v9327_v49 }
 0x299   :  { %5303 = vmatprep.mubr.msk.bf16.mxu1 %vm1914_vm0, %v9328_v60 }
 0x2a0   :  { %2849 = vmatmul.mubr.bf16.vlgmr.msra.gmra.mxu1 %v9329_v8 }
 0x2a1   :  { %5304 = vmatprep.mubr.msk.bf16.mxu1 %vm1914_vm0, %v9330_v47 }
 0x2a8   :  { %2857 = vmatmul.mubr.bf16.gmra.mxu1 %v9331_v58 }
 0x2a9   :  { %5305 = vmatprep.mubr.msk.bf16.mxu1 %vm1914_vm0, %v9332_v34 }
 0x2b0   :  { %2865 = vmatmul.mubr.bf16.gmra.mxu1 %v7975_v1  ;;  %v9362_v1 = vld [vmem:[#allocation17_spill] sm:$0xff] }
 0x2b1   :  { %5306 = vmatprep.mubr.msk.bf16.mxu1 %vm1914_vm0, %v7981_v50 }
 0x2b8   :  { %2873 = vmatmul.mubr.bf16.gmra.mxu1 %v7988_v22 }
 0x2b9   :  { %5307 = vmatprep.mubr.msk.bf16.mxu1 %vm1914_vm0, %v7994_v45 }
 0x2c0   :  { %2881 = vmatmul.mubr.bf16.gmra.mxu1 %v8001_v29 }
 0x2c1   :  { %5308 = vmatprep.mubr.msk.bf16.mxu1 %vm1914_vm0, %v8007_v2 }
 0x2c8   :  { %2889 = vmatmul.mubr.bf16.gmra.mxu1 %v8014_v21 }
 0x2c9   :  { %5309 = vmatprep.mubr.msk.bf16.mxu1 %vm1914_vm0, %v7909_v28  ;;  %v9359_v28 = vld [vmem:[#allocation38_spill] sm:$0xff] }
 0x2d0   :  { %2897 = vmatmul.mubr.bf16.gmra.mxu1 %v7920_v27  ;;  %v9357_v27 = vld [vmem:[#allocation21_spill] sm:$0xff] }
 0x2d1   :  { %5310 = vmatprep.mubr.msk.bf16.mxu1 %vm1914_vm0, %v7926_v38 }
 0x2d8   :  { %2905 = vmatmul.mubr.bf16.gmra.mxu1 %v8025_v32 }
 0x2d9   :  { %5311 = vmatprep.mubr.msk.bf16.mxu1 %vm1914_vm0, %v8031_v52 }
 0x2e0   :  { %2913 = vmatmul.mubr.bf16.gmra.mxu1 %v8038_v0 }
 0x2e1   :  { %5312 = vmatprep.mubr.msk.bf16.mxu1 %vm1914_vm0, %v8044_v61 }
 0x2e8   :  { %v5951_v46 = vpop.f32.mrf.mxu1  ;;  %2921 = vmatmul.mubr.bf16.gmra.mxu1 %v9315_v53 }
 0x2e9   :  { %5313 = vmatprep.mubr.msk.bf16.mxu1 %vm1914_vm0, %v9316_v13 }
 0x2ea   :  { %v5952_v51 = vpop.f32.mrf.mxu1 }
 0x2eb   :  { %v8051_v60 = vadd.f32 %v5952_v51, %v5951_v46 }
 0x2ec   :  { %v5954_v8 = vpop.f32.mrf.mxu1 }
 0x2ed   :  { %9344 = vst [vmem:[#allocation19_spill] sm:$0xff] %v8051_v60 }
 0x2ee   :  { %v5955_v47 = vpop.f32.mrf.mxu1 }
 0x2ef   :  { %v8053_v58 = vadd.f32 %v5955_v47, %v5954_v8 }
 0x2f0   :  { %2929 = vmatmul.mubr.bf16.gmra.mxu1 %v9317_v17  ;;  %v5957_v34 = vpop.f32.mrf.mxu1 }
 0x2f1   :  { %9345 = vst [vmem:[#allocation22_spill] sm:$0xff] %v8053_v58  ;;  %5314 = vmatprep.mubr.msk.bf16.mxu1 %vm1914_vm0, %v9318_v3 }
 0x2f2   :  { %v5958_v61 = vpop.f32.mrf.mxu1 }
 0x2f3   :  { %v8058_v0 = vadd.f32 %v5958_v61, %v5957_v34  ;;  %v9354_v34 = vld [vmem:[#allocation25_spill] sm:$0xff] }
 0x2f4   :  { %v5960_v53 = vpop.f32.mrf.mxu1 }
 0x2f5   :  { %9346 = vst [vmem:[#allocation24_spill] sm:$0xff] %v8058_v0  ;;  %v9360_v0 = vld [vmem:[#allocation35_spill] sm:$0xff] }
 0x2f6   :  { %v5961_v52 = vpop.f32.mrf.mxu1 }
 0x2f7   :  { %v8060_v32 = vadd.f32 %v5961_v52, %v5960_v53 }
 0x2f8   :  { %2937 = vmatmul.mubr.bf16.gmra.mxu1 %v9319_v26  ;;  %v5963_v13 = vpop.f32.mrf.mxu1  ;;  %v6331_v26 = vld [vmem:[%s9175_s2 + $0x44] ss:$8 sps:$4 sm:$0xff]  }
 0x2f9   :  { %9347 = vst [vmem:[#allocation27_spill] sm:$0xff] %v8060_v32  ;;  %5315 = vmatprep.mubr.msk.bf16.mxu1 %vm1914_vm0, %v9320_v40  ;;  %2687 = vmatprep.mubr.bf16.mxu0 %v6331_v26 }
 0x2fa   :  { %v5964_v46 = vpop.f32.mrf.mxu1 }
 0x2fb   :  { %v8065_v51 = vadd.f32 %v5964_v46, %v5963_v13  ;;  %v9355_v46 = vld [vmem:[#allocation26_spill] sm:$0xff] }
 0x2fc   :  { %v8067_v17 = vpop.f32.mrf.mxu1 }
 0x2fd   :  { %9348 = vst [vmem:[#allocation28_spill] sm:$0xff] %v8065_v51  ;;  %9349 = vst [vmem:[#allocation29_spill] sm:$0xff] %v8067_v17 }
 0x2fe   :  { %v8069_v8 = vpop.f32.mrf.mxu1 }
 0x2ff   :  { %9350 = vst [vmem:[#allocation30_spill] sm:$0xff] %v8069_v8 }
 0x300   :  { %2945 = vmatmul.mubr.bf16.gmra.mxu1 %v9321_v48  ;;  %v5969_v3 = vpop.f32.mrf.mxu1 }
 0x301   :  { %5316 = vmatprep.mubr.msk.bf16.mxu1 %vm1914_vm0, %v9322_v54 }
 0x302   :  { %v5970_v52 = vpop.f32.mrf.mxu1 }
 0x303   :  { %v8074_v61 = vadd.f32 %v5970_v52, %v5969_v3 }
 0x304   :  { %v8082_v40 = vpop.f32.mrf.mxu1 }
 0x305   :  { %9351 = vst [vmem:[#allocation42_spill] sm:$0xff] %v8074_v61  ;;  %9352 = vst [vmem:[#allocation43_spill] sm:$0xff] %v8082_v40  ;;  %v9356_v61 = vld [vmem:[#allocation20_spill] sm:$0xff] }
 0x306   :  { %v8084_v48 = vpop.f32.mrf.mxu1 }
 0x307   :  { %9353 = vst [vmem:[#allocation44_spill] sm:$0xff] %v8084_v48 }
 0x308   :  { %2953 = vmatmul.mubr.bf16.gmra.mxu1 %v9323_v15 }
 0x309   :  { %5317 = vmatprep.mubr.msk.bf16.mxu1 %vm1914_vm0, %v9324_v20 }
 0x310   :  { %v2471_v47 = vpop.f32.mrf.mxu1  ;;  %2961 = vmatmul.mubr.bf16.gmra.mxu1 %v9325_v16 }
 0x311   :  { %5318 = vmatprep.mubr.msk.bf16.mxu1 %vm1914_vm0, %v9326_v39  ;;  %v2472_v53 = vadd.f32 %v2471_v47, %v9354_v34 }
 0x312   :  { %v2473_v54 = vpop.f32.mrf.mxu1 }
 0x313   :  { %v2562_v52 = vmax.f32 %v2472_v53, 0.0 }
 0x314   :  { %v2474_v13 = vpop.f32.mrf.mxu1 }
 0x315   :  { %v2475_v3 = vadd.f32 %v2474_v13, %v9355_v46 }
 0x316   :  { %v2476_v15 = vpop.f32.mrf.mxu1 }
 0x317   :  { %v2563_v26 = vmax.f32 %v2475_v3, 0.0  ;;  %v9358_v15 = vld [vmem:[#allocation37_spill] sm:$0xff] }
 0x318   :  { %v2479_v20 = vpop.f32.mrf.mxu1  ;;  %2969 = vmatmul.mubr.bf16.gmra.mxu1 %v9327_v49 }
 0x319   :  { %v8092_v40 = vpack.c.bf16 %v2563_v26, %v2562_v52  ;;  %v2480_v16 = vadd.f32 %v2479_v20, %v9356_v61 }
 0x31a   :  { %v2481_v48 = vpop.f32.mrf.mxu1 }
 0x31b   :  { %v2564_v8 = vmax.f32 %v2480_v16, 0.0  ;;  %v9361_v16 = vld [vmem:[#allocation36_spill] sm:$0xff] }
 0x31c   :  { %v2482_v38 = vpop.f32.mrf.mxu1 }
 0x31d   :  { %v2483_v39 = vadd.f32 %v2482_v38, %v9357_v27 }
 0x31e   :  { %v2484_v54 = vpop.f32.mrf.mxu1 }
 0x31f   :  { %v2565_v47 = vmax.f32 %v2483_v39, 0.0 }
 0x320   :  { %v2487_v17 = vpop.f32.mrf.mxu1 }
 0x321   :  { %v2589_v51 = vpack.c.bf16 %v2565_v47, %v2564_v8  ;;  %v2488_v53 = vadd.f32 %v2487_v17, %v9358_v15 }
 0x322   :  { %v2489_v13 = vpop.f32.mrf.mxu1 }
 0x323   :  { %v2566_v52 = vmax.f32 %v2488_v53, 0.0 }
 0x324   :  { %v2490_v3 = vpop.f32.mrf.mxu1 }
 0x325   :  { %v2491_v32 = vadd.f32 %v2490_v3, %v9359_v28 }
 0x326   :  { %v2492_v49 = vpop.f32.mrf.mxu1 }
 0x327   :  { %v2567_v26 = vmax.f32 %v2491_v32, 0.0 }
 0x328   :  { %v2495_v48 = vpop.f32.mrf.mxu1 }
 0x329   :  { %v8098_v21 = vpack.c.bf16 %v2567_v26, %v2566_v52  ;;  %v2496_v38 = vadd.f32 %v2495_v48, %v9360_v0 }
 0x32a   :  { %v2497_v20 = vpop.f32.mrf.mxu1 }
 0x32b   :  { %v2568_v8 = vmax.f32 %v2496_v38, 0.0 }
 0x32c   :  { %v2498_v54 = vpop.f32.mrf.mxu1 }
 0x32d   :  { %v2499_v39 = vadd.f32 %v2498_v54, %v9361_v16 }
 0x32e   :  { %v2500_v2 = vpop.f32.mrf.mxu1 }
 0x32f   :  { %v2569_v47 = vmax.f32 %v2499_v39, 0.0 }
 0x330   :  { %v8102_v13 = vpop.f32.mrf.mxu1 }
 0x331   :  { %v8104_v17 = vpack.c.bf16 %v2569_v47, %v2568_v8 }
 0x332   :  { %v2505_v3 = vpop.f32.mrf.mxu1 }
 0x334   :  { %v2506_v49 = vpop.f32.mrf.mxu1 }
 0x336   :  { %v2508_v53 = vpop.f32.mrf.mxu1 }
 0x338   :  { %v2511_v32 = vpop.f32.mrf.mxu1 }
 0x33a   :  { %v2513_v58 = vpop.f32.mrf.mxu1 }
 0x33c   :  { %v2514_v52 = vpop.f32.mrf.mxu1 }
 0x33e   :  { %v2516_v26 = vpop.f32.mrf.mxu1 }
 0x340   :  { %v2519_v20 = vpop.f32.mrf.mxu1 }
 0x342   :  { %v2521_v29 = vpop.f32.mrf.mxu1 }
 0x344   :  { %v2522_v48 = vpop.f32.mrf.mxu1 }
 0x346   :  { %v2524_v60 = vpop.f32.mrf.mxu1 }
 0x348   :  { %v2527_v45 = vpop.f32.mrf.mxu1 }
 0x34a   :  { %v2529_v54 = vpop.f32.mrf.mxu1 }
 0x34c   :  { %v2530_v2 = vpop.f32.mrf.mxu1 }
 0x34d   :  { %v2531_v54 = vadd.f32 %v2530_v2, %v7720_v14  ;;  %v2520_v2 = vadd.f32 %v2519_v20, %v7739_v6 }
 0x34e   :  { %v2532_v38 = vpop.f32.mrf.mxu1 }
 0x350   :  { %v2535_v39 = vpop.f32.mrf.mxu1 }
 0x351   :  { %v2536_v26 = vadd.f32 %v2535_v39, %v7684_v18 }
 0x352   :  { %v2537_v22 = vpop.f32.mrf.mxu1 }
 0x353   :  { %v2578_v28 = vmax.f32 %v2536_v26, 0.0 }
 0x354   :  { %v2538_v50 = vpop.f32.mrf.mxu1 }
 0x355   :  { %v2539_v53 = vadd.f32 %v2538_v50, %v7691_v55  ;;  %v2523_v50 = vadd.f32 %v2522_v48, %v7741_v23 }
 0x356   :  { %v2540_v8 = vpop.f32.mrf.mxu1 }
 0x357   :  { %v2579_v16 = vmax.f32 %v2539_v53, 0.0  ;;  %v2528_v8 = vadd.f32 %v2527_v45, %v7705_v19  ;;  %v2515_v45 = vadd.f32 %v2514_v52, %v7755_v9 }
 0x358   :  { %v2543_v47 = vpop.f32.mrf.mxu1 }
 0x359   :  { %v2544_v58 = vadd.f32 %v2543_v47, %v9362_v1  ;;  %v2577_v47 = vmax.f32 %v2531_v54, 0.0  ;;  %v2596_v1 = vpack.c.bf16 %v2579_v16, %v2578_v28  ;;  %v2576_v53 = vmax.f32 %v2528_v8, 0.0 }
 0x35a   :  { %v2545_v3 = vpop.f32.mrf.mxu1  ;;  %v2512_v16 = vadd.f32 %v2511_v32, %v7750_v4  ;;  %v2507_v54 = vadd.f32 %v2506_v49, %v7766_v35 }
 0x35b   :  { %v2580_v38 = vmax.f32 %v2544_v58, 0.0 }
 0x35c   :  { %v2546_v33 = vpop.f32.mrf.mxu1  ;;  %v2572_v8 = vmax.f32 %v2512_v16, 0.0 }
 0x35d   :  { %v2547_v29 = vadd.f32 %v2546_v33, %v7665_v12 }
 0x35e   :  { %v2548_v60 = vpop.f32.mrf.mxu1 }
 0x35f   :  { %v2581_v0 = vmax.f32 %v2547_v29, 0.0 }
 0x360   :  { %v2850_v22 = vpop.f32.mrf.mxu1 }
 0x361   :  { %v2597_v3 = vpack.c.bf16 %v2581_v0, %v2580_v38  ;;  %v2851_v39 = vadd.f32 %v2850_v22, %v7785_v57  ;;  %v2575_v0 = vmax.f32 %v2523_v50, 0.0  ;;  %v2571_v50 = vmax.f32 %v2507_v54, 0.0 }
 0x362   :  { %v2852_v15 = vpop.f32.mrf.mxu1 }
 0x363   :  { %5975 = vmatprep.subr.bf16.mxu0 %v2597_v3  ;;  %v2595_v15 = vpack.c.bf16 %v2577_v47, %v2576_v53  ;;  %v2977_v29 = vmax.f32 %v2851_v39, 0.0 }
 0x364   :  { %5976 = vmatpush3.bf16.msra.mxu0 %v2589_v51  ;;  %v2853_v33 = vpop.f32.mrf.mxu1  ;;  %v2574_v51 = vmax.f32 %v2520_v2, 0.0 }
 0x365   :  { %v2854_v58 = vadd.f32 %v2853_v33, %v7788_v44  ;;  %5977 = vmatprep.subr.bf16.mxu0 %v2596_v1  ;;  %v2573_v1 = vmax.f32 %v2515_v45, 0.0 }
 0x366   :  { %v2855_v26 = vpop.f32.mrf.mxu1  ;;  %v2594_v38 = vpack.c.bf16 %v2575_v0, %v2574_v51 }
 0x367   :  { %v2978_v48 = vmax.f32 %v2854_v58, 0.0  ;;  %v2593_v47 = vpack.c.bf16 %v2573_v1, %v2572_v8 }
 0x368   :  { %5978 = vmatpush3.bf16.msra.mxu0 %v8092_v40  ;;  %v2858_v28 = vpop.f32.mrf.mxu1  ;;  %v2504_v40 = vadd.f32 %v8102_v13, %v7764_v30 }
 0x369   :  { %v8119_v60 = vpack.c.bf16 %v2978_v48, %v2977_v29  ;;  %5979 = vmatprep.subr.bf16.mxu0 %v2595_v15  ;;  %v2859_v52 = vadd.f32 %v2858_v28, %v7777_v41 }
 0x36a   :  { %v2860_v20 = vpop.f32.mrf.mxu1  ;;  %v2570_v2 = vmax.f32 %v2504_v40, 0.0 }
 0x36b   :  { %v2979_v39 = vmax.f32 %v2859_v52, 0.0 }
 0x36c   :  { %5980 = vmatpush3.bf16.msra.mxu0 %v7898_v37  ;;  %v2861_v22 = vpop.f32.mrf.mxu1  ;;  %v2592_v58 = vpack.c.bf16 %v2571_v50, %v2570_v2 }
 0x36d   :  { %v2862_v32 = vadd.f32 %v2861_v22, %v7779_v10  ;;  %5981 = vmatprep.subr.bf16.mxu0 %v2594_v38  ;;  %v6332_v38 = vld [vmem:[%s9175_s2 + $0x54] ss:$8 sps:$4 sm:$0xff]  }
 0x36e   :  { %v2863_v3 = vpop.f32.mrf.mxu1 }
 0x36f   :  { %v2980_v33 = vmax.f32 %v2862_v32, 0.0 }
 0x370   :  { %5982 = vmatpush3.bf16.msra.mxu0 %v7886_v56  ;;  %v2866_v49 = vpop.f32.mrf.mxu1 }
 0x371   :  { %v8128_v53 = vpack.c.bf16 %v2980_v33, %v2979_v39  ;;  %5983 = vmatprep.subr.bf16.mxu0 %v2593_v47  ;;  %v2867_v13 = vadd.f32 %v2866_v49, %v7769_v43  ;;  %v6335_v47 = vld [vmem:[%s9175_s2 + $0x64] ss:$8 sps:$4 sm:$0xff]  }
 0x372   :  { %v2868_v37 = vpop.f32.mrf.mxu1 }
 0x373   :  { %v2981_v15 = vmax.f32 %v2867_v13, 0.0 }
 0x374   :  { %5984 = vmatpush3.bf16.msra.mxu0 %v7874_v7  ;;  %v2869_v45 = vpop.f32.mrf.mxu1 }
 0x375   :  { %v2870_v26 = vadd.f32 %v2869_v45, %v7771_v25  ;;  %5985 = vmatprep.subr.bf16.mxu0 %v2592_v58 }
 0x376   :  { %v2871_v0 = vpop.f32.mrf.mxu1 }
 0x377   :  { %v2982_v29 = vmax.f32 %v2870_v26, 0.0  ;;  %v6337_v26 = vld [vmem:[%s9175_s2 + $0x60] ss:$8 sps:$4 sm:$0xff]  }
 0x378   :  { %5986 = vmatpush3.bf16.msra.mxu0 %v7860_v36  ;;  %v2874_v56 = vpop.f32.mrf.mxu1  ;;  %v6329_v36 = vld [vmem:[%s9175_s2 + $0x40] ss:$8 sps:$4 sm:$0xff]  }
 0x379   :  { %v8134_v48 = vpack.c.bf16 %v2982_v29, %v2981_v15  ;;  %5987 = vmatprep.subr.bf16.mxu0 %v8104_v17  ;;  %v2875_v16 = vadd.f32 %v2874_v56, %v7757_v31  ;;  %v6338_v15 = vld [vmem:[%s9175_s2 + $0x74] ss:$8 sps:$4 sm:$0xff]  }
 0x37a   :  { %v2876_v28 = vpop.f32.mrf.mxu1 }
 0x37b   :  { %v2983_v54 = vmax.f32 %v2875_v16, 0.0 }
 0x37c   :  { %5988 = vmatpush3.bf16.msra.mxu0 %v7854_v59  ;;  %v2877_v7 = vpop.f32.mrf.mxu1 }
 0x37d   :  { %v2878_v51 = vadd.f32 %v2877_v7, %v7759_v11  ;;  %5989 = vmatprep.subr.bf16.mxu0 %v8098_v21 }
 0x37e   :  { %v2879_v20 = vpop.f32.mrf.mxu1 }
 0x37f   :  { %v2984_v1 = vmax.f32 %v2878_v51, 0.0 }
 0x380   :  { %5990 = vmatpush3.bf16.msra.mxu0 %v7845_v63  ;;  %v2882_v17 = vpop.f32.mrf.mxu1  ;;  %v6334_v63 = vld [vmem:[%s9175_s2 + $0x50] ss:$8 sps:$4 sm:$0xff]  }
 0x381   :  { %v8148_v59 = vpack.c.bf16 %v2984_v1, %v2983_v54  ;;  %v2883_v22 = vadd.f32 %v2882_v17, %v7746_v62  ;;  %v6340_v1 = vld [vmem:[%s9175_s2 + $0x70] ss:$8 sps:$4 sm:$0xff]   ;;  %v6343_v17 = vld [vmem:[%s9175_s2 + $0x84] ss:$8 sps:$4 sm:$0xff]  }
 0x382   :  { %v2884_v52 = vpop.f32.mrf.mxu1 }
 0x383   :  { %2688 = vmatmul.mubr.bf16.vlgmr.msra.gmra.mxu0 %v6329_v36  ;;  %v2985_v32 = vmax.f32 %v2883_v22, 0.0 }
 0x384   :  { %v2885_v21 = vpop.f32.mrf.mxu1  ;;  %2695 = vmatprep.mubr.bf16.mxu0 %v6332_v38 }
 0x385   :  { %v2886_v40 = vadd.f32 %v2885_v21, %v7748_v5 }
 0x386   :  { %v2887_v8 = vpop.f32.mrf.mxu1 }
 0x387   :  { %v2986_v3 = vmax.f32 %v2886_v40, 0.0 }
 0x388   :  { %v2890_v50 = vpop.f32.mrf.mxu1 }
 0x389   :  { %v8158_v39 = vpack.c.bf16 %v2986_v3, %v2985_v32  ;;  %v2891_v49 = vadd.f32 %v2890_v50, %v7722_v24 }
 0x38a   :  { %v2892_v33 = vpop.f32.mrf.mxu1 }
 0x38b   :  { %2696 = vmatmul.mubr.bf16.gmra.mxu0 %v6334_v63  ;;  %v2987_v13 = vmax.f32 %v2891_v49, 0.0  ;;  %v9363_v33 = vld [vmem:[#allocation37_spill] sm:$0xff] }
 0x38c   :  { %v2893_v2 = vpop.f32.mrf.mxu1  ;;  %2703 = vmatprep.mubr.bf16.mxu0 %v6335_v47 }
 0x38d   :  { %v2894_v37 = vadd.f32 %v2893_v2, %v7724_v42 }
 0x38e   :  { %v2895_v58 = vpop.f32.mrf.mxu1 }
 0x38f   :  { %v2988_v45 = vmax.f32 %v2894_v37, 0.0  ;;  %v9364_v37 = vld [vmem:[#allocation38_spill] sm:$0xff] }
 0x390   :  { %v2898_v0 = vpop.f32.mrf.mxu1 }
 0x391   :  { %v8168_v29 = vpack.c.bf16 %v2988_v45, %v2987_v13  ;;  %v2899_v28 = vadd.f32 %v2898_v0, %v9354_v34 }
 0x392   :  { %v2900_v56 = vpop.f32.mrf.mxu1 }
 0x393   :  { %2704 = vmatmul.mubr.bf16.gmra.mxu0 %v6337_v26  ;;  %v2989_v20 = vmax.f32 %v2899_v28, 0.0  ;;  %v9365_v28 = vld [vmem:[#allocation35_spill] sm:$0xff] }
 0x394   :  { %v2901_v16 = vpop.f32.mrf.mxu1  ;;  %2711 = vmatprep.mubr.bf16.mxu0 %v6338_v15 }
 0x395   :  { %v2902_v7 = vadd.f32 %v2901_v16, %v9355_v46 }
 0x396   :  { %v2903_v51 = vpop.f32.mrf.mxu1 }
 0x397   :  { %v2990_v54 = vmax.f32 %v2902_v7, 0.0  ;;  %v9366_v51 = vld [vmem:[#allocation36_spill] sm:$0xff] }
 0x398   :  { %v2906_v36 = vpop.f32.mrf.mxu1 }
 0x399   :  { %v8178_v38 = vpack.c.bf16 %v2990_v54, %v2989_v20  ;;  %v2907_v22 = vadd.f32 %v2906_v36, %v9356_v61 }
 0x39a   :  { %v2908_v52 = vpop.f32.mrf.mxu1 }
 0x39b   :  { %2712 = vmatmul.mubr.bf16.gmra.mxu0 %v6340_v1  ;;  %v2991_v32 = vmax.f32 %v2907_v22, 0.0 }
 0x39c   :  { %v2909_v21 = vpop.f32.mrf.mxu1  ;;  %3114 = vmatprep.mubr.bf16.mxu0 %v6343_v17 }
 0x39d   :  { %v2910_v40 = vadd.f32 %v2909_v21, %v9357_v27 }
 0x39e   :  { %v2911_v8 = vpop.f32.mrf.mxu1 }
 0x39f   :  { %v2992_v3 = vmax.f32 %v2910_v40, 0.0 }
 0x3a0   :  { %v2914_v63 = vpop.f32.mrf.mxu1 }
 0x3a1   :  { %v3016_v50 = vpack.c.bf16 %v2992_v3, %v2991_v32  ;;  %v2915_v49 = vadd.f32 %v2914_v63, %v9363_v33 }
 0x3a2   :  { %v2916_v47 = vpop.f32.mrf.mxu1 }
 0x3a3   :  { %v2993_v45 = vmax.f32 %v2915_v49, 0.0 }
 0x3a4   :  { %v2917_v2 = vpop.f32.mrf.mxu1 }
 0x3a5   :  { %v2918_v58 = vadd.f32 %v2917_v2, %v9364_v37 }
 0x3a6   :  { %v2919_v13 = vpop.f32.mrf.mxu1 }
 0x3a7   :  { %v2994_v26 = vmax.f32 %v2918_v58, 0.0 }
 0x3a8   :  { %v2922_v0 = vpop.f32.mrf.mxu1 }
 0x3a9   :  { %v8184_v15 = vpack.c.bf16 %v2994_v26, %v2993_v45  ;;  %v2923_v16 = vadd.f32 %v2922_v0, %v9365_v28 }
 0x3aa   :  { %v2924_v56 = vpop.f32.mrf.mxu1 }
 0x3ab   :  { %v2995_v1 = vmax.f32 %v2923_v16, 0.0 }
 0x3ac   :  { %v2925_v7 = vpop.f32.mrf.mxu1 }
 0x3ad   :  { %v2926_v20 = vadd.f32 %v2925_v7, %v9366_v51 }
 0x3ae   :  { %v2927_v54 = vpop.f32.mrf.mxu1 }
 0x3af   :  { %v2996_v36 = vmax.f32 %v2926_v20, 0.0 }
 0x3b0   :  { %v2930_v17 = vpop.f32.mrf.mxu1 }
 0x3b1   :  { %v8188_v52 = vpack.c.bf16 %v2996_v36, %v2995_v1 }
 0x3b2   :  { %v2932_v22 = vpop.f32.mrf.mxu1 }
 0x3b3   :  { %v9367_v22 = vld [vmem:[#allocation17_spill] sm:$0xff] }
 0x3b4   :  { %v2933_v21 = vpop.f32.mrf.mxu1 }
 0x3b6   :  { %v2935_v40 = vpop.f32.mrf.mxu1 }
 0x3b8   :  { %v2938_v8 = vpop.f32.mrf.mxu1 }
 0x3ba   :  { %v2940_v32 = vpop.f32.mrf.mxu1 }
 0x3bc   :  { %v2941_v3 = vpop.f32.mrf.mxu1 }
 0x3be   :  { %v2943_v63 = vpop.f32.mrf.mxu1 }
 0x3c0   :  { %v2946_v47 = vpop.f32.mrf.mxu1 }
 0x3c2   :  { %v2948_v49 = vpop.f32.mrf.mxu1 }
 0x3c4   :  { %v2949_v2 = vpop.f32.mrf.mxu1 }
 0x3c6   :  { %v2951_v58 = vpop.f32.mrf.mxu1 }
 0x3c8   :  { %v2954_v13 = vpop.f32.mrf.mxu1 }
 0x3ca   :  { %v2956_v45 = vpop.f32.mrf.mxu1 }
 0x3cc   :  { %v2957_v26 = vpop.f32.mrf.mxu1 }
 0x3cd   :  { %v2958_v45 = vadd.f32 %v2957_v26, %v7720_v14 }
 0x3ce   :  { %v2959_v0 = vpop.f32.mrf.mxu1 }
 0x3d0   :  { %v2962_v56 = vpop.f32.mrf.mxu1 }
 0x3d1   :  { %v2963_v63 = vadd.f32 %v2962_v56, %v7684_v18  ;;  %v2947_v56 = vadd.f32 %v2946_v47, %v7739_v6 }
 0x3d2   :  { %v2964_v16 = vpop.f32.mrf.mxu1 }
 0x3d3   :  { %v2955_v16 = vadd.f32 %v2954_v13, %v7705_v19  ;;  %v2939_v13 = vadd.f32 %v2938_v8, %v7750_v4  ;;  %v6358_v8 = vld [vmem:[%s9175_s2 + $0xb4] ss:$8 sps:$4 sm:$0xff]  }
 0x3d4   :  { %v2965_v7 = vpop.f32.mrf.mxu1 }
 0x3d5   :  { %v2966_v36 = vadd.f32 %v2965_v7, %v7691_v55  ;;  %v3004_v7 = vmax.f32 %v2958_v45, 0.0  ;;  %v6359_v45 = vld [vmem:[#allocation2 + $0xc8] sm:$0xff]  }
 0x3d6   :  { %v2967_v20 = vpop.f32.mrf.mxu1 }
 0x3d7   :  { %v3006_v51 = vmax.f32 %v2966_v36, 0.0  ;;  %v3005_v20 = vmax.f32 %v2963_v63, 0.0  ;;  %v6354_v63 = vld [vmem:[#allocation2 + $0xd8] sm:$0xff]  }
 0x3d8   :  { %v2970_v54 = vpop.f32.mrf.mxu1 }
 0x3d9   :  { %v2971_v40 = vadd.f32 %v2970_v54, %v9367_v22  ;;  %v3023_v55 = vpack.c.bf16 %v3006_v51, %v3005_v20  ;;  %v3003_v54 = vmax.f32 %v2955_v16, 0.0  ;;  %v6360_v16 = vld [vmem:[#allocation2 + $0xc0] sm:$0xff]   ;;  %v6361_v20 = vld [vmem:[#allocation2 + $0x108] sm:$0xff]  }
 0x3da   :  { %v2972_v1 = vpop.f32.mrf.mxu1 }
 0x3db   :  { %v3007_v0 = vmax.f32 %v2971_v40, 0.0  ;;  %v2950_v1 = vadd.f32 %v2949_v2, %v7741_v23  ;;  %v3022_v36 = vpack.c.bf16 %v3004_v7, %v3003_v54  ;;  %v3001_v40 = vmax.f32 %v2947_v56, 0.0  ;;  %v6363_v7 = vld [vmem:[#allocation2 + $0x138] sm:$0xff]   ;;  %v8253_v56 = vld [vmem:[%s9174_s1] ss:$8 sps:$4 sm:$0xff]  }
 0x3dc   :  { %v2973_v32 = vpop.f32.mrf.mxu1  ;;  %v8259_v54 = vld [vmem:[%s9174_s1 + $0x14] ss:$8 sps:$4 sm:$0xff]  }
 0x3dd   :  { %v2974_v49 = vadd.f32 %v2973_v32, %v7665_v12  ;;  %v2942_v32 = vadd.f32 %v2941_v3, %v7755_v9  ;;  %v3002_v26 = vmax.f32 %v2950_v1, 0.0  ;;  %v6362_v1 = vld [vmem:[#allocation2 + $0x100] sm:$0xff]  }
 0x3de   :  { %v2975_v58 = vpop.f32.mrf.mxu1 }
 0x3df   :  { %v3008_v28 = vmax.f32 %v2974_v49, 0.0  ;;  %v3000_v2 = vmax.f32 %v2942_v32, 0.0  ;;  %v3021_v51 = vpack.c.bf16 %v3002_v26, %v3001_v40  ;;  %v6355_v49 = vld [vmem:[#allocation2 + $0xd0] sm:$0xff]   ;;  %v6365_v26 = vld [vmem:[#allocation2 + $0x128] sm:$0xff]   ;;  %v6366_v40 = vld [vmem:[#allocation2 + $0x120] sm:$0xff]  }
 0x3e0   :  { %v6356_v58 = vld [vmem:[%s9175_s2 + $0xb0] ss:$8 sps:$4 sm:$0xff]  }
 0x3e1   :  { %v3024_v37 = vpack.c.bf16 %v3008_v28, %v3007_v0  ;;  %v2934_v28 = vadd.f32 %v2933_v21, %v7766_v35  ;;  %v6351_v21 = vld [vmem:[%s9175_s2 + $0xa0] ss:$8 sps:$4 sm:$0xff]   ;;  %v8242_v0 = vld [vmem:[%s9174_s1 + $0x4] ss:$8 sps:$4 sm:$0xff]   ;;  %v6364_v32 = vld [vmem:[#allocation2 + $0x130] sm:$0xff]  }
 0x3e3   :  { %6015 = vmatprep.subr.bf16.mxu0 %v3024_v37  ;;  %v2999_v37 = vmax.f32 %v2939_v13, 0.0  ;;  %v8274_v13 = vld [vmem:[%s9174_s1 + $0x24] ss:$8 sps:$4 sm:$0xff]  }
 0x3e4   :  { %6016 = vmatpush3.bf16.msra.mxu0 %v3016_v50  ;;  %v2931_v50 = vadd.f32 %v2930_v17, %v7764_v30  ;;  %v6344_v17 = vld [vmem:[#allocation2 + $0xf8] sm:$0xff]  }
 0x3e5   :  { %6017 = vmatprep.subr.bf16.mxu0 %v3023_v55  ;;  %v2998_v55 = vmax.f32 %v2934_v28, 0.0  ;;  %v3020_v3 = vpack.c.bf16 %v3000_v2, %v2999_v37  ;;  %v6367_v28 = vld [vmem:[#allocation2 + $0x118] sm:$0xff]   ;;  %v6369_v37 = vld [vmem:[#allocation2 + $0x108] sm:$0xff]  }
 0x3e6   :  { %v2997_v47 = vmax.f32 %v2931_v50, 0.0  ;;  %v9369_v2 = vld [vmem:[#allocation7_spill] sm:$0xff] }
 0x3e7   :  { %v6368_v50 = vld [vmem:[#allocation2 + $0x110] sm:$0xff]  }
 0x3e8   :  { %6018 = vmatpush3.bf16.msra.mxu0 %v8178_v38  ;;  %v3019_v38 = vpack.c.bf16 %v2998_v55, %v2997_v47  ;;  %v9372_v47 = vld [vmem:[#allocation10_spill] sm:$0xff] }
 0x3e9   :  { %6019 = vmatprep.subr.bf16.mxu0 %v3022_v36  ;;  %v8268_v36 = vld [vmem:[%s9174_s1 + $0x10] ss:$8 sps:$4 sm:$0xff]  }
 0x3ea   :  { %v8413_v30 = vld [vmem:[%s9174_s1 + $0xf0] ss:$8 sps:$4 sm:$0xff]  }
 0x3ec   :  { %6020 = vmatpush3.bf16.msra.mxu0 %v8168_v29  ;;  %v6341_v29 = vld [vmem:[%s9175_s2 + $0x80] ss:$8 sps:$4 sm:$0xff]  }
 0x3ed   :  { %6021 = vmatprep.subr.bf16.mxu0 %v3021_v51  ;;  %v9370_v51 = vld [vmem:[#allocation8_spill] sm:$0xff] }
 0x3f0   :  { %6022 = vmatpush3.bf16.msra.mxu0 %v8158_v39  ;;  %v6346_v39 = vld [vmem:[%s9175_s2 + $0x94] ss:$8 sps:$4 sm:$0xff]  }
 0x3f1   :  { %6023 = vmatprep.subr.bf16.mxu0 %v3020_v3  ;;  %v9371_v3 = vld [vmem:[#allocation9_spill] sm:$0xff] }
 0x3f4   :  { %6024 = vmatpush3.bf16.msra.mxu0 %v8148_v59  ;;  %v9368_v59 = vmov 0  }
 0x3f5   :  { %6025 = vmatprep.subr.bf16.mxu0 %v3019_v38 }
 0x3f8   :  { %6026 = vmatpush3.bf16.msra.mxu0 %v8134_v48  ;;  %v6348_v48 = vld [vmem:[%s9175_s2 + $0x90] ss:$8 sps:$4 sm:$0xff]  }
 0x3f9   :  { %6027 = vmatprep.subr.bf16.mxu0 %v8188_v52  ;;  %v6350_v52 = vld [vmem:[#allocation2 + $0xe0] sm:$0xff]  }
 0x3fc   :  { %6028 = vmatpush3.bf16.msra.mxu0 %v8128_v53  ;;  %v6345_v53 = vld [vmem:[#allocation2 + $0xf0] sm:$0xff]  }
 0x3fd   :  { %6029 = vmatprep.subr.bf16.mxu0 %v8184_v15  ;;  %v6349_v15 = vld [vmem:[#allocation2 + $0xe8] sm:$0xff]  }
 0x400   :  { %6030 = vmatpush3.bf16.msra.mxu0 %v8119_v60  ;;  %v6353_v60 = vld [vmem:[%s9175_s2 + $0xa4] ss:$8 sps:$4 sm:$0xff]  }
 0x401   :  { %3243 = vmatprep.subr.bf16.mxu0 %v9368_v59 }
 0x403   :  { %3115 = vmatmul.mubr.bf16.vlgmr.msra.gmra.mxu0 %v6341_v29 }
 0x404   :  { %3244 = vmatpush1.bf16.msra.mxu0 %v6344_v17  ;;  %3122 = vmatprep.mubr.bf16.mxu0 %v6346_v39  ;;  %v6370_v39 = vld [vmem:[#allocation2 + $0x100] sm:$0xff]  }
 0x405   :  { %3245 = vmatprep.subr.bf16.mxu0 %v9368_v59 }
 0x408   :  { %3246 = vmatpush1.bf16.msra.mxu0 %v6345_v53  ;;  %v9373_v53 = vld [vmem:[#allocation19_spill] sm:$0xff] }
 0x409   :  { %3247 = vmatprep.subr.bf16.mxu0 %v9368_v59 }
 0x40b   :  { %3123 = vmatmul.mubr.bf16.gmra.mxu0 %v6348_v48 }
 0x40c   :  { %3248 = vmatpush1.bf16.msra.mxu0 %v6349_v15  ;;  %3130 = vmatprep.mubr.bf16.mxu0 %v6353_v60 }
 0x40d   :  { %3249 = vmatprep.subr.bf16.mxu0 %v9368_v59 }
 0x410   :  { %3250 = vmatpush1.bf16.msra.mxu0 %v6350_v52  ;;  %v6371_v52 = vld [vmem:[#allocation2 + $0x148] sm:$0xff]  }
 0x411   :  { %3251 = vmatprep.subr.bf16.mxu0 %v9368_v59 }
 0x413   :  { %3131 = vmatmul.mubr.bf16.gmra.mxu0 %v6351_v21 }
 0x414   :  { %3252 = vmatpush1.bf16.msra.mxu0 %v6354_v63  ;;  %3138 = vmatprep.mubr.bf16.mxu0 %v6358_v8  ;;  %v9374_v8 = vld [vmem:[#allocation11_spill] sm:$0xff]  ;;  %v9375_v63 = vld [vmem:[#allocation22_spill] sm:$0xff] }
 0x415   :  { %3253 = vmatprep.subr.bf16.mxu0 %v9368_v59 }
 0x418   :  { %3254 = vmatpush1.bf16.msra.mxu0 %v6355_v49 }
 0x419   :  { %3255 = vmatprep.subr.bf16.mxu0 %v9368_v59 }
 0x41b   :  { %3139 = vmatmul.mubr.bf16.gmra.mxu0 %v6356_v58  ;;  %v9376_v58 = vld [vmem:[#allocation12_spill] sm:$0xff] }
 0x41c   :  { %3256 = vmatpush1.bf16.msra.mxu0 %v6359_v45  ;;  %5345 = vmatprep.mubr.msk.bf16.mxu0 %vm1914_vm0, %v8242_v0 }
 0x41d   :  { %3257 = vmatprep.subr.bf16.mxu0 %v9368_v59 }
 0x420   :  { %3258 = vmatpush1.bf16.msra.mxu0 %v6360_v16 }
 0x421   :  { %3271 = vmatprep.subr.bf16.mxu0 %v9368_v59 }
 0x424   :  { %3272 = vmatpush2.bf16.msra.mxu0 %v6361_v20  ;;  %v6372_v20 = vld [vmem:[#allocation2 + $0x140] sm:$0xff]  }
 0x425   :  { %3273 = vmatprep.subr.bf16.mxu0 %v9368_v59 }
 0x428   :  { %3274 = vmatpush2.bf16.msra.mxu0 %v6362_v1 }
 0x429   :  { %3670 = vmatprep.subr.bf16.mxu0 %v9368_v59 }
 0x42b   :  { %3276 = vmatmul.mubr.bf16.vlgmr.msra.gmra.mxu0 %v8253_v56 }
 0x42c   :  { %3671 = vmatpush1.bf16.msra.mxu0 %v6363_v7  ;;  %5346 = vmatprep.mubr.msk.bf16.mxu0 %vm1914_vm0, %v8259_v54  ;;  %v9377_v7 = vld [vmem:[#allocation24_spill] sm:$0xff] }
 0x42d   :  { %3672 = vmatprep.subr.bf16.mxu0 %v9368_v59 }
 0x430   :  { %3673 = vmatpush1.bf16.msra.mxu0 %v6364_v32 }
 0x431   :  { %3674 = vmatprep.subr.bf16.mxu0 %v9368_v59 }
 0x433   :  { %3284 = vmatmul.mubr.bf16.gmra.mxu0 %v8268_v36 }
 0x434   :  { %3675 = vmatpush1.bf16.msra.mxu0 %v6365_v26  ;;  %5347 = vmatprep.mubr.msk.bf16.mxu0 %vm1914_vm0, %v8274_v13 }
 0x435   :  { %3676 = vmatprep.subr.bf16.mxu0 %v9368_v59 }
 0x438   :  { %3677 = vmatpush1.bf16.msra.mxu0 %v6366_v40 }
 0x439   :  { %3678 = vmatprep.subr.bf16.mxu0 %v9368_v59 }
 0x43b   :  { %3292 = vmatmul.mubr.bf16.gmra.mxu0 %v9369_v2 }
 0x43c   :  { %3679 = vmatpush1.bf16.msra.mxu0 %v6367_v28  ;;  %5348 = vmatprep.mubr.msk.bf16.mxu0 %vm1914_vm0, %v9370_v51 }
 0x43d   :  { %3680 = vmatprep.subr.bf16.mxu0 %v9368_v59 }
 0x440   :  { %3681 = vmatpush1.bf16.msra.mxu0 %v6368_v50  ;;  %v9378_v50 = vld [vmem:[#allocation13_spill] sm:$0xff] }
 0x441   :  { %3682 = vmatprep.subr.bf16.mxu0 %v9368_v59 }
 0x443   :  { %v5991_v55 = vpop.f32.mrf.mxu0  ;;  %3300 = vmatmul.mubr.bf16.gmra.mxu0 %v9371_v3 }
 0x444   :  { %3683 = vmatpush1.bf16.msra.mxu0 %v6369_v37  ;;  %5349 = vmatprep.mubr.msk.bf16.mxu0 %vm1914_vm0, %v9372_v47  ;;  %v9379_v37 = vld [vmem:[#allocation27_spill] sm:$0xff] }
 0x445   :  { %v5992_v38 = vpop.f32.mrf.mxu0  ;;  %3684 = vmatprep.subr.bf16.mxu0 %v9368_v59 }
 0x446   :  { %v5993_v29 = vadd.f32 %v5992_v38, %v5991_v55  ;;  %v9380_v38 = vld [vmem:[#allocation39_spill] sm:$0xff] }
 0x447   :  { %v5994_v17 = vpop.f32.mrf.mxu0 }
 0x448   :  { %v8290_v48 = vadd.f32 %v5993_v29, %v9373_v53  ;;  %3685 = vmatpush1.bf16.msra.mxu0 %v6370_v39  ;;  %v9381_v53 = vld [vmem:[#allocation28_spill] sm:$0xff] }
 0x449   :  { %v5995_v60 = vpop.f32.mrf.mxu0  ;;  %3698 = vmatprep.subr.bf16.mxu0 %v9368_v59 }
 0x44a   :  { %v5996_v15 = vadd.f32 %v5995_v60, %v5994_v17 }
 0x44b   :  { %v5997_v21 = vpop.f32.mrf.mxu0  ;;  %3308 = vmatmul.mubr.bf16.gmra.mxu0 %v9374_v8 }
 0x44c   :  { %v8295_v49 = vadd.f32 %v5996_v15, %v9375_v63  ;;  %3699 = vmatpush2.bf16.msra.mxu0 %v6371_v52  ;;  %5350 = vmatprep.mubr.msk.bf16.mxu0 %vm1914_vm0, %v9376_v58  ;;  %v9382_v52 = vld [vmem:[#allocation29_spill] sm:$0xff] }
 0x44d   :  { %v5998_v45 = vpop.f32.mrf.mxu0  ;;  %3700 = vmatprep.subr.bf16.mxu0 %v9368_v59 }
 0x44e   :  { %v5999_v16 = vadd.f32 %v5998_v45, %v5997_v21  ;;  %v9383_v21 = vld [vmem:[#allocation30_spill] sm:$0xff] }
 0x44f   :  { %v6000_v1 = vpop.f32.mrf.mxu0  ;;  %v5968_v63 = vadd.f32 %v9383_v21, %v9382_v52  ;;  %v9390_v21 = vld [vmem:[#allocation15_spill] sm:$0xff] }
 0x450   :  { %v8301_v32 = vadd.f32 %v5999_v16, %v9377_v7  ;;  %3701 = vmatpush2.bf16.msra.mxu0 %v6372_v20  ;;  %v9384_v20 = vld [vmem:[#allocation40_spill] sm:$0xff]  ;;  %v9385_v7 = vld [vmem:[#allocation41_spill] sm:$0xff] }
 0x451   :  { %v6001_v26 = vpop.f32.mrf.mxu0 }
 0x452   :  { %v6002_v40 = vadd.f32 %v6001_v26, %v6000_v1 }
 0x453   :  { %v6003_v28 = vpop.f32.mrf.mxu0  ;;  %3316 = vmatmul.mubr.bf16.gmra.mxu0 %v9378_v50 }
 0x454   :  { %v8305_v55 = vadd.f32 %v6002_v40, %v9379_v37  ;;  %5351 = vmatprep.mubr.msk.bf16.mxu0 %vm1914_vm0, %v9380_v38  ;;  %v9386_v37 = vld [vmem:[#allocation42_spill] sm:$0xff] }
 0x455   :  { %v6004_v29 = vpop.f32.mrf.mxu0 }
 0x456   :  { %v6005_v39 = vadd.f32 %v6004_v29, %v6003_v28 }
 0x457   :  { %v6006_v17 = vpop.f32.mrf.mxu0 }
 0x458   :  { %v8310_v60 = vadd.f32 %v6005_v39, %v9381_v53  ;;  %v9387_v39 = vld [vmem:[#allocation43_spill] sm:$0xff]  ;;  %v9388_v53 = vld [vmem:[#allocation44_spill] sm:$0xff] }
 0x459   :  { %v6007_v15 = vpop.f32.mrf.mxu0  ;;  %v5974_v59 = vadd.f32 %v9388_v53, %v9387_v39  ;;  %v8393_v39 = vld [vmem:[%s9174_s1 + $0xe4] ss:$8 sps:$4 sm:$0xff]   ;;  %v8400_v53 = vld [vmem:[%s9174_s1 + $0xe0] ss:$8 sps:$4 sm:$0xff]  }
 0x45a   :  { %v6008_v45 = vadd.f32 %v6007_v15, %v6006_v17  ;;  %v9389_v17 = vld [vmem:[#allocation14_spill] sm:$0xff] }
 0x45b   :  { %v6009_v16 = vpop.f32.mrf.mxu0  ;;  %3324 = vmatmul.mubr.bf16.gmra.mxu0 %v9384_v20  ;;  %v8348_v20 = vld [vmem:[%s9174_s1 + $0xa0] ss:$8 sps:$4 sm:$0xff]  }
 0x45c   :  { %v8315_v1 = vadd.f32 %v6008_v45, %v5968_v63  ;;  %5352 = vmatprep.mubr.msk.bf16.mxu0 %vm1914_vm0, %v9385_v7  ;;  %v9391_v63 = vld [vmem:[#allocation16_spill] sm:$0xff]  ;;  %v9392_v45 = vld [vmem:[#allocation18_spill] sm:$0xff] }
 0x45d   :  { %v6010_v26 = vpop.f32.mrf.mxu0  ;;  %v8354_v7 = vld [vmem:[%s9174_s1 + $0xb4] ss:$8 sps:$4 sm:$0xff]  }
 0x45e   :  { %v6011_v40 = vadd.f32 %v6010_v26, %v6009_v16  ;;  %v8335_v16 = vld [vmem:[%s9174_s1 + $0x90] ss:$8 sps:$4 sm:$0xff]  }
 0x45f   :  { %v6012_v28 = vpop.f32.mrf.mxu0  ;;  %v8361_v26 = vld [vmem:[%s9174_s1 + $0xb0] ss:$8 sps:$4 sm:$0xff]  }
 0x460   :  { %v8320_v38 = vadd.f32 %v6011_v40, %v9386_v37  ;;  %v8367_v40 = vld [vmem:[%s9174_s1 + $0xc4] ss:$8 sps:$4 sm:$0xff]   ;;  %v8380_v37 = vld [vmem:[%s9174_s1 + $0xd4] ss:$8 sps:$4 sm:$0xff]  }
 0x461   :  { %v6013_v29 = vpop.f32.mrf.mxu0 }
 0x462   :  { %v6014_v52 = vadd.f32 %v6013_v29, %v6012_v28  ;;  %v8374_v28 = vld [vmem:[%s9174_s1 + $0xc0] ss:$8 sps:$4 sm:$0xff]   ;;  %v8387_v29 = vld [vmem:[%s9174_s1 + $0xd0] ss:$8 sps:$4 sm:$0xff]  }
 0x463   :  { %3332 = vmatmul.mubr.bf16.gmra.mxu0 %v9389_v17 }
 0x464   :  { %v8325_v15 = vadd.f32 %v6014_v52, %v5974_v59  ;;  %5353 = vmatprep.mubr.msk.bf16.mxu0 %vm1914_vm0, %v9390_v21  ;;  %v8341_v59 = vld [vmem:[%s9174_s1 + $0xa4] ss:$8 sps:$4 sm:$0xff]   ;;  %v8406_v52 = vld [vmem:[%s9174_s1 + $0xf4] ss:$8 sps:$4 sm:$0xff]  }
 0x46b   :  { %3340 = vmatmul.mubr.bf16.gmra.mxu0 %v9391_v63 }
 0x46c   :  { %5354 = vmatprep.mubr.msk.bf16.mxu0 %vm1914_vm0, %v9392_v45 }
 0x473   :  { %3348 = vmatmul.mubr.bf16.gmra.mxu0 %v8335_v16 }
 0x474   :  { %5355 = vmatprep.mubr.msk.bf16.mxu0 %vm1914_vm0, %v8341_v59 }
 0x47b   :  { %3356 = vmatmul.mubr.bf16.gmra.mxu0 %v8348_v20 }
 0x47c   :  { %5356 = vmatprep.mubr.msk.bf16.mxu0 %vm1914_vm0, %v8354_v7 }
 0x483   :  { %3364 = vmatmul.mubr.bf16.gmra.mxu0 %v8361_v26 }
 0x484   :  { %5357 = vmatprep.mubr.msk.bf16.mxu0 %vm1914_vm0, %v8367_v40 }
 0x48b   :  { %3372 = vmatmul.mubr.bf16.gmra.mxu0 %v8374_v28 }
 0x48c   :  { %5358 = vmatprep.mubr.msk.bf16.mxu0 %vm1914_vm0, %v8380_v37 }
 0x493   :  { %3380 = vmatmul.mubr.bf16.gmra.mxu0 %v8387_v29 }
 0x494   :  { %5359 = vmatprep.mubr.msk.bf16.mxu0 %vm1914_vm0, %v8393_v39 }
 0x49b   :  { %3388 = vmatmul.mubr.bf16.gmra.mxu0 %v8400_v53 }
 0x49c   :  { %5360 = vmatprep.mubr.msk.bf16.mxu0 %vm1914_vm0, %v8406_v52 }
 0x4a3   :  { %3396 = vmatmul.mubr.bf16.gmra.mxu0 %v8413_v30 }
 0x4a4   :  { %5387 = vmatprep.mubr.msk.bf16.mxu0 %vm1914_vm0, %v8242_v0 }
 0x4ab   :  { %3703 = vmatmul.mubr.bf16.vlgmr.msra.gmra.mxu0 %v8253_v56 }
 0x4ac   :  { %5388 = vmatprep.mubr.msk.bf16.mxu0 %vm1914_vm0, %v8259_v54 }
 0x4b3   :  { %3711 = vmatmul.mubr.bf16.gmra.mxu0 %v8268_v36 }
 0x4b4   :  { %5389 = vmatprep.mubr.msk.bf16.mxu0 %vm1914_vm0, %v8274_v13 }
 0x4bb   :  { %3719 = vmatmul.mubr.bf16.gmra.mxu0 %v9369_v2 }
 0x4bc   :  { %5390 = vmatprep.mubr.msk.bf16.mxu0 %vm1914_vm0, %v9370_v51 }
 0x4c3   :  { %v6031_v35 = vpop.f32.mrf.mxu0  ;;  %3727 = vmatmul.mubr.bf16.gmra.mxu0 %v9371_v3 }
 0x4c4   :  { %5391 = vmatprep.mubr.msk.bf16.mxu0 %vm1914_vm0, %v9372_v47 }
 0x4c5   :  { %v6032_v0 = vpop.f32.mrf.mxu0 }
 0x4c6   :  { %v6033_v56 = vadd.f32 %v6032_v0, %v6031_v35 }
 0x4c7   :  { %v6034_v4 = vpop.f32.mrf.mxu0 }
 0x4c8   :  { %v8431_v54 = vadd.f32 %v6033_v56, %v8290_v48 }
 0x4c9   :  { %v6035_v36 = vpop.f32.mrf.mxu0 }
 0x4ca   :  { %9393 = vst [vmem:[#allocation25_spill] sm:$0xff] %v8431_v54  ;;  %v6036_v9 = vadd.f32 %v6035_v36, %v6034_v4 }
 0x4cb   :  { %v6037_v13 = vpop.f32.mrf.mxu0  ;;  %3735 = vmatmul.mubr.bf16.gmra.mxu0 %v9374_v8 }
 0x4cc   :  { %v8435_v2 = vadd.f32 %v6036_v9, %v8295_v49  ;;  %5392 = vmatprep.mubr.msk.bf16.mxu0 %vm1914_vm0, %v9376_v58  ;;  %v8449_v9 = vld [vmem:[%s9174_s1 + $0x64] ss:$8 sps:$4 sm:$0xff]  }
 0x4cd   :  { %v6038_v51 = vpop.f32.mrf.mxu0  ;;  %9397 = vst [vmem:[#allocation37_spill] sm:$0xff] %v8449_v9 }
 0x4ce   :  { %9394 = vst [vmem:[#allocation26_spill] sm:$0xff] %v8435_v2  ;;  %v6039_v3 = vadd.f32 %v6038_v51, %v6037_v13 }
 0x4cf   :  { %v6040_v47 = vpop.f32.mrf.mxu0 }
 0x4d0   :  { %v8440_v35 = vadd.f32 %v6039_v3, %v8301_v32  ;;  %v8468_v3 = vld [vmem:[%s9174_s1 + $0x74] ss:$8 sps:$4 sm:$0xff]  }
 0x4d1   :  { %v6041_v0 = vpop.f32.mrf.mxu0  ;;  %9401 = vst [vmem:[#allocation10_spill] sm:$0xff] %v8468_v3 }
 0x4d2   :  { %9395 = vst [vmem:[#allocation20_spill] sm:$0xff] %v8440_v35  ;;  %v6042_v48 = vadd.f32 %v6041_v0, %v6040_v47 }
 0x4d3   :  { %v6043_v56 = vpop.f32.mrf.mxu0  ;;  %3743 = vmatmul.mubr.bf16.gmra.mxu0 %v9378_v50 }
 0x4d4   :  { %v8444_v4 = vadd.f32 %v6042_v48, %v8305_v55  ;;  %5393 = vmatprep.mubr.msk.bf16.mxu0 %vm1914_vm0, %v8449_v9  ;;  %v8459_v55 = vld [vmem:[%s9174_s1 + $0x60] ss:$8 sps:$4 sm:$0xff]  }
 0x4d5   :  { %v6044_v8 = vpop.f32.mrf.mxu0  ;;  %9399 = vst [vmem:[#allocation8_spill] sm:$0xff] %v8459_v55 }
 0x4d6   :  { %9396 = vst [vmem:[#allocation21_spill] sm:$0xff] %v8444_v4  ;;  %v6045_v49 = vadd.f32 %v6044_v8, %v6043_v56 }
 0x4d7   :  { %v6046_v58 = vpop.f32.mrf.mxu0 }
 0x4d8   :  { %v8454_v32 = vadd.f32 %v6045_v49, %v8310_v60 }
 0x4d9   :  { %v6047_v36 = vpop.f32.mrf.mxu0 }
 0x4da   :  { %9398 = vst [vmem:[#allocation7_spill] sm:$0xff] %v8454_v32  ;;  %v6048_v13 = vadd.f32 %v6047_v36, %v6046_v58  ;;  %v9407_v32 = vld [vmem:[#allocation23_spill] sm:$0xff] }
 0x4db   :  { %v6049_v50 = vpop.f32.mrf.mxu0  ;;  %3751 = vmatmul.mubr.bf16.gmra.mxu0 %v8459_v55 }
 0x4dc   :  { %v8463_v51 = vadd.f32 %v6048_v13, %v8315_v1  ;;  %5394 = vmatprep.mubr.msk.bf16.mxu0 %vm1914_vm0, %v8468_v3 }
 0x4dd   :  { %v6050_v60 = vpop.f32.mrf.mxu0 }
 0x4de   :  { %9400 = vst [vmem:[#allocation9_spill] sm:$0xff] %v8463_v51  ;;  %v6051_v47 = vadd.f32 %v6050_v60, %v6049_v50 }
 0x4df   :  { %v6052_v0 = vpop.f32.mrf.mxu0 }
 0x4e0   :  { %v8473_v48 = vadd.f32 %v6051_v47, %v8320_v38 }
 0x4e1   :  { %v6053_v56 = vpop.f32.mrf.mxu0 }
 0x4e2   :  { %9402 = vst [vmem:[#allocation19_spill] sm:$0xff] %v8473_v48  ;;  %v6054_v8 = vadd.f32 %v6053_v56, %v6052_v0 }
 0x4e3   :  { %3759 = vmatmul.mubr.bf16.gmra.mxu0 %v9389_v17 }
 0x4e4   :  { %v8477_v1 = vadd.f32 %v6054_v8, %v8325_v15  ;;  %5395 = vmatprep.mubr.msk.bf16.mxu0 %vm1914_vm0, %v9390_v21 }
 0x4e6   :  { %9403 = vst [vmem:[#allocation11_spill] sm:$0xff] %v8477_v1 }
 0x4eb   :  { %v3277_v49 = vpop.f32.mrf.mxu0  ;;  %3767 = vmatmul.mubr.bf16.gmra.mxu0 %v9391_v63 }
 0x4ec   :  { %5396 = vmatprep.mubr.msk.bf16.mxu0 %vm1914_vm0, %v9392_v45  ;;  %v3278_v38 = vadd.f32 %v3277_v49, %v7785_v57 }
 0x4ed   :  { %v3279_v58 = vpop.f32.mrf.mxu0 }
 0x4ee   :  { %v3404_v17 = vmax.f32 %v3278_v38, 0.0 }
 0x4ef   :  { %v3280_v36 = vpop.f32.mrf.mxu0 }
 0x4f0   :  { %v3281_v13 = vadd.f32 %v3280_v36, %v7788_v44 }
 0x4f1   :  { %v3282_v50 = vpop.f32.mrf.mxu0 }
 0x4f2   :  { %v3405_v60 = vmax.f32 %v3281_v13, 0.0 }
 0x4f3   :  { %v3285_v15 = vpop.f32.mrf.mxu0  ;;  %3775 = vmatmul.mubr.bf16.gmra.mxu0 %v8335_v16 }
 0x4f4   :  { %v8487_v47 = vpack.c.bf16 %v3405_v60, %v3404_v17  ;;  %5397 = vmatprep.mubr.msk.bf16.mxu0 %vm1914_vm0, %v8341_v59  ;;  %v3286_v63 = vadd.f32 %v3285_v15, %v7777_v41 }
 0x4f5   :  { %v3287_v21 = vpop.f32.mrf.mxu0 }
 0x4f6   :  { %v3406_v8 = vmax.f32 %v3286_v63, 0.0 }
 0x4f7   :  { %v3288_v45 = vpop.f32.mrf.mxu0 }
 0x4f8   :  { %v3289_v0 = vadd.f32 %v3288_v45, %v7779_v10 }
 0x4f9   :  { %v3290_v56 = vpop.f32.mrf.mxu0 }
 0x4fa   :  { %v3407_v49 = vmax.f32 %v3289_v0, 0.0 }
 0x4fb   :  { %v3293_v58 = vpop.f32.mrf.mxu0  ;;  %3783 = vmatmul.mubr.bf16.gmra.mxu0 %v8348_v20 }
 0x4fc   :  { %v8494_v38 = vpack.c.bf16 %v3407_v49, %v3406_v8  ;;  %5398 = vmatprep.mubr.msk.bf16.mxu0 %vm1914_vm0, %v8354_v7  ;;  %v3294_v59 = vadd.f32 %v3293_v58, %v7769_v43 }
 0x4fd   :  { %v3295_v16 = vpop.f32.mrf.mxu0 }
 0x4fe   :  { %v3408_v17 = vmax.f32 %v3294_v59, 0.0  ;;  %v6375_v16 = vld [vmem:[%s9175_s2 + $0xc4] ss:$8 sps:$4 sm:$0xff]  }
 0x4ff   :  { %v3296_v36 = vpop.f32.mrf.mxu0  ;;  %3541 = vmatprep.mubr.bf16.mxu1 %v6375_v16 }
 0x500   :  { %v3297_v13 = vadd.f32 %v3296_v36, %v7771_v25 }
 0x501   :  { %v3298_v50 = vpop.f32.mrf.mxu0 }
 0x502   :  { %v3409_v60 = vmax.f32 %v3297_v13, 0.0 }
 0x503   :  { %v3301_v15 = vpop.f32.mrf.mxu0  ;;  %3791 = vmatmul.mubr.bf16.gmra.mxu0 %v8361_v26 }
 0x504   :  { %v8501_v21 = vpack.c.bf16 %v3409_v60, %v3408_v17  ;;  %5399 = vmatprep.mubr.msk.bf16.mxu0 %vm1914_vm0, %v8367_v40  ;;  %v3302_v7 = vadd.f32 %v3301_v15, %v7757_v31 }
 0x505   :  { %v3303_v20 = vpop.f32.mrf.mxu0 }
 0x506   :  { %v3410_v56 = vmax.f32 %v3302_v7, 0.0 }
 0x507   :  { %v3304_v63 = vpop.f32.mrf.mxu0 }
 0x508   :  { %v3305_v45 = vadd.f32 %v3304_v63, %v7759_v11 }
 0x509   :  { %v3306_v0 = vpop.f32.mrf.mxu0 }
 0x50a   :  { %v3411_v8 = vmax.f32 %v3305_v45, 0.0 }
 0x50b   :  { %v3309_v49 = vpop.f32.mrf.mxu0  ;;  %3799 = vmatmul.mubr.bf16.gmra.mxu0 %v8374_v28 }
 0x50c   :  { %v8508_v58 = vpack.c.bf16 %v3411_v8, %v3410_v56  ;;  %5400 = vmatprep.mubr.msk.bf16.mxu0 %vm1914_vm0, %v8380_v37  ;;  %v3310_v40 = vadd.f32 %v3309_v49, %v7746_v62 }
 0x50d   :  { %v3311_v26 = vpop.f32.mrf.mxu0 }
 0x50e   :  { %v3412_v50 = vmax.f32 %v3310_v40, 0.0 }
 0x50f   :  { %v3312_v59 = vpop.f32.mrf.mxu0 }
 0x510   :  { %v3313_v36 = vadd.f32 %v3312_v59, %v7748_v5 }
 0x511   :  { %v3314_v13 = vpop.f32.mrf.mxu0 }
 0x512   :  { %v3413_v17 = vmax.f32 %v3313_v36, 0.0 }
 0x513   :  { %v3317_v28 = vpop.f32.mrf.mxu0  ;;  %3807 = vmatmul.mubr.bf16.gmra.mxu0 %v8387_v29 }
 0x514   :  { %v8518_v60 = vpack.c.bf16 %v3413_v17, %v3412_v50  ;;  %5401 = vmatprep.mubr.msk.bf16.mxu0 %vm1914_vm0, %v8393_v39  ;;  %v3318_v15 = vadd.f32 %v3317_v28, %v7722_v24 }
 0x515   :  { %v3319_v37 = vpop.f32.mrf.mxu0 }
 0x516   :  { %v3414_v45 = vmax.f32 %v3318_v15, 0.0 }
 0x517   :  { %v3320_v20 = vpop.f32.mrf.mxu0 }
 0x518   :  { %v3321_v7 = vadd.f32 %v3320_v20, %v7724_v42 }
 0x519   :  { %v3322_v63 = vpop.f32.mrf.mxu0 }
 0x51a   :  { %v3415_v0 = vmax.f32 %v3321_v7, 0.0 }
 0x51b   :  { %v3325_v56 = vpop.f32.mrf.mxu0  ;;  %3815 = vmatmul.mubr.bf16.gmra.mxu0 %v8400_v53 }
 0x51c   :  { %v8525_v8 = vpack.c.bf16 %v3415_v0, %v3414_v45  ;;  %5402 = vmatprep.mubr.msk.bf16.mxu0 %vm1914_vm0, %v8406_v52  ;;  %v3326_v39 = vadd.f32 %v3325_v56, %v9354_v34  ;;  %v9404_v56 = vld [vmem:[#allocation38_spill] sm:$0xff] }
 0x51d   :  { %v3327_v29 = vpop.f32.mrf.mxu0 }
 0x51e   :  { %v3416_v16 = vmax.f32 %v3326_v39, 0.0 }
 0x51f   :  { %v3328_v49 = vpop.f32.mrf.mxu0 }
 0x520   :  { %v3329_v26 = vadd.f32 %v3328_v49, %v9355_v46 }
 0x521   :  { %v3330_v40 = vpop.f32.mrf.mxu0 }
 0x522   :  { %v3417_v59 = vmax.f32 %v3329_v26, 0.0 }
 0x523   :  { %v3333_v36 = vpop.f32.mrf.mxu0  ;;  %3823 = vmatmul.mubr.bf16.gmra.mxu0 %v8413_v30 }
 0x524   :  { %v8532_v13 = vpack.c.bf16 %v3417_v59, %v3416_v16  ;;  %v3334_v50 = vadd.f32 %v3333_v36, %v9356_v61  ;;  %v9405_v59 = vld [vmem:[#allocation35_spill] sm:$0xff] }
 0x525   :  { %v3335_v53 = vpop.f32.mrf.mxu0 }
 0x526   :  { %v3418_v37 = vmax.f32 %v3334_v50, 0.0  ;;  %v9406_v50 = vld [vmem:[#allocation36_spill] sm:$0xff] }
 0x527   :  { %v3336_v17 = vpop.f32.mrf.mxu0 }
 0x528   :  { %v3337_v52 = vadd.f32 %v3336_v17, %v9357_v27 }
 0x529   :  { %v3338_v28 = vpop.f32.mrf.mxu0 }
 0x52a   :  { %v3419_v15 = vmax.f32 %v3337_v52, 0.0 }
 0x52b   :  { %v3341_v20 = vpop.f32.mrf.mxu0 }
 0x52c   :  { %v3443_v7 = vpack.c.bf16 %v3419_v15, %v3418_v37  ;;  %v3342_v45 = vadd.f32 %v3341_v20, %v9363_v33 }
 0x52d   :  { %v3343_v63 = vpop.f32.mrf.mxu0 }
 0x52e   :  { %v3420_v39 = vmax.f32 %v3342_v45, 0.0 }
 0x52f   :  { %v3344_v0 = vpop.f32.mrf.mxu0 }
 0x530   :  { %v3345_v29 = vadd.f32 %v3344_v0, %v9404_v56 }
 0x531   :  { %v3346_v30 = vpop.f32.mrf.mxu0 }
 0x532   :  { %v3421_v49 = vmax.f32 %v3345_v29, 0.0 }
 0x533   :  { %v3349_v26 = vpop.f32.mrf.mxu0 }
 0x534   :  { %v8538_v40 = vpack.c.bf16 %v3421_v49, %v3420_v39  ;;  %v3350_v36 = vadd.f32 %v3349_v26, %v9405_v59 }
 0x535   :  { %v3351_v16 = vpop.f32.mrf.mxu0 }
 0x536   :  { %v3422_v28 = vmax.f32 %v3350_v36, 0.0 }
 0x537   :  { %v3352_v53 = vpop.f32.mrf.mxu0 }
 0x538   :  { %v3353_v17 = vadd.f32 %v3352_v53, %v9406_v50 }
 0x539   :  { %v3354_v52 = vpop.f32.mrf.mxu0 }
 0x53a   :  { %v3423_v37 = vmax.f32 %v3353_v17, 0.0 }
 0x53b   :  { %v8542_v15 = vpop.f32.mrf.mxu0 }
 0x53c   :  { %v8544_v20 = vpack.c.bf16 %v3423_v37, %v3422_v28 }
 0x53d   :  { %v3359_v63 = vpop.f32.mrf.mxu0 }
 0x53f   :  { %v3360_v0 = vpop.f32.mrf.mxu0 }
 0x541   :  { %v3362_v45 = vpop.f32.mrf.mxu0 }
 0x543   :  { %v3365_v29 = vpop.f32.mrf.mxu0 }
 0x545   :  { %v3367_v30 = vpop.f32.mrf.mxu0 }
 0x547   :  { %v3368_v39 = vpop.f32.mrf.mxu0 }
 0x549   :  { %v3370_v49 = vpop.f32.mrf.mxu0 }
 0x54b   :  { %v3373_v16 = vpop.f32.mrf.mxu0 }
 0x54d   :  { %v3375_v1 = vpop.f32.mrf.mxu0 }
 0x54f   :  { %v3376_v26 = vpop.f32.mrf.mxu0 }
 0x551   :  { %v3378_v48 = vpop.f32.mrf.mxu0 }
 0x553   :  { %v3381_v3 = vpop.f32.mrf.mxu0 }
 0x555   :  { %v3383_v53 = vpop.f32.mrf.mxu0 }
 0x557   :  { %v3384_v52 = vpop.f32.mrf.mxu0 }
 0x558   :  { %v3385_v53 = vadd.f32 %v3384_v52, %v7720_v14  ;;  %v3374_v52 = vadd.f32 %v3373_v16, %v7739_v6 }
 0x559   :  { %v3386_v36 = vpop.f32.mrf.mxu0 }
 0x55b   :  { %v3389_v17 = vpop.f32.mrf.mxu0 }
 0x55c   :  { %v3390_v49 = vadd.f32 %v3389_v17, %v7684_v18 }
 0x55d   :  { %v3391_v51 = vpop.f32.mrf.mxu0 }
 0x55e   :  { %v3432_v2 = vmax.f32 %v3390_v49, 0.0 }
 0x55f   :  { %v3392_v55 = vpop.f32.mrf.mxu0 }
 0x560   :  { %v3393_v45 = vadd.f32 %v3392_v55, %v9407_v32  ;;  %v3377_v55 = vadd.f32 %v3376_v26, %v7741_v23 }
 0x561   :  { %v3394_v28 = vpop.f32.mrf.mxu0 }
 0x562   :  { %v3433_v4 = vmax.f32 %v3393_v45, 0.0  ;;  %v3382_v28 = vadd.f32 %v3381_v3, %v7705_v19 }
 0x563   :  { %v3397_v37 = vpop.f32.mrf.mxu0 }
 0x564   :  { %v3398_v30 = vadd.f32 %v3397_v37, %v9367_v22  ;;  %v3431_v37 = vmax.f32 %v3385_v53, 0.0  ;;  %v3450_v22 = vpack.c.bf16 %v3433_v4, %v3432_v2  ;;  %v3430_v45 = vmax.f32 %v3382_v28, 0.0  ;;  %v9409_v4 = vld [vmem:[#allocation31_spill] sm:$0xff] }
 0x565   :  { %v3399_v63 = vpop.f32.mrf.mxu0  ;;  %v3366_v53 = vadd.f32 %v3365_v29, %v9409_v4 }
 0x566   :  { %v3434_v36 = vmax.f32 %v3398_v30, 0.0 }
 0x567   :  { %v3400_v9 = vpop.f32.mrf.mxu0 }
 0x568   :  { %v3401_v1 = vadd.f32 %v3400_v9, %v7665_v12 }
 0x569   :  { %v3402_v48 = vpop.f32.mrf.mxu0 }
 0x56a   :  { %v3435_v35 = vmax.f32 %v3401_v1, 0.0  ;;  %v9408_v1 = vld [vmem:[#allocation32_spill] sm:$0xff] }
 0x56b   :  { %v3704_v51 = vpop.f32.mrf.mxu0  ;;  %v3369_v3 = vadd.f32 %v3368_v39, %v9408_v1 }
 0x56c   :  { %v3451_v63 = vpack.c.bf16 %v3435_v35, %v3434_v36  ;;  %v3705_v17 = vadd.f32 %v3704_v51, %v7785_v57  ;;  %v3429_v35 = vmax.f32 %v3377_v55, 0.0  ;;  %v9410_v51 = vld [vmem:[#allocation34_spill] sm:$0xff] }
 0x56d   :  { %v3706_v54 = vpop.f32.mrf.mxu0  ;;  %v3361_v28 = vadd.f32 %v3360_v0, %v9410_v51 }
 0x56e   :  { %6055 = vmatprep.subr.bf16.mxu1 %v3451_v63  ;;  %v3449_v54 = vpack.c.bf16 %v3431_v37, %v3430_v45  ;;  %v3831_v48 = vmax.f32 %v3705_v17, 0.0  ;;  %v9411_v37 = vld [vmem:[#allocation33_spill] sm:$0xff]  ;;  %v3426_v17 = vmax.f32 %v3366_v53, 0.0 }
 0x56f   :  { %6056 = vmatpush3.bf16.msra.mxu1 %v3443_v7  ;;  %v3707_v9 = vpop.f32.mrf.mxu0  ;;  %v3428_v7 = vmax.f32 %v3374_v52, 0.0  ;;  %v3425_v52 = vmax.f32 %v3361_v28, 0.0 }
 0x570   :  { %v3708_v30 = vadd.f32 %v3707_v9, %v7788_v44  ;;  %6057 = vmatprep.subr.bf16.mxu1 %v3450_v22  ;;  %v3427_v22 = vmax.f32 %v3369_v3, 0.0 }
 0x571   :  { %v3709_v49 = vpop.f32.mrf.mxu0  ;;  %v3448_v63 = vpack.c.bf16 %v3429_v35, %v3428_v7 }
 0x572   :  { %v3832_v26 = vmax.f32 %v3708_v30, 0.0  ;;  %v3447_v45 = vpack.c.bf16 %v3427_v22, %v3426_v17  ;;  %v6378_v17 = vld [vmem:[%s9175_s2 + $0xd4] ss:$8 sps:$4 sm:$0xff]  }
 0x573   :  { %6058 = vmatpush3.bf16.msra.mxu1 %v8532_v13  ;;  %v3712_v2 = vpop.f32.mrf.mxu0  ;;  %v3358_v13 = vadd.f32 %v8542_v15, %v9411_v37 }
 0x574   :  { %v8559_v36 = vpack.c.bf16 %v3832_v26, %v3831_v48  ;;  %6059 = vmatprep.subr.bf16.mxu1 %v3449_v54  ;;  %v3713_v39 = vadd.f32 %v3712_v2, %v7777_v41 }
 0x575   :  { %v3714_v16 = vpop.f32.mrf.mxu0  ;;  %v3424_v3 = vmax.f32 %v3358_v13, 0.0 }
 0x576   :  { %v3833_v30 = vmax.f32 %v3713_v39, 0.0 }
 0x577   :  { %6060 = vmatpush3.bf16.msra.mxu1 %v8525_v8  ;;  %v3715_v55 = vpop.f32.mrf.mxu0  ;;  %v3446_v54 = vpack.c.bf16 %v3425_v52, %v3424_v3  ;;  %v6381_v3 = vld [vmem:[%s9175_s2 + $0xe4] ss:$8 sps:$4 sm:$0xff]  }
 0x578   :  { %v3716_v29 = vadd.f32 %v3715_v55, %v7779_v10  ;;  %6061 = vmatprep.subr.bf16.mxu1 %v3448_v63 }
 0x579   :  { %v3717_v9 = vpop.f32.mrf.mxu0 }
 0x57a   :  { %v3834_v49 = vmax.f32 %v3716_v29, 0.0 }
 0x57b   :  { %6062 = vmatpush3.bf16.msra.mxu1 %v8518_v60  ;;  %v3720_v0 = vpop.f32.mrf.mxu0 }
 0x57c   :  { %v8568_v35 = vpack.c.bf16 %v3834_v49, %v3833_v30  ;;  %6063 = vmatprep.subr.bf16.mxu1 %v3447_v45  ;;  %v3721_v15 = vadd.f32 %v3720_v0, %v7769_v43 }
 0x57d   :  { %v3722_v8 = vpop.f32.mrf.mxu0 }
 0x57e   :  { %v3835_v53 = vmax.f32 %v3721_v15, 0.0 }
 0x57f   :  { %6064 = vmatpush3.bf16.msra.mxu1 %v8508_v58  ;;  %v3723_v48 = vpop.f32.mrf.mxu0 }
 0x580   :  { %v3724_v26 = vadd.f32 %v3723_v48, %v7771_v25  ;;  %6065 = vmatprep.subr.bf16.mxu1 %v3446_v54 }
 0x581   :  { %v3725_v2 = vpop.f32.mrf.mxu0 }
 0x582   :  { %v3836_v7 = vmax.f32 %v3724_v26, 0.0 }
 0x583   :  { %6066 = vmatpush3.bf16.msra.mxu1 %v8501_v21  ;;  %v3728_v60 = vpop.f32.mrf.mxu0  ;;  %v6373_v21 = vld [vmem:[%s9175_s2 + $0xc0] ss:$8 sps:$4 sm:$0xff]  }
 0x584   :  { %v8574_v16 = vpack.c.bf16 %v3836_v7, %v3835_v53  ;;  %6067 = vmatprep.subr.bf16.mxu1 %v8544_v20  ;;  %v3729_v22 = vadd.f32 %v3728_v60, %v7757_v31  ;;  %v6379_v60 = vld [vmem:[%s9175_s2 + $0xe0] ss:$8 sps:$4 sm:$0xff]  }
 0x585   :  { %v3730_v28 = vpop.f32.mrf.mxu0 }
 0x586   :  { %v3837_v55 = vmax.f32 %v3729_v22, 0.0  ;;  %v6384_v22 = vld [vmem:[%s9175_s2 + $0xf4] ss:$8 sps:$4 sm:$0xff]  }
 0x587   :  { %6068 = vmatpush3.bf16.msra.mxu1 %v8494_v38  ;;  %v3731_v58 = vpop.f32.mrf.mxu0 }
 0x588   :  { %v3732_v63 = vadd.f32 %v3731_v58, %v7759_v11  ;;  %6069 = vmatprep.subr.bf16.mxu1 %v8538_v40 }
 0x589   :  { %v3733_v39 = vpop.f32.mrf.mxu0 }
 0x58a   :  { %v3838_v13 = vmax.f32 %v3732_v63, 0.0 }
 0x58b   :  { %6070 = vmatpush3.bf16.msra.mxu1 %v8487_v47  ;;  %v3736_v20 = vpop.f32.mrf.mxu0  ;;  %v6376_v47 = vld [vmem:[%s9175_s2 + $0xd0] ss:$8 sps:$4 sm:$0xff]  }
 0x58c   :  { %v8588_v38 = vpack.c.bf16 %v3838_v13, %v3837_v55  ;;  %v3737_v9 = vadd.f32 %v3736_v20, %v7746_v62 }
 0x58d   :  { %v3738_v29 = vpop.f32.mrf.mxu0 }
 0x58e   :  { %3542 = vmatmul.mubr.bf16.vlgmr.msra.gmra.mxu1 %v6373_v21  ;;  %v3839_v30 = vmax.f32 %v3737_v9, 0.0  ;;  %v6382_v29 = vld [vmem:[%s9175_s2 + $0xf0] ss:$8 sps:$4 sm:$0xff]  }
 0x58f   :  { %v3739_v40 = vpop.f32.mrf.mxu0  ;;  %3549 = vmatprep.mubr.bf16.mxu1 %v6378_v17 }
 0x590   :  { %v3740_v52 = vadd.f32 %v3739_v40, %v7748_v5  ;;  %v6387_v40 = vld [vmem:[%s9175_s2 + $0x104] ss:$8 sps:$4 sm:$0xff]  }
 0x591   :  { %v3741_v45 = vpop.f32.mrf.mxu0 }
 0x592   :  { %v3840_v49 = vmax.f32 %v3740_v52, 0.0 }
 0x593   :  { %v3744_v0 = vpop.f32.mrf.mxu0 }
 0x594   :  { %v8598_v8 = vpack.c.bf16 %v3840_v49, %v3839_v30  ;;  %v3745_v15 = vadd.f32 %v3744_v0, %v7722_v24 }
 0x595   :  { %v3746_v54 = vpop.f32.mrf.mxu0 }
 0x596   :  { %3550 = vmatmul.mubr.bf16.gmra.mxu1 %v6376_v47  ;;  %v3841_v53 = vmax.f32 %v3745_v15, 0.0 }
 0x597   :  { %v3747_v48 = vpop.f32.mrf.mxu0  ;;  %3557 = vmatprep.mubr.bf16.mxu1 %v6381_v3 }
 0x598   :  { %v3748_v26 = vadd.f32 %v3747_v48, %v7724_v42 }
 0x599   :  { %v3749_v2 = vpop.f32.mrf.mxu0 }
 0x59a   :  { %v3842_v7 = vmax.f32 %v3748_v26, 0.0 }
 0x59b   :  { %v3752_v28 = vpop.f32.mrf.mxu0 }
 0x59c   :  { %v8608_v58 = vpack.c.bf16 %v3842_v7, %v3841_v53  ;;  %v3753_v39 = vadd.f32 %v3752_v28, %v9354_v34 }
 0x59d   :  { %v3754_v63 = vpop.f32.mrf.mxu0 }
 0x59e   :  { %3558 = vmatmul.mubr.bf16.gmra.mxu1 %v6379_v60  ;;  %v3843_v20 = vmax.f32 %v3753_v39, 0.0 }
 0x59f   :  { %v3755_v55 = vpop.f32.mrf.mxu0  ;;  %3565 = vmatprep.mubr.bf16.mxu1 %v6384_v22 }
 0x5a0   :  { %v3756_v13 = vadd.f32 %v3755_v55, %v9355_v46 }
 0x5a1   :  { %v3757_v21 = vpop.f32.mrf.mxu0 }
 0x5a2   :  { %v3844_v17 = vmax.f32 %v3756_v13, 0.0 }
 0x5a3   :  { %v3760_v9 = vpop.f32.mrf.mxu0 }
 0x5a4   :  { %v8618_v52 = vpack.c.bf16 %v3844_v17, %v3843_v20  ;;  %v3761_v30 = vadd.f32 %v3760_v9, %v9356_v61 }
 0x5a5   :  { %v3762_v45 = vpop.f32.mrf.mxu0 }
 0x5a6   :  { %3566 = vmatmul.mubr.bf16.gmra.mxu1 %v6382_v29  ;;  %v3845_v3 = vmax.f32 %v3761_v30, 0.0 }
 0x5a7   :  { %v3763_v49 = vpop.f32.mrf.mxu0  ;;  %3968 = vmatprep.mubr.bf16.mxu1 %v6387_v40 }
 0x5a8   :  { %v3764_v47 = vadd.f32 %v3763_v49, %v9357_v27 }
 0x5a9   :  { %v3765_v0 = vpop.f32.mrf.mxu0 }
 0x5aa   :  { %v3846_v54 = vmax.f32 %v3764_v47, 0.0 }
 0x5ab   :  { %v3768_v15 = vpop.f32.mrf.mxu0 }
 0x5ac   :  { %v3870_v48 = vpack.c.bf16 %v3846_v54, %v3845_v3  ;;  %v3769_v2 = vadd.f32 %v3768_v15, %v9363_v33 }
 0x5ad   :  { %v3770_v26 = vpop.f32.mrf.mxu0 }
 0x5ae   :  { %v3847_v28 = vmax.f32 %v3769_v2, 0.0 }
 0x5af   :  { %v3771_v53 = vpop.f32.mrf.mxu0 }
 0x5b0   :  { %v3772_v7 = vadd.f32 %v3771_v53, %v9404_v56 }
 0x5b1   :  { %v3773_v60 = vpop.f32.mrf.mxu0 }
 0x5b2   :  { %v3848_v22 = vmax.f32 %v3772_v7, 0.0 }
 0x5b3   :  { %v3776_v63 = vpop.f32.mrf.mxu0 }
 0x5b4   :  { %v8624_v39 = vpack.c.bf16 %v3848_v22, %v3847_v28  ;;  %v3777_v13 = vadd.f32 %v3776_v63, %v9405_v59 }
 0x5b5   :  { %v3778_v55 = vpop.f32.mrf.mxu0 }
 0x5b6   :  { %v3849_v29 = vmax.f32 %v3777_v13, 0.0 }
 0x5b7   :  { %v3779_v21 = vpop.f32.mrf.mxu0 }
 0x5b8   :  { %v3780_v20 = vadd.f32 %v3779_v21, %v9406_v50 }
 0x5b9   :  { %v3781_v17 = vpop.f32.mrf.mxu0 }
 0x5ba   :  { %v3850_v9 = vmax.f32 %v3780_v20, 0.0 }
 0x5bb   :  { %v3784_v40 = vpop.f32.mrf.mxu0 }
 0x5bc   :  { %v8628_v45 = vpack.c.bf16 %v3850_v9, %v3849_v29 }
 0x5bd   :  { %v3786_v30 = vpop.f32.mrf.mxu0 }
 0x5be   :  { %v9412_v30 = vld [vmem:[#allocation17_spill] sm:$0xff] }
 0x5bf   :  { %v3787_v49 = vpop.f32.mrf.mxu0 }
 0x5c1   :  { %v3789_v47 = vpop.f32.mrf.mxu0 }
 0x5c3   :  { %v3792_v0 = vpop.f32.mrf.mxu0 }
 0x5c5   :  { %v3794_v3 = vpop.f32.mrf.mxu0 }
 0x5c7   :  { %v3795_v54 = vpop.f32.mrf.mxu0 }
 0x5c9   :  { %v3797_v15 = vpop.f32.mrf.mxu0 }
 0x5cb   :  { %v3800_v26 = vpop.f32.mrf.mxu0 }
 0x5cd   :  { %v3802_v2 = vpop.f32.mrf.mxu0 }
 0x5cf   :  { %v3803_v53 = vpop.f32.mrf.mxu0 }
 0x5d1   :  { %v3805_v7 = vpop.f32.mrf.mxu0 }
 0x5d3   :  { %v3808_v60 = vpop.f32.mrf.mxu0 }
 0x5d5   :  { %v3810_v28 = vpop.f32.mrf.mxu0 }
 0x5d7   :  { %v3811_v22 = vpop.f32.mrf.mxu0 }
 0x5d8   :  { %v3812_v28 = vadd.f32 %v3811_v22, %v7720_v14 }
 0x5d9   :  { %v3813_v63 = vpop.f32.mrf.mxu0 }
 0x5db   :  { %v3816_v55 = vpop.f32.mrf.mxu0 }
 0x5dc   :  { %v3817_v15 = vadd.f32 %v3816_v55, %v7684_v18  ;;  %v3801_v55 = vadd.f32 %v3800_v26, %v7739_v6 }
 0x5dd   :  { %v3818_v13 = vpop.f32.mrf.mxu0 }
 0x5de   :  { %v3809_v13 = vadd.f32 %v3808_v60, %v7705_v19  ;;  %v3793_v60 = vadd.f32 %v3792_v0, %v9409_v4  ;;  %v6402_v0 = vld [vmem:[%s9175_s2 + $0x134] ss:$8 sps:$4 sm:$0xff]  }
 0x5df   :  { %v3819_v21 = vpop.f32.mrf.mxu0 }
 0x5e0   :  { %v3820_v9 = vadd.f32 %v3819_v21, %v9407_v32  ;;  %v3858_v21 = vmax.f32 %v3812_v28, 0.0  ;;  %v6403_v28 = vld [vmem:[#allocation2 + $0x148] sm:$0xff]  }
 0x5e1   :  { %v3821_v20 = vpop.f32.mrf.mxu0 }
 0x5e2   :  { %v3860_v50 = vmax.f32 %v3820_v9, 0.0  ;;  %v3859_v20 = vmax.f32 %v3817_v15, 0.0  ;;  %v6398_v15 = vld [vmem:[#allocation2 + $0x158] sm:$0xff]  }
 0x5e3   :  { %v3824_v17 = vpop.f32.mrf.mxu0 }
 0x5e4   :  { %v3825_v47 = vadd.f32 %v3824_v17, %v9412_v30  ;;  %v3877_v32 = vpack.c.bf16 %v3860_v50, %v3859_v20  ;;  %v3857_v17 = vmax.f32 %v3809_v13, 0.0  ;;  %v6404_v13 = vld [vmem:[#allocation2 + $0x140] sm:$0xff]   ;;  %v6405_v20 = vld [vmem:[#allocation2 + $0x188] sm:$0xff]  }
 0x5e5   :  { %v3826_v29 = vpop.f32.mrf.mxu0 }
 0x5e6   :  { %v3861_v63 = vmax.f32 %v3825_v47, 0.0  ;;  %v3804_v29 = vadd.f32 %v3803_v53, %v7741_v23  ;;  %v3876_v9 = vpack.c.bf16 %v3858_v21, %v3857_v17  ;;  %v3855_v47 = vmax.f32 %v3801_v55, 0.0  ;;  %v6407_v21 = vld [vmem:[#allocation2 + $0x198] sm:$0xff]   ;;  %v8693_v55 = vld [vmem:[%s9174_s1] ss:$8 sps:$4 sm:$0xff]  }
 0x5e7   :  { %v3827_v3 = vpop.f32.mrf.mxu0  ;;  %v8699_v17 = vld [vmem:[%s9174_s1 + $0x14] ss:$8 sps:$4 sm:$0xff]  }
 0x5e8   :  { %v3828_v2 = vadd.f32 %v3827_v3, %v7665_v12  ;;  %v3796_v3 = vadd.f32 %v3795_v54, %v9408_v1  ;;  %v3856_v22 = vmax.f32 %v3804_v29, 0.0  ;;  %v6406_v29 = vld [vmem:[#allocation2 + $0x180] sm:$0xff]  }
 0x5e9   :  { %v3829_v7 = vpop.f32.mrf.mxu0 }
 0x5ea   :  { %v3862_v59 = vmax.f32 %v3828_v2, 0.0  ;;  %v3854_v53 = vmax.f32 %v3796_v3, 0.0  ;;  %v3875_v50 = vpack.c.bf16 %v3856_v22, %v3855_v47  ;;  %v6399_v2 = vld [vmem:[#allocation2 + $0x150] sm:$0xff]   ;;  %v6409_v22 = vld [vmem:[#allocation2 + $0x188] sm:$0xff]   ;;  %v6410_v47 = vld [vmem:[#allocation2 + $0x180] sm:$0xff]  }
 0x5eb   :  { %v6400_v7 = vld [vmem:[%s9175_s2 + $0x130] ss:$8 sps:$4 sm:$0xff]  }
 0x5ec   :  { %v3878_v56 = vpack.c.bf16 %v3862_v59, %v3861_v63  ;;  %v3788_v59 = vadd.f32 %v3787_v49, %v9410_v51  ;;  %v6395_v49 = vld [vmem:[%s9175_s2 + $0x120] ss:$8 sps:$4 sm:$0xff]   ;;  %v8682_v63 = vld [vmem:[%s9174_s1 + $0x4] ss:$8 sps:$4 sm:$0xff]   ;;  %v6408_v3 = vld [vmem:[#allocation2 + $0x190] sm:$0xff]  }
 0x5ee   :  { %6095 = vmatprep.subr.bf16.mxu1 %v3878_v56  ;;  %v3785_v56 = vadd.f32 %v3784_v40, %v9411_v37  ;;  %v6388_v40 = vld [vmem:[#allocation2 + $0x178] sm:$0xff]  }
 0x5ef   :  { %6096 = vmatpush3.bf16.msra.mxu1 %v3870_v48  ;;  %v3853_v48 = vmax.f32 %v3793_v60, 0.0  ;;  %v8714_v60 = vld [vmem:[%s9174_s1 + $0x24] ss:$8 sps:$4 sm:$0xff]   ;;  %v8906_v37 = vld [vmem:[%s9174_s1 + $0xf0] ss:$8 sps:$4 sm:$0xff]  }
 0x5f0   :  { %6097 = vmatprep.subr.bf16.mxu1 %v3877_v32  ;;  %v3852_v32 = vmax.f32 %v3788_v59, 0.0  ;;  %v3851_v26 = vmax.f32 %v3785_v56, 0.0  ;;  %v6411_v59 = vld [vmem:[#allocation2 + $0x178] sm:$0xff]   ;;  %v6412_v56 = vld [vmem:[#allocation2 + $0x170] sm:$0xff]  }
 0x5f1   :  { %v3874_v54 = vpack.c.bf16 %v3854_v53, %v3853_v48  ;;  %v8723_v53 = vld [vmem:[%s9174_s1 + $0x20] ss:$8 sps:$4 sm:$0xff]  }
 0x5f2   :  { %v6413_v48 = vld [vmem:[#allocation2 + $0x168] sm:$0xff]  }
 0x5f3   :  { %6098 = vmatpush3.bf16.msra.mxu1 %v8618_v52  ;;  %v3873_v52 = vpack.c.bf16 %v3852_v32, %v3851_v26  ;;  %v8744_v26 = vld [vmem:[%s9174_s1 + $0x44] ss:$8 sps:$4 sm:$0xff]  }
 0x5f4   :  { %6099 = vmatprep.subr.bf16.mxu1 %v3876_v9  ;;  %v8708_v9 = vld [vmem:[%s9174_s1 + $0x10] ss:$8 sps:$4 sm:$0xff]  }
 0x5f7   :  { %6100 = vmatpush3.bf16.msra.mxu1 %v8608_v58  ;;  %v6385_v58 = vld [vmem:[%s9175_s2 + $0x100] ss:$8 sps:$4 sm:$0xff]  }
 0x5f8   :  { %6101 = vmatprep.subr.bf16.mxu1 %v3875_v50  ;;  %v8729_v50 = vld [vmem:[%s9174_s1 + $0x34] ss:$8 sps:$4 sm:$0xff]  }
 0x5fb   :  { %6102 = vmatpush3.bf16.msra.mxu1 %v8598_v8  ;;  %v6392_v8 = vld [vmem:[%s9175_s2 + $0x114] ss:$8 sps:$4 sm:$0xff]  }
 0x5fc   :  { %6103 = vmatprep.subr.bf16.mxu1 %v3874_v54  ;;  %v8738_v54 = vld [vmem:[%s9174_s1 + $0x30] ss:$8 sps:$4 sm:$0xff]  }
 0x5ff   :  { %6104 = vmatpush3.bf16.msra.mxu1 %v8588_v38  ;;  %v9413_v38 = vmov 0  }
 0x600   :  { %6105 = vmatprep.subr.bf16.mxu1 %v3873_v52 }
 0x603   :  { %6106 = vmatpush3.bf16.msra.mxu1 %v8574_v16  ;;  %v6390_v16 = vld [vmem:[%s9175_s2 + $0x110] ss:$8 sps:$4 sm:$0xff]  }
 0x604   :  { %6107 = vmatprep.subr.bf16.mxu1 %v8628_v45  ;;  %v6394_v45 = vld [vmem:[#allocation2 + $0x160] sm:$0xff]  }
 0x607   :  { %6108 = vmatpush3.bf16.msra.mxu1 %v8568_v35  ;;  %v6389_v35 = vld [vmem:[#allocation2 + $0x170] sm:$0xff]  }
 0x608   :  { %6109 = vmatprep.subr.bf16.mxu1 %v8624_v39  ;;  %v6393_v39 = vld [vmem:[#allocation2 + $0x168] sm:$0xff]  }
 0x60b   :  { %6110 = vmatpush3.bf16.msra.mxu1 %v8559_v36  ;;  %v6397_v36 = vld [vmem:[%s9175_s2 + $0x124] ss:$8 sps:$4 sm:$0xff]  }
 0x60c   :  { %4097 = vmatprep.subr.bf16.mxu1 %v9413_v38 }
 0x60e   :  { %3969 = vmatmul.mubr.bf16.vlgmr.msra.gmra.mxu1 %v6385_v58 }
 0x60f   :  { %4098 = vmatpush1.bf16.msra.mxu1 %v6388_v40  ;;  %3976 = vmatprep.mubr.bf16.mxu1 %v6392_v8  ;;  %v6414_v8 = vld [vmem:[#allocation2 + $0x160] sm:$0xff]  }
 0x610   :  { %4099 = vmatprep.subr.bf16.mxu1 %v9413_v38 }
 0x613   :  { %4100 = vmatpush1.bf16.msra.mxu1 %v6389_v35  ;;  %v9414_v35 = vld [vmem:[#allocation25_spill] sm:$0xff] }
 0x614   :  { %4101 = vmatprep.subr.bf16.mxu1 %v9413_v38 }
 0x616   :  { %3977 = vmatmul.mubr.bf16.gmra.mxu1 %v6390_v16 }
 0x617   :  { %4102 = vmatpush1.bf16.msra.mxu1 %v6393_v39  ;;  %3984 = vmatprep.mubr.bf16.mxu1 %v6397_v36 }
 0x618   :  { %4103 = vmatprep.subr.bf16.mxu1 %v9413_v38 }
 0x61b   :  { %4104 = vmatpush1.bf16.msra.mxu1 %v6394_v45  ;;  %v6415_v45 = vld [vmem:[#allocation2 + $0x1a8] sm:$0xff]  }
 0x61c   :  { %4105 = vmatprep.subr.bf16.mxu1 %v9413_v38 }
 0x61e   :  { %3985 = vmatmul.mubr.bf16.gmra.mxu1 %v6395_v49 }
 0x61f   :  { %4106 = vmatpush1.bf16.msra.mxu1 %v6398_v15  ;;  %3992 = vmatprep.mubr.bf16.mxu1 %v6402_v0  ;;  %v8756_v0 = vld [vmem:[%s9174_s1 + $0x40] ss:$8 sps:$4 sm:$0xff]  }
 0x620   :  { %4107 = vmatprep.subr.bf16.mxu1 %v9413_v38  ;;  %v9415_v15 = vld [vmem:[#allocation26_spill] sm:$0xff] }
 0x623   :  { %4108 = vmatpush1.bf16.msra.mxu1 %v6399_v2 }
 0x624   :  { %4109 = vmatprep.subr.bf16.mxu1 %v9413_v38 }
 0x626   :  { %3993 = vmatmul.mubr.bf16.gmra.mxu1 %v6400_v7  ;;  %v8765_v7 = vld [vmem:[%s9174_s1 + $0x54] ss:$8 sps:$4 sm:$0xff]  }
 0x627   :  { %4110 = vmatpush1.bf16.msra.mxu1 %v6403_v28  ;;  %5429 = vmatprep.mubr.msk.bf16.mxu1 %vm1914_vm0, %v8682_v63 }
 0x628   :  { %4111 = vmatprep.subr.bf16.mxu1 %v9413_v38 }
 0x62b   :  { %4112 = vmatpush1.bf16.msra.mxu1 %v6404_v13 }
 0x62c   :  { %4125 = vmatprep.subr.bf16.mxu1 %v9413_v38 }
 0x62f   :  { %4126 = vmatpush2.bf16.msra.mxu1 %v6405_v20  ;;  %v6416_v20 = vld [vmem:[#allocation2 + $0x1a0] sm:$0xff]  }
 0x630   :  { %4127 = vmatprep.subr.bf16.mxu1 %v9413_v38 }
 0x633   :  { %4128 = vmatpush2.bf16.msra.mxu1 %v6406_v29 }
 0x634   :  { %4524 = vmatprep.subr.bf16.mxu1 %v9413_v38 }
 0x636   :  { %4130 = vmatmul.mubr.bf16.vlgmr.msra.gmra.mxu1 %v8693_v55 }
 0x637   :  { %4525 = vmatpush1.bf16.msra.mxu1 %v6407_v21  ;;  %5430 = vmatprep.mubr.msk.bf16.mxu1 %vm1914_vm0, %v8699_v17  ;;  %v9416_v21 = vld [vmem:[#allocation20_spill] sm:$0xff] }
 0x638   :  { %4526 = vmatprep.subr.bf16.mxu1 %v9413_v38 }
 0x63b   :  { %4527 = vmatpush1.bf16.msra.mxu1 %v6408_v3 }
 0x63c   :  { %4528 = vmatprep.subr.bf16.mxu1 %v9413_v38 }
 0x63e   :  { %4138 = vmatmul.mubr.bf16.gmra.mxu1 %v8708_v9 }
 0x63f   :  { %4529 = vmatpush1.bf16.msra.mxu1 %v6409_v22  ;;  %5431 = vmatprep.mubr.msk.bf16.mxu1 %vm1914_vm0, %v8714_v60 }
 0x640   :  { %4530 = vmatprep.subr.bf16.mxu1 %v9413_v38 }
 0x643   :  { %4531 = vmatpush1.bf16.msra.mxu1 %v6410_v47 }
 0x644   :  { %4532 = vmatprep.subr.bf16.mxu1 %v9413_v38 }
 0x646   :  { %4146 = vmatmul.mubr.bf16.gmra.mxu1 %v8723_v53 }
 0x647   :  { %4533 = vmatpush1.bf16.msra.mxu1 %v6411_v59  ;;  %5432 = vmatprep.mubr.msk.bf16.mxu1 %vm1914_vm0, %v8729_v50 }
 0x648   :  { %4534 = vmatprep.subr.bf16.mxu1 %v9413_v38 }
 0x64b   :  { %4535 = vmatpush1.bf16.msra.mxu1 %v6412_v56  ;;  %v8776_v56 = vld [vmem:[%s9174_s1 + $0x50] ss:$8 sps:$4 sm:$0xff]  }
 0x64c   :  { %4536 = vmatprep.subr.bf16.mxu1 %v9413_v38 }
 0x64e   :  { %v6071_v32 = vpop.f32.mrf.mxu1  ;;  %4154 = vmatmul.mubr.bf16.gmra.mxu1 %v8738_v54 }
 0x64f   :  { %4537 = vmatpush1.bf16.msra.mxu1 %v6413_v48  ;;  %5433 = vmatprep.mubr.msk.bf16.mxu1 %vm1914_vm0, %v8744_v26  ;;  %v9417_v48 = vld [vmem:[#allocation21_spill] sm:$0xff] }
 0x650   :  { %v6072_v52 = vpop.f32.mrf.mxu1  ;;  %4538 = vmatprep.subr.bf16.mxu1 %v9413_v38 }
 0x651   :  { %v6073_v58 = vadd.f32 %v6072_v52, %v6071_v32 }
 0x652   :  { %v6074_v40 = vpop.f32.mrf.mxu1 }
 0x653   :  { %v8750_v16 = vadd.f32 %v6073_v58, %v9414_v35  ;;  %4539 = vmatpush1.bf16.msra.mxu1 %v6414_v8 }
 0x654   :  { %v6075_v36 = vpop.f32.mrf.mxu1  ;;  %4552 = vmatprep.subr.bf16.mxu1 %v9413_v38 }
 0x655   :  { %v6076_v39 = vadd.f32 %v6075_v36, %v6074_v40  ;;  %v9419_v40 = vld [vmem:[#allocation7_spill] sm:$0xff] }
 0x656   :  { %v6077_v49 = vpop.f32.mrf.mxu1  ;;  %4162 = vmatmul.mubr.bf16.gmra.mxu1 %v8756_v0 }
 0x657   :  { %v8760_v2 = vadd.f32 %v6076_v39, %v9415_v15  ;;  %4553 = vmatpush2.bf16.msra.mxu1 %v6415_v45  ;;  %5434 = vmatprep.mubr.msk.bf16.mxu1 %vm1914_vm0, %v8765_v7  ;;  %v9421_v15 = vld [vmem:[#allocation9_spill] sm:$0xff] }
 0x658   :  { %v6078_v28 = vpop.f32.mrf.mxu1  ;;  %4554 = vmatprep.subr.bf16.mxu1 %v9413_v38  ;;  %v9418_v38 = vld [vmem:[#allocation37_spill] sm:$0xff] }
 0x659   :  { %v6079_v13 = vadd.f32 %v6078_v28, %v6077_v49  ;;  %v9420_v49 = vld [vmem:[#allocation8_spill] sm:$0xff] }
 0x65a   :  { %v6080_v29 = vpop.f32.mrf.mxu1 }
 0x65b   :  { %v8771_v3 = vadd.f32 %v6079_v13, %v9416_v21  ;;  %4555 = vmatpush2.bf16.msra.mxu1 %v6416_v20  ;;  %v9422_v13 = vld [vmem:[#allocation10_spill] sm:$0xff] }
 0x65c   :  { %v6081_v22 = vpop.f32.mrf.mxu1 }
 0x65d   :  { %v6082_v47 = vadd.f32 %v6081_v22, %v6080_v29  ;;  %v9423_v22 = vld [vmem:[#allocation19_spill] sm:$0xff] }
 0x65e   :  { %v6083_v59 = vpop.f32.mrf.mxu1  ;;  %4170 = vmatmul.mubr.bf16.gmra.mxu1 %v8776_v56 }
 0x65f   :  { %v8780_v32 = vadd.f32 %v6082_v47, %v9417_v48  ;;  %5435 = vmatprep.mubr.msk.bf16.mxu1 %vm1914_vm0, %v9418_v38  ;;  %v8799_v38 = vld [vmem:[%s9174_s1 + $0x70] ss:$8 sps:$4 sm:$0xff]  }
 0x660   :  { %v6084_v52 = vpop.f32.mrf.mxu1 }
 0x661   :  { %v6085_v58 = vadd.f32 %v6084_v52, %v6083_v59  ;;  %v9424_v52 = vld [vmem:[#allocation11_spill] sm:$0xff] }
 0x662   :  { %v6086_v8 = vpop.f32.mrf.mxu1 }
 0x663   :  { %v8785_v35 = vadd.f32 %v6085_v58, %v9419_v40  ;;  %v8815_v40 = vld [vmem:[%s9174_s1 + $0x80] ss:$8 sps:$4 sm:$0xff]  }
 0x664   :  { %v6087_v36 = vpop.f32.mrf.mxu1 }
 0x665   :  { %v6088_v39 = vadd.f32 %v6087_v36, %v6086_v8  ;;  %v8808_v8 = vld [vmem:[%s9174_s1 + $0x84] ss:$8 sps:$4 sm:$0xff]   ;;  %v8821_v36 = vld [vmem:[%s9174_s1 + $0x94] ss:$8 sps:$4 sm:$0xff]  }
 0x666   :  { %v6089_v45 = vpop.f32.mrf.mxu1  ;;  %4178 = vmatmul.mubr.bf16.gmra.mxu1 %v9420_v49  ;;  %v8841_v49 = vld [vmem:[%s9174_s1 + $0xa0] ss:$8 sps:$4 sm:$0xff]  }
 0x667   :  { %v8789_v28 = vadd.f32 %v6088_v39, %v9421_v15  ;;  %5436 = vmatprep.mubr.msk.bf16.mxu1 %vm1914_vm0, %v9422_v13  ;;  %v8828_v39 = vld [vmem:[%s9174_s1 + $0x90] ss:$8 sps:$4 sm:$0xff]   ;;  %v8847_v15 = vld [vmem:[%s9174_s1 + $0xb4] ss:$8 sps:$4 sm:$0xff]  }
 0x668   :  { %v6090_v20 = vpop.f32.mrf.mxu1  ;;  %v8854_v13 = vld [vmem:[%s9174_s1 + $0xb0] ss:$8 sps:$4 sm:$0xff]  }
 0x669   :  { %v6091_v29 = vadd.f32 %v6090_v20, %v6089_v45  ;;  %v8834_v45 = vld [vmem:[%s9174_s1 + $0xa4] ss:$8 sps:$4 sm:$0xff]  }
 0x66a   :  { %v6092_v21 = vpop.f32.mrf.mxu1  ;;  %v8860_v20 = vld [vmem:[%s9174_s1 + $0xc4] ss:$8 sps:$4 sm:$0xff]  }
 0x66b   :  { %v8794_v47 = vadd.f32 %v6091_v29, %v9423_v22  ;;  %v8867_v29 = vld [vmem:[%s9174_s1 + $0xc0] ss:$8 sps:$4 sm:$0xff]   ;;  %v8880_v22 = vld [vmem:[%s9174_s1 + $0xd0] ss:$8 sps:$4 sm:$0xff]  }
 0x66c   :  { %v6093_v59 = vpop.f32.mrf.mxu1 }
 0x66d   :  { %v6094_v48 = vadd.f32 %v6093_v59, %v6092_v21  ;;  %v8873_v21 = vld [vmem:[%s9174_s1 + $0xd4] ss:$8 sps:$4 sm:$0xff]   ;;  %v8886_v59 = vld [vmem:[%s9174_s1 + $0xe4] ss:$8 sps:$4 sm:$0xff]  }
 0x66e   :  { %4186 = vmatmul.mubr.bf16.gmra.mxu1 %v8799_v38 }
 0x66f   :  { %v8803_v58 = vadd.f32 %v6094_v48, %v9424_v52  ;;  %5437 = vmatprep.mubr.msk.bf16.mxu1 %vm1914_vm0, %v8808_v8  ;;  %v8893_v48 = vld [vmem:[%s9174_s1 + $0xe0] ss:$8 sps:$4 sm:$0xff]   ;;  %v8899_v52 = vld [vmem:[%s9174_s1 + $0xf4] ss:$8 sps:$4 sm:$0xff]  }
 0x676   :  { %4194 = vmatmul.mubr.bf16.gmra.mxu1 %v8815_v40 }
 0x677   :  { %5438 = vmatprep.mubr.msk.bf16.mxu1 %vm1914_vm0, %v8821_v36 }
 0x67e   :  { %4202 = vmatmul.mubr.bf16.gmra.mxu1 %v8828_v39 }
 0x67f   :  { %5439 = vmatprep.mubr.msk.bf16.mxu1 %vm1914_vm0, %v8834_v45 }
 0x686   :  { %4210 = vmatmul.mubr.bf16.gmra.mxu1 %v8841_v49 }
 0x687   :  { %5440 = vmatprep.mubr.msk.bf16.mxu1 %vm1914_vm0, %v8847_v15 }
 0x68e   :  { %4218 = vmatmul.mubr.bf16.gmra.mxu1 %v8854_v13 }
 0x68f   :  { %5441 = vmatprep.mubr.msk.bf16.mxu1 %vm1914_vm0, %v8860_v20 }
 0x696   :  { %4226 = vmatmul.mubr.bf16.gmra.mxu1 %v8867_v29 }
 0x697   :  { %5442 = vmatprep.mubr.msk.bf16.mxu1 %vm1914_vm0, %v8873_v21 }
 0x69e   :  { %4234 = vmatmul.mubr.bf16.gmra.mxu1 %v8880_v22 }
 0x69f   :  { %5443 = vmatprep.mubr.msk.bf16.mxu1 %vm1914_vm0, %v8886_v59 }
 0x6a6   :  { %4242 = vmatmul.mubr.bf16.gmra.mxu1 %v8893_v48 }
 0x6a7   :  { %5444 = vmatprep.mubr.msk.bf16.mxu1 %vm1914_vm0, %v8899_v52 }
 0x6ae   :  { %4250 = vmatmul.mubr.bf16.gmra.mxu1 %v8906_v37 }
 0x6af   :  { %5471 = vmatprep.mubr.msk.bf16.mxu1 %vm1914_vm0, %v8682_v63 }
 0x6b6   :  { %4557 = vmatmul.mubr.bf16.vlgmr.msra.gmra.mxu1 %v8693_v55 }
 0x6b7   :  { %5472 = vmatprep.mubr.msk.bf16.mxu1 %vm1914_vm0, %v8699_v17 }
 0x6be   :  { %4565 = vmatmul.mubr.bf16.gmra.mxu1 %v8708_v9 }
 0x6bf   :  { %5473 = vmatprep.mubr.msk.bf16.mxu1 %vm1914_vm0, %v8714_v60 }
 0x6c6   :  { %4573 = vmatmul.mubr.bf16.gmra.mxu1 %v8723_v53 }
 0x6c7   :  { %5474 = vmatprep.mubr.msk.bf16.mxu1 %vm1914_vm0, %v8729_v50 }
 0x6ce   :  { %v6111_v51 = vpop.f32.mrf.mxu1  ;;  %4581 = vmatmul.mubr.bf16.gmra.mxu1 %v8738_v54 }
 0x6cf   :  { %5475 = vmatprep.mubr.msk.bf16.mxu1 %vm1914_vm0, %v8744_v26 }
 0x6d0   :  { %v6112_v63 = vpop.f32.mrf.mxu1 }
 0x6d1   :  { %v6113_v55 = vadd.f32 %v6112_v63, %v6111_v51 }
 0x6d2   :  { %v6114_v4 = vpop.f32.mrf.mxu1 }
 0x6d3   :  { %v8924_v17 = vadd.f32 %v6113_v55, %v8750_v16 }
 0x6d4   :  { %v6115_v9 = vpop.f32.mrf.mxu1 }
 0x6d5   :  { %9425 = vst [vmem:[#allocation22_spill] sm:$0xff] %v8924_v17  ;;  %v6116_v1 = vadd.f32 %v6115_v9, %v6114_v4 }
 0x6d6   :  { %v6117_v60 = vpop.f32.mrf.mxu1  ;;  %4589 = vmatmul.mubr.bf16.gmra.mxu1 %v8756_v0 }
 0x6d7   :  { %v8928_v53 = vadd.f32 %v6116_v1, %v8760_v2  ;;  %5476 = vmatprep.mubr.msk.bf16.mxu1 %vm1914_vm0, %v8765_v7  ;;  %v6524_v1 = vld [vmem:[%s9174_s1 + $0x64] ss:$8 sps:$4 sm:$0xff]  }
 0x6d8   :  { %v6118_v50 = vpop.f32.mrf.mxu1 }
 0x6d9   :  { %9426 = vst [vmem:[#allocation12_spill] sm:$0xff] %v8928_v53  ;;  %v6119_v54 = vadd.f32 %v6118_v50, %v6117_v60 }
 0x6da   :  { %v6120_v26 = vpop.f32.mrf.mxu1 }
 0x6db   :  { %v8933_v51 = vadd.f32 %v6119_v54, %v8771_v3  ;;  %v6526_v54 = vld [vmem:[%s9174_s1 + $0x74] ss:$8 sps:$4 sm:$0xff]  }
 0x6dc   :  { %v6121_v63 = vpop.f32.mrf.mxu1 }
 0x6dd   :  { %9427 = vst [vmem:[#allocation24_spill] sm:$0xff] %v8933_v51  ;;  %v6122_v16 = vadd.f32 %v6121_v63, %v6120_v26 }
 0x6de   :  { %v6123_v55 = vpop.f32.mrf.mxu1  ;;  %4597 = vmatmul.mubr.bf16.gmra.mxu1 %v8776_v56  ;;  %v6525_v56 = vld [vmem:[%s9174_s1 + $0x60] ss:$8 sps:$4 sm:$0xff]  }
 0x6df   :  { %v8937_v4 = vadd.f32 %v6122_v16, %v8780_v32  ;;  %5477 = vmatprep.mubr.msk.bf16.mxu1 %vm1914_vm0, %v6524_v1 }
 0x6e0   :  { %v6124_v0 = vpop.f32.mrf.mxu1 }
 0x6e1   :  { %9428 = vst [vmem:[#allocation13_spill] sm:$0xff] %v8937_v4  ;;  %v6125_v2 = vadd.f32 %v6124_v0, %v6123_v55 }
 0x6e2   :  { %v6126_v7 = vpop.f32.mrf.mxu1 }
 0x6e3   :  { %v8944_v3 = vadd.f32 %v6125_v2, %v8785_v35 }
 0x6e4   :  { %v6127_v9 = vpop.f32.mrf.mxu1 }
 0x6e5   :  { %9429 = vst [vmem:[#allocation27_spill] sm:$0xff] %v8944_v3  ;;  %v6128_v60 = vadd.f32 %v6127_v9, %v6126_v7 }
 0x6e6   :  { %v6129_v50 = vpop.f32.mrf.mxu1  ;;  %4605 = vmatmul.mubr.bf16.gmra.mxu1 %v6525_v56 }
 0x6e7   :  { %v8950_v32 = vadd.f32 %v6128_v60, %v8789_v28  ;;  %5478 = vmatprep.mubr.msk.bf16.mxu1 %vm1914_vm0, %v6526_v54 }
 0x6e8   :  { %v6130_v26 = vpop.f32.mrf.mxu1 }
 0x6e9   :  { %9430 = vst [vmem:[#allocation39_spill] sm:$0xff] %v8950_v32  ;;  %v6131_v35 = vadd.f32 %v6130_v26, %v6129_v50  ;;  %v9436_v32 = vld [vmem:[#allocation23_spill] sm:$0xff] }
 0x6ea   :  { %v6132_v63 = vpop.f32.mrf.mxu1 }
 0x6eb   :  { %v8957_v16 = vadd.f32 %v6131_v35, %v8794_v47 }
 0x6ec   :  { %v6133_v55 = vpop.f32.mrf.mxu1 }
 0x6ed   :  { %9431 = vst [vmem:[#allocation28_spill] sm:$0xff] %v8957_v16  ;;  %v6134_v1 = vadd.f32 %v6133_v55, %v6132_v63 }
 0x6ee   :  { %4613 = vmatmul.mubr.bf16.gmra.mxu1 %v8799_v38 }
 0x6ef   :  { %v8961_v0 = vadd.f32 %v6134_v1, %v8803_v58  ;;  %5479 = vmatprep.mubr.msk.bf16.mxu1 %vm1914_vm0, %v8808_v8 }
 0x6f1   :  { %9432 = vst [vmem:[#allocation29_spill] sm:$0xff] %v8961_v0 }
 0x6f6   :  { %v4131_v28 = vpop.f32.mrf.mxu1  ;;  %4621 = vmatmul.mubr.bf16.gmra.mxu1 %v8815_v40 }
 0x6f7   :  { %5480 = vmatprep.mubr.msk.bf16.mxu1 %vm1914_vm0, %v8821_v36  ;;  %v4132_v47 = vadd.f32 %v4131_v28, %v7785_v57 }
 0x6f8   :  { %v4133_v2 = vpop.f32.mrf.mxu1 }
 0x6f9   :  { %v4258_v38 = vmax.f32 %v4132_v47, 0.0 }
 0x6fa   :  { %v4134_v7 = vpop.f32.mrf.mxu1 }
 0x6fb   :  { %v4135_v9 = vadd.f32 %v4134_v7, %v7788_v44 }
 0x6fc   :  { %v4136_v60 = vpop.f32.mrf.mxu1 }
 0x6fd   :  { %v4259_v50 = vmax.f32 %v4135_v9, 0.0 }
 0x6fe   :  { %v4139_v58 = vpop.f32.mrf.mxu1  ;;  %4629 = vmatmul.mubr.bf16.gmra.mxu1 %v8828_v39 }
 0x6ff   :  { %v8971_v56 = vpack.c.bf16 %v4259_v50, %v4258_v38  ;;  %5481 = vmatprep.mubr.msk.bf16.mxu1 %vm1914_vm0, %v8834_v45  ;;  %v4140_v40 = vadd.f32 %v4139_v58, %v7777_v41 }
 0x700   :  { %v4141_v8 = vpop.f32.mrf.mxu1 }
 0x701   :  { %v4260_v35 = vmax.f32 %v4140_v40, 0.0 }
 0x702   :  { %v4142_v36 = vpop.f32.mrf.mxu1 }
 0x703   :  { %v4143_v54 = vadd.f32 %v4142_v36, %v7779_v10 }
 0x704   :  { %v4144_v26 = vpop.f32.mrf.mxu1 }
 0x705   :  { %v4261_v63 = vmax.f32 %v4143_v54, 0.0 }
 0x706   :  { %v4147_v55 = vpop.f32.mrf.mxu1  ;;  %4637 = vmatmul.mubr.bf16.gmra.mxu1 %v8841_v49 }
 0x707   :  { %v8978_v1 = vpack.c.bf16 %v4261_v63, %v4260_v35  ;;  %5482 = vmatprep.mubr.msk.bf16.mxu1 %vm1914_vm0, %v8847_v15  ;;  %v4148_v45 = vadd.f32 %v4147_v55, %v7769_v43  ;;  %v6419_v35 = vld [vmem:[%s9175_s2 + $0x144] ss:$8 sps:$4 sm:$0xff]  }
 0x708   :  { %v4149_v39 = vpop.f32.mrf.mxu1  ;;  %4395 = vmatprep.mubr.bf16.mxu0 %v6419_v35 }
 0x709   :  { %v4262_v7 = vmax.f32 %v4148_v45, 0.0 }
 0x70a   :  { %v4150_v28 = vpop.f32.mrf.mxu1 }
 0x70b   :  { %v4151_v2 = vadd.f32 %v4150_v28, %v7771_v25 }
 0x70c   :  { %v4152_v47 = vpop.f32.mrf.mxu1 }
 0x70d   :  { %v4263_v9 = vmax.f32 %v4151_v2, 0.0 }
 0x70e   :  { %v4155_v60 = vpop.f32.mrf.mxu1  ;;  %4645 = vmatmul.mubr.bf16.gmra.mxu1 %v8854_v13 }
 0x70f   :  { %v8985_v38 = vpack.c.bf16 %v4263_v9, %v4262_v7  ;;  %5483 = vmatprep.mubr.msk.bf16.mxu1 %vm1914_vm0, %v8860_v20  ;;  %v4156_v15 = vadd.f32 %v4155_v60, %v7757_v31 }
 0x710   :  { %v4157_v49 = vpop.f32.mrf.mxu1 }
 0x711   :  { %v4264_v40 = vmax.f32 %v4156_v15, 0.0 }
 0x712   :  { %v4158_v50 = vpop.f32.mrf.mxu1 }
 0x713   :  { %v4159_v58 = vadd.f32 %v4158_v50, %v7759_v11 }
 0x714   :  { %v4160_v8 = vpop.f32.mrf.mxu1 }
 0x715   :  { %v4265_v36 = vmax.f32 %v4159_v58, 0.0 }
 0x716   :  { %v4163_v54 = vpop.f32.mrf.mxu1  ;;  %4653 = vmatmul.mubr.bf16.gmra.mxu1 %v8867_v29 }
 0x717   :  { %v8992_v26 = vpack.c.bf16 %v4265_v36, %v4264_v40  ;;  %5484 = vmatprep.mubr.msk.bf16.mxu1 %vm1914_vm0, %v8873_v21  ;;  %v4164_v20 = vadd.f32 %v4163_v54, %v7746_v62 }
 0x718   :  { %v4165_v13 = vpop.f32.mrf.mxu1 }
 0x719   :  { %v4266_v45 = vmax.f32 %v4164_v20, 0.0 }
 0x71a   :  { %v4166_v63 = vpop.f32.mrf.mxu1 }
 0x71b   :  { %v4167_v55 = vadd.f32 %v4166_v63, %v7748_v5 }
 0x71c   :  { %v4168_v39 = vpop.f32.mrf.mxu1 }
 0x71d   :  { %v4267_v28 = vmax.f32 %v4167_v55, 0.0 }
 0x71e   :  { %v4171_v29 = vpop.f32.mrf.mxu1  ;;  %4661 = vmatmul.mubr.bf16.gmra.mxu1 %v8880_v22 }
 0x71f   :  { %v9002_v2 = vpack.c.bf16 %v4267_v28, %v4266_v45  ;;  %5485 = vmatprep.mubr.msk.bf16.mxu1 %vm1914_vm0, %v8886_v59  ;;  %v4172_v47 = vadd.f32 %v4171_v29, %v7722_v24 }
 0x720   :  { %v4173_v21 = vpop.f32.mrf.mxu1 }
 0x721   :  { %v4268_v49 = vmax.f32 %v4172_v47, 0.0 }
 0x722   :  { %v4174_v7 = vpop.f32.mrf.mxu1 }
 0x723   :  { %v4175_v9 = vadd.f32 %v4174_v7, %v7724_v42 }
 0x724   :  { %v4176_v60 = vpop.f32.mrf.mxu1 }
 0x725   :  { %v4269_v15 = vmax.f32 %v4175_v9, 0.0  ;;  %v9433_v60 = vld [vmem:[#allocation38_spill] sm:$0xff] }
 0x726   :  { %v4179_v50 = vpop.f32.mrf.mxu1  ;;  %4669 = vmatmul.mubr.bf16.gmra.mxu1 %v8893_v48 }
 0x727   :  { %v9009_v58 = vpack.c.bf16 %v4269_v15, %v4268_v49  ;;  %5486 = vmatprep.mubr.msk.bf16.mxu1 %vm1914_vm0, %v8899_v52  ;;  %v4180_v59 = vadd.f32 %v4179_v50, %v9354_v34 }
 0x728   :  { %v4181_v22 = vpop.f32.mrf.mxu1 }
 0x729   :  { %v4270_v54 = vmax.f32 %v4180_v59, 0.0 }
 0x72a   :  { %v4182_v8 = vpop.f32.mrf.mxu1 }
 0x72b   :  { %v4183_v40 = vadd.f32 %v4182_v8, %v9355_v46 }
 0x72c   :  { %v4184_v36 = vpop.f32.mrf.mxu1 }
 0x72d   :  { %v4271_v13 = vmax.f32 %v4183_v40, 0.0  ;;  %v9434_v40 = vld [vmem:[#allocation35_spill] sm:$0xff] }
 0x72e   :  { %v4187_v20 = vpop.f32.mrf.mxu1  ;;  %4677 = vmatmul.mubr.bf16.gmra.mxu1 %v8906_v37 }
 0x72f   :  { %v9016_v35 = vpack.c.bf16 %v4271_v13, %v4270_v54  ;;  %v4188_v63 = vadd.f32 %v4187_v20, %v9356_v61  ;;  %v9435_v13 = vld [vmem:[#allocation36_spill] sm:$0xff] }
 0x730   :  { %v4189_v48 = vpop.f32.mrf.mxu1 }
 0x731   :  { %v4272_v45 = vmax.f32 %v4188_v63, 0.0 }
 0x732   :  { %v4190_v55 = vpop.f32.mrf.mxu1 }
 0x733   :  { %v4191_v52 = vadd.f32 %v4190_v55, %v9357_v27 }
 0x734   :  { %v4192_v39 = vpop.f32.mrf.mxu1 }
 0x735   :  { %v4273_v28 = vmax.f32 %v4191_v52, 0.0 }
 0x736   :  { %v4195_v29 = vpop.f32.mrf.mxu1 }
 0x737   :  { %v4297_v21 = vpack.c.bf16 %v4273_v28, %v4272_v45  ;;  %v4196_v7 = vadd.f32 %v4195_v29, %v9363_v33 }
 0x738   :  { %v4197_v47 = vpop.f32.mrf.mxu1 }
 0x739   :  { %v4274_v15 = vmax.f32 %v4196_v7, 0.0 }
 0x73a   :  { %v4198_v9 = vpop.f32.mrf.mxu1 }
 0x73b   :  { %v4199_v49 = vadd.f32 %v4198_v9, %v9433_v60 }
 0x73c   :  { %v4200_v37 = vpop.f32.mrf.mxu1 }
 0x73d   :  { %v4275_v50 = vmax.f32 %v4199_v49, 0.0 }
 0x73e   :  { %v4203_v22 = vpop.f32.mrf.mxu1 }
 0x73f   :  { %v9022_v59 = vpack.c.bf16 %v4275_v50, %v4274_v15  ;;  %v4204_v36 = vadd.f32 %v4203_v22, %v9434_v40 }
 0x740   :  { %v4205_v8 = vpop.f32.mrf.mxu1 }
 0x741   :  { %v4276_v63 = vmax.f32 %v4204_v36, 0.0 }
 0x742   :  { %v4206_v54 = vpop.f32.mrf.mxu1 }
 0x743   :  { %v4207_v20 = vadd.f32 %v4206_v54, %v9435_v13 }
 0x744   :  { %v4208_v48 = vpop.f32.mrf.mxu1 }
 0x745   :  { %v4277_v55 = vmax.f32 %v4207_v20, 0.0 }
 0x746   :  { %v9026_v52 = vpop.f32.mrf.mxu1 }
 0x747   :  { %v9028_v39 = vpack.c.bf16 %v4277_v55, %v4276_v63 }
 0x748   :  { %v4213_v45 = vpop.f32.mrf.mxu1 }
 0x74a   :  { %v4214_v28 = vpop.f32.mrf.mxu1 }
 0x74c   :  { %v4216_v29 = vpop.f32.mrf.mxu1 }
 0x74e   :  { %v4219_v47 = vpop.f32.mrf.mxu1 }
 0x750   :  { %v4221_v7 = vpop.f32.mrf.mxu1 }
 0x752   :  { %v4222_v9 = vpop.f32.mrf.mxu1 }
 0x754   :  { %v4224_v49 = vpop.f32.mrf.mxu1 }
 0x756   :  { %v4227_v37 = vpop.f32.mrf.mxu1 }
 0x758   :  { %v4229_v15 = vpop.f32.mrf.mxu1 }
 0x75a   :  { %v4230_v50 = vpop.f32.mrf.mxu1 }
 0x75c   :  { %v4232_v22 = vpop.f32.mrf.mxu1 }
 0x75e   :  { %v4235_v8 = vpop.f32.mrf.mxu1 }
 0x760   :  { %v4237_v54 = vpop.f32.mrf.mxu1 }
 0x762   :  { %v4238_v48 = vpop.f32.mrf.mxu1 }
 0x763   :  { %v4239_v54 = vadd.f32 %v4238_v48, %v7720_v14  ;;  %v4228_v48 = vadd.f32 %v4227_v37, %v7739_v6 }
 0x764   :  { %v4240_v36 = vpop.f32.mrf.mxu1 }
 0x766   :  { %v4243_v20 = vpop.f32.mrf.mxu1 }
 0x767   :  { %v4244_v49 = vadd.f32 %v4243_v20, %v7684_v18 }
 0x768   :  { %v4245_v0 = vpop.f32.mrf.mxu1 }
 0x769   :  { %v4286_v53 = vmax.f32 %v4244_v49, 0.0 }
 0x76a   :  { %v4246_v16 = vpop.f32.mrf.mxu1 }
 0x76b   :  { %v4247_v29 = vadd.f32 %v4246_v16, %v9436_v32  ;;  %v4231_v16 = vadd.f32 %v4230_v50, %v7741_v23 }
 0x76c   :  { %v4248_v63 = vpop.f32.mrf.mxu1 }
 0x76d   :  { %v4287_v4 = vmax.f32 %v4247_v29, 0.0  ;;  %v4236_v63 = vadd.f32 %v4235_v8, %v7705_v19 }
 0x76e   :  { %v4251_v55 = vpop.f32.mrf.mxu1 }
 0x76f   :  { %v4252_v7 = vadd.f32 %v4251_v55, %v9412_v30  ;;  %v4285_v55 = vmax.f32 %v4239_v54, 0.0  ;;  %v4304_v30 = vpack.c.bf16 %v4287_v4, %v4286_v53  ;;  %v4284_v29 = vmax.f32 %v4236_v63, 0.0 }
 0x770   :  { %v4253_v45 = vpop.f32.mrf.mxu1 }
 0x771   :  { %v4288_v36 = vmax.f32 %v4252_v7, 0.0 }
 0x772   :  { %v4254_v3 = vpop.f32.mrf.mxu1 }
 0x773   :  { %v4255_v15 = vadd.f32 %v4254_v3, %v7665_v12 }
 0x774   :  { %v4256_v22 = vpop.f32.mrf.mxu1 }
 0x775   :  { %v4289_v51 = vmax.f32 %v4255_v15, 0.0  ;;  %v9437_v15 = vld [vmem:[#allocation32_spill] sm:$0xff] }
 0x776   :  { %v4558_v0 = vpop.f32.mrf.mxu1  ;;  %v4223_v8 = vadd.f32 %v4222_v9, %v9437_v15 }
 0x777   :  { %v4305_v45 = vpack.c.bf16 %v4289_v51, %v4288_v36  ;;  %v4559_v20 = vadd.f32 %v4558_v0, %v7785_v57  ;;  %v4283_v51 = vmax.f32 %v4231_v16, 0.0  ;;  %v9438_v57 = vld [vmem:[#allocation31_spill] sm:$0xff]  ;;  %v9439_v36 = vld [vmem:[#allocation34_spill] sm:$0xff] }
 0x778   :  { %v4560_v17 = vpop.f32.mrf.mxu1  ;;  %v4220_v4 = vadd.f32 %v4219_v47, %v9438_v57 }
 0x779   :  { %6135 = vmatprep.subr.bf16.mxu0 %v4305_v45  ;;  %v4303_v17 = vpack.c.bf16 %v4285_v55, %v4284_v29  ;;  %v4685_v22 = vmax.f32 %v4559_v20, 0.0  ;;  %v9440_v45 = vld [vmem:[#allocation33_spill] sm:$0xff] }
 0x77a   :  { %6136 = vmatpush3.bf16.msra.mxu0 %v4297_v21  ;;  %v4561_v3 = vpop.f32.mrf.mxu1  ;;  %v4282_v21 = vmax.f32 %v4228_v48, 0.0  ;;  %v4280_v16 = vmax.f32 %v4220_v4, 0.0 }
 0x77b   :  { %v4562_v7 = vadd.f32 %v4561_v3, %v7788_v44  ;;  %6137 = vmatprep.subr.bf16.mxu0 %v4304_v30  ;;  %v4215_v44 = vadd.f32 %v4214_v28, %v9439_v36  ;;  %v4281_v30 = vmax.f32 %v4223_v8, 0.0 }
 0x77c   :  { %v4563_v49 = vpop.f32.mrf.mxu1  ;;  %v4302_v0 = vpack.c.bf16 %v4283_v51, %v4282_v21 }
 0x77d   :  { %v4686_v50 = vmax.f32 %v4562_v7, 0.0  ;;  %v4279_v20 = vmax.f32 %v4215_v44, 0.0  ;;  %v4301_v3 = vpack.c.bf16 %v4281_v30, %v4280_v16  ;;  %v6425_v16 = vld [vmem:[%s9175_s2 + $0x164] ss:$8 sps:$4 sm:$0xff]  }
 0x77e   :  { %6138 = vmatpush3.bf16.msra.mxu0 %v9016_v35  ;;  %v4566_v53 = vpop.f32.mrf.mxu1  ;;  %v4212_v35 = vadd.f32 %v9026_v52, %v9440_v45 }
 0x77f   :  { %v9043_v54 = vpack.c.bf16 %v4686_v50, %v4685_v22  ;;  %6139 = vmatprep.subr.bf16.mxu0 %v4303_v17  ;;  %v4567_v9 = vadd.f32 %v4566_v53, %v7777_v41 }
 0x780   :  { %v4568_v37 = vpop.f32.mrf.mxu1  ;;  %v4278_v7 = vmax.f32 %v4212_v35, 0.0 }
 0x781   :  { %v4687_v48 = vmax.f32 %v4567_v9, 0.0 }
 0x782   :  { %6140 = vmatpush3.bf16.msra.mxu0 %v9009_v58  ;;  %v4569_v63 = vpop.f32.mrf.mxu1  ;;  %v4300_v8 = vpack.c.bf16 %v4279_v20, %v4278_v7 }
 0x783   :  { %v4570_v47 = vadd.f32 %v4569_v63, %v7779_v10  ;;  %6141 = vmatprep.subr.bf16.mxu0 %v4302_v0 }
 0x784   :  { %v4571_v55 = vpop.f32.mrf.mxu1 }
 0x785   :  { %v4688_v29 = vmax.f32 %v4570_v47, 0.0 }
 0x786   :  { %6142 = vmatpush3.bf16.msra.mxu0 %v9002_v2  ;;  %v4574_v28 = vpop.f32.mrf.mxu1 }
 0x787   :  { %v9052_v41 = vpack.c.bf16 %v4688_v29, %v4687_v48  ;;  %6143 = vmatprep.subr.bf16.mxu0 %v4301_v3  ;;  %v4575_v52 = vadd.f32 %v4574_v28, %v7769_v43  ;;  %v6423_v28 = vld [vmem:[%s9175_s2 + $0x160] ss:$8 sps:$4 sm:$0xff]  }
 0x788   :  { %v4576_v58 = vpop.f32.mrf.mxu1 }
 0x789   :  { %v4689_v17 = vmax.f32 %v4575_v52, 0.0  ;;  %v6428_v58 = vld [vmem:[%s9175_s2 + $0x174] ss:$8 sps:$4 sm:$0xff]  }
 0x78a   :  { %6144 = vmatpush3.bf16.msra.mxu0 %v8992_v26  ;;  %v4577_v10 = vpop.f32.mrf.mxu1 }
 0x78b   :  { %v4578_v49 = vadd.f32 %v4577_v10, %v7771_v25  ;;  %6145 = vmatprep.subr.bf16.mxu0 %v4300_v8 }
 0x78c   :  { %v4579_v51 = vpop.f32.mrf.mxu1 }
 0x78d   :  { %v4690_v22 = vmax.f32 %v4578_v49, 0.0 }
 0x78e   :  { %6146 = vmatpush3.bf16.msra.mxu0 %v8985_v38  ;;  %v4582_v2 = vpop.f32.mrf.mxu1  ;;  %v6417_v38 = vld [vmem:[%s9175_s2 + $0x140] ss:$8 sps:$4 sm:$0xff]  }
 0x78f   :  { %v9058_v50 = vpack.c.bf16 %v4690_v22, %v4689_v17  ;;  %6147 = vmatprep.subr.bf16.mxu0 %v9028_v39  ;;  %v4583_v4 = vadd.f32 %v4582_v2, %v7757_v31  ;;  %v6422_v31 = vld [vmem:[%s9175_s2 + $0x154] ss:$8 sps:$4 sm:$0xff]   ;;  %v6426_v22 = vld [vmem:[%s9175_s2 + $0x170] ss:$8 sps:$4 sm:$0xff]  }
 0x790   :  { %v4584_v53 = vpop.f32.mrf.mxu1 }
 0x791   :  { %v4691_v21 = vmax.f32 %v4583_v4, 0.0  ;;  %v6431_v53 = vld [vmem:[%s9175_s2 + $0x184] ss:$8 sps:$4 sm:$0xff]  }
 0x792   :  { %6148 = vmatpush3.bf16.msra.mxu0 %v8978_v1  ;;  %v4585_v43 = vpop.f32.mrf.mxu1 }
 0x793   :  { %v4586_v26 = vadd.f32 %v4585_v43, %v7759_v11  ;;  %6149 = vmatprep.subr.bf16.mxu0 %v9022_v59 }
 0x794   :  { %v4587_v25 = vpop.f32.mrf.mxu1 }
 0x795   :  { %v4692_v37 = vmax.f32 %v4586_v26, 0.0 }
 0x796   :  { %6150 = vmatpush3.bf16.msra.mxu0 %v8971_v56  ;;  %v4590_v39 = vpop.f32.mrf.mxu1  ;;  %v6420_v56 = vld [vmem:[%s9175_s2 + $0x150] ss:$8 sps:$4 sm:$0xff]  }
 0x797   :  { %v9072_v1 = vpack.c.bf16 %v4692_v37, %v4691_v21  ;;  %v4591_v11 = vadd.f32 %v4590_v39, %v7746_v62 }
 0x798   :  { %v4592_v44 = vpop.f32.mrf.mxu1 }
 0x799   :  { %4396 = vmatmul.mubr.bf16.vlgmr.msra.gmra.mxu0 %v6417_v38  ;;  %v4693_v9 = vmax.f32 %v4591_v11, 0.0 }
 0x79a   :  { %v4593_v59 = vpop.f32.mrf.mxu1  ;;  %4403 = vmatprep.mubr.bf16.mxu0 %v6422_v31 }
 0x79b   :  { %v4594_v30 = vadd.f32 %v4593_v59, %v7748_v5 }
 0x79c   :  { %v4595_v0 = vpop.f32.mrf.mxu1 }
 0x79d   :  { %v4694_v63 = vmax.f32 %v4594_v30, 0.0 }
 0x79e   :  { %v4598_v35 = vpop.f32.mrf.mxu1 }
 0x79f   :  { %v9082_v47 = vpack.c.bf16 %v4694_v63, %v4693_v9  ;;  %v4599_v55 = vadd.f32 %v4598_v35, %v7722_v24 }
 0x7a0   :  { %v4600_v62 = vpop.f32.mrf.mxu1 }
 0x7a1   :  { %4404 = vmatmul.mubr.bf16.gmra.mxu0 %v6420_v56  ;;  %v4695_v48 = vmax.f32 %v4599_v55, 0.0 }
 0x7a2   :  { %v4601_v20 = vpop.f32.mrf.mxu1  ;;  %4411 = vmatprep.mubr.bf16.mxu0 %v6425_v16 }
 0x7a3   :  { %v4602_v5 = vadd.f32 %v4601_v20, %v7724_v42 }
 0x7a4   :  { %v4603_v3 = vpop.f32.mrf.mxu1 }
 0x7a5   :  { %v4696_v29 = vmax.f32 %v4602_v5, 0.0 }
 0x7a6   :  { %v4606_v7 = vpop.f32.mrf.mxu1 }
 0x7a7   :  { %v9092_v8 = vpack.c.bf16 %v4696_v29, %v4695_v48  ;;  %v4607_v52 = vadd.f32 %v4606_v7, %v9354_v34 }
 0x7a8   :  { %v4608_v24 = vpop.f32.mrf.mxu1 }
 0x7a9   :  { %4412 = vmatmul.mubr.bf16.gmra.mxu0 %v6423_v28  ;;  %v4697_v51 = vmax.f32 %v4607_v52, 0.0 }
 0x7aa   :  { %v4609_v10 = vpop.f32.mrf.mxu1  ;;  %4419 = vmatprep.mubr.bf16.mxu0 %v6428_v58 }
 0x7ab   :  { %v4610_v42 = vadd.f32 %v4609_v10, %v9355_v46 }
 0x7ac   :  { %v4611_v49 = vpop.f32.mrf.mxu1 }
 0x7ad   :  { %v4698_v17 = vmax.f32 %v4610_v42, 0.0 }
 0x7ae   :  { %v4614_v2 = vpop.f32.mrf.mxu1 }
 0x7af   :  { %v9102_v4 = vpack.c.bf16 %v4698_v17, %v4697_v51  ;;  %v4615_v43 = vadd.f32 %v4614_v2, %v9356_v61 }
 0x7b0   :  { %v4616_v34 = vpop.f32.mrf.mxu1 }
 0x7b1   :  { %4420 = vmatmul.mubr.bf16.gmra.mxu0 %v6426_v22  ;;  %v4699_v21 = vmax.f32 %v4615_v43, 0.0 }
 0x7b2   :  { %v4617_v26 = vpop.f32.mrf.mxu1  ;;  %4822 = vmatprep.mubr.bf16.mxu0 %v6431_v53 }
 0x7b3   :  { %v4618_v46 = vadd.f32 %v4617_v26, %v9357_v27 }
 0x7b4   :  { %v4619_v25 = vpop.f32.mrf.mxu1 }
 0x7b5   :  { %v4700_v37 = vmax.f32 %v4618_v46, 0.0  ;;  %v9441_v46 = vld [vmem:[#allocation17_spill] sm:$0xff] }
 0x7b6   :  { %v4622_v38 = vpop.f32.mrf.mxu1 }
 0x7b7   :  { %v4724_v39 = vpack.c.bf16 %v4700_v37, %v4699_v21  ;;  %v4623_v44 = vadd.f32 %v4622_v38, %v9363_v33 }
 0x7b8   :  { %v4624_v31 = vpop.f32.mrf.mxu1 }
 0x7b9   :  { %v4701_v0 = vmax.f32 %v4623_v44, 0.0 }
 0x7ba   :  { %v4625_v11 = vpop.f32.mrf.mxu1 }
 0x7bb   :  { %v4626_v59 = vadd.f32 %v4625_v11, %v9433_v60 }
 0x7bc   :  { %v4627_v30 = vpop.f32.mrf.mxu1 }
 0x7bd   :  { %v4702_v9 = vmax.f32 %v4626_v59, 0.0 }
 0x7be   :  { %v4630_v61 = vpop.f32.mrf.mxu1 }
 0x7bf   :  { %v9108_v63 = vpack.c.bf16 %v4702_v9, %v4701_v0  ;;  %v4631_v27 = vadd.f32 %v4630_v61, %v9434_v40 }
 0x7c0   :  { %v4632_v56 = vpop.f32.mrf.mxu1 }
 0x7c1   :  { %v4703_v55 = vmax.f32 %v4631_v27, 0.0 }
 0x7c2   :  { %v4633_v35 = vpop.f32.mrf.mxu1 }
 0x7c3   :  { %v4634_v16 = vadd.f32 %v4633_v35, %v9435_v13 }
 0x7c4   :  { %v4635_v62 = vpop.f32.mrf.mxu1 }
 0x7c5   :  { %v4704_v20 = vmax.f32 %v4634_v16, 0.0 }
 0x7c6   :  { %v4638_v5 = vpop.f32.mrf.mxu1 }
 0x7c7   :  { %v9112_v33 = vpack.c.bf16 %v4704_v20, %v4703_v55 }
 0x7c8   :  { %v4640_v3 = vpop.f32.mrf.mxu1 }
 0x7ca   :  { %v4641_v60 = vpop.f32.mrf.mxu1 }
 0x7cc   :  { %v4643_v48 = vpop.f32.mrf.mxu1 }
 0x7ce   :  { %v4646_v29 = vpop.f32.mrf.mxu1 }
 0x7d0   :  { %v4648_v28 = vpop.f32.mrf.mxu1 }
 0x7d2   :  { %v4649_v7 = vpop.f32.mrf.mxu1 }
 0x7d4   :  { %v4651_v58 = vpop.f32.mrf.mxu1 }
 0x7d6   :  { %v4654_v24 = vpop.f32.mrf.mxu1 }
 0x7d8   :  { %v4656_v52 = vpop.f32.mrf.mxu1 }
 0x7da   :  { %v4657_v10 = vpop.f32.mrf.mxu1 }
 0x7db   :  { %v4658_v56 = vadd.f32 %v4657_v10, %v7741_v23  ;;  %v4642_v23 = vadd.f32 %v4641_v60, %v9439_v36  ;;  %v6434_v36 = vld [vmem:[%s9175_s2 + $0x194] ss:$8 sps:$4 sm:$0xff]  }
 0x7dc   :  { %v4659_v40 = vpop.f32.mrf.mxu1 }
 0x7dd   :  { %v4706_v3 = vmax.f32 %v4642_v23, 0.0 }
 0x7de   :  { %v4662_v42 = vpop.f32.mrf.mxu1 }
 0x7df   :  { %v4663_v0 = vadd.f32 %v4662_v42, %v7705_v19  ;;  %v4647_v19 = vadd.f32 %v4646_v29, %v9438_v57  ;;  %v6429_v57 = vld [vmem:[%s9175_s2 + $0x180] ss:$8 sps:$4 sm:$0xff]   ;;  %v4882_v42 = vpop.permute.xlu0 %4881 }
 0x7e0   :  { %v4664_v49 = vpop.f32.mrf.mxu1 }
 0x7e1   :  { %v4711_v35 = vmax.f32 %v4663_v0, 0.0  ;;  %v4887_v49 = vpop.permute.xlu1 %4886 }
 0x7e2   :  { %v4665_v13 = vpop.f32.mrf.mxu1 }
 0x7e3   :  { %v4666_v44 = vadd.f32 %v4665_v13, %v7720_v14  ;;  %v4710_v14 = vmax.f32 %v4658_v56, 0.0 }
 0x7e4   :  { %v4667_v51 = vpop.f32.mrf.mxu1 }
 0x7e5   :  { %v4892_v51 = vpop.permute.xlu0 %4891 }
 0x7e6   :  { %v4670_v17 = vpop.f32.mrf.mxu1 }
 0x7e7   :  { %v4671_v37 = vadd.f32 %v4670_v17, %v7684_v18  ;;  %v4655_v18 = vadd.f32 %v4654_v24, %v7739_v6  ;;  %v4639_v6 = vadd.f32 %v4638_v5, %v9440_v45  ;;  %v6432_v45 = vld [vmem:[%s9175_s2 + $0x190] ss:$8 sps:$4 sm:$0xff]  }
 0x7e8   :  { %v4672_v22 = vpop.f32.mrf.mxu1 }
 0x7e9   :  { %v4713_v9 = vmax.f32 %v4671_v37, 0.0  ;;  %v4709_v62 = vmax.f32 %v4655_v18, 0.0  ;;  %v4705_v48 = vmax.f32 %v4639_v6, 0.0  ;;  %v9445_v6 = vld [vmem:[#allocation13_spill] sm:$0xff] }
 0x7ea   :  { %v4673_v2 = vpop.f32.mrf.mxu1 }
 0x7eb   :  { %v4674_v26 = vadd.f32 %v4673_v2, %v9436_v32  ;;  %v4712_v32 = vmax.f32 %v4666_v44, 0.0  ;;  %v4729_v20 = vpack.c.bf16 %v4710_v14, %v4709_v62  ;;  %v4897_v2 = vpop.permute.xlu1 %4896 }
 0x7ec   :  { %v4675_v53 = vpop.f32.mrf.mxu1 }
 0x7ed   :  { %v4714_v11 = vmax.f32 %v4674_v26, 0.0  ;;  %v4730_v16 = vpack.c.bf16 %v4712_v32, %v4711_v35  ;;  %v9444_v35 = vld [vmem:[#allocation24_spill] sm:$0xff] }
 0x7ee   :  { %v4678_v34 = vpop.f32.mrf.mxu1 }
 0x7ef   :  { %v4679_v25 = vadd.f32 %v4678_v34, %v9441_v46  ;;  %v4731_v27 = vpack.c.bf16 %v4714_v11, %v4713_v9  ;;  %v9443_v11 = vld [vmem:[#allocation12_spill] sm:$0xff] }
 0x7f0   :  { %v4680_v43 = vpop.f32.mrf.mxu1 }
 0x7f1   :  { %v4715_v59 = vmax.f32 %v4679_v25, 0.0  ;;  %v9442_v43 = vld [vmem:[#allocation22_spill] sm:$0xff] }
 0x7f2   :  { %v4681_v21 = vpop.f32.mrf.mxu1 }
 0x7f3   :  { %v4682_v38 = vadd.f32 %v4681_v21, %v7665_v12  ;;  %v4650_v12 = vadd.f32 %v4649_v7, %v9437_v15  ;;  %v4938_v21 = vpop.permute.xlu0 %4937 }
 0x7f4   :  { %v4683_v31 = vpop.f32.mrf.mxu1 }
 0x7f5   :  { %v4716_v30 = vmax.f32 %v4682_v38, 0.0  ;;  %v4708_v55 = vmax.f32 %v4650_v12, 0.0  ;;  %v4943_v31 = vpop.permute.xlu1 %4942 }
 0x7f7   :  { %v4732_v61 = vpack.c.bf16 %v4716_v30, %v4715_v59  ;;  %v4902_v32 = vpop.permute.xlu0 %4901 }
 0x7f9   :  { %6175 = vmatprep.subr.bf16.mxu0 %v4732_v61  ;;  %v4948_v62 = vpop.permute.xlu1 %4947 }
 0x7fa   :  { %6176 = vmatpush3.bf16.msra.mxu0 %v4724_v39  ;;  %v4707_v39 = vmax.f32 %v4647_v19, 0.0 }
 0x7fb   :  { %6177 = vmatprep.subr.bf16.mxu0 %v4731_v27 }
 0x7fc   :  { %v4728_v15 = vpack.c.bf16 %v4708_v55, %v4707_v39 }
 0x7fe   :  { %6178 = vmatpush3.bf16.msra.mxu0 %v9102_v4  ;;  %v4727_v4 = vpack.c.bf16 %v4706_v3, %v4705_v48 }
 0x7ff   :  { %6179 = vmatprep.subr.bf16.mxu0 %v4730_v16 }
 0x802   :  { %6180 = vmatpush3.bf16.msra.mxu0 %v9092_v8 }
 0x803   :  { %6181 = vmatprep.subr.bf16.mxu0 %v4729_v20 }
 0x806   :  { %6182 = vmatpush3.bf16.msra.mxu0 %v9082_v47 }
 0x807   :  { %6183 = vmatprep.subr.bf16.mxu0 %v4728_v15 }
 0x80a   :  { %6184 = vmatpush3.bf16.msra.mxu0 %v9072_v1  ;;  %v6438_v1 = vld [vmem:[%s9175_s2 + $0x1b0] ss:$8 sps:$4 sm:$0xff]  }
 0x80b   :  { %6185 = vmatprep.subr.bf16.mxu0 %v4727_v4 }
 0x80e   :  { %6186 = vmatpush3.bf16.msra.mxu0 %v9058_v50  ;;  %v6440_v50 = vld [vmem:[%s9175_s2 + $0x1b4] ss:$8 sps:$4 sm:$0xff]  }
 0x80f   :  { %6187 = vmatprep.subr.bf16.mxu0 %v9112_v33 }
 0x812   :  { %6188 = vmatpush3.bf16.msra.mxu0 %v9052_v41  ;;  %v6437_v41 = vld [vmem:[%s9175_s2 + $0x1a4] ss:$8 sps:$4 sm:$0xff]  }
 0x813   :  { %6189 = vmatprep.subr.bf16.mxu0 %v9108_v63 }
 0x816   :  { %6190 = vmatpush3.bf16.msra.mxu0 %v9043_v54  ;;  %v6435_v54 = vld [vmem:[%s9175_s2 + $0x1a0] ss:$8 sps:$4 sm:$0xff]   ;;  %s6550_s2 = smov [#allocation4]  }
 0x817   :  { %s5015_s21 = sshll.u32 %s6550_s2, 4  ;;  %s5016_s21 = int_to_ptr.vmem [resolvable:$true] %s5015_s21 }
 0x818   :  { %s6527_s22 = scalar_lea.vmem %s5016_s21, 16  ;;  %s6531_s23 = scalar_lea.vmem %s5016_s21, 32 }
 0x819   :  { %4823 = vmatmul.mubr.bf16.vlgmr.msra.gmra.mxu0 %v6429_v57  ;;  %p6528_p0 = scmp.ne.s32.totalorder %s5016_s21, %s6527_s22  ;;  %p6532_p1 = scmp.lt.s32.totalorder %s5016_s21, %s5016_s21 }
 0x81a   :  { %4830 = vmatprep.mubr.bf16.mxu0 %v6434_v36  ;;  %p6533_p2 = scmp.lt.s32.totalorder %s6531_s23, %s6527_s22 }
 0x81c   :  { %p6534_p3 = por %p6533_p2, %p6532_p1 }
 0x81e   :  { %p6535_p4 = pnand %p6534_p3, %p6528_p0 }
 0x821   :  { %4831 = vmatmul.mubr.bf16.gmra.mxu0 %v6432_v45  ;;  %v4907_v45 = vpop.permute.xlu0 %4906 }
 0x822   :  { %4838 = vmatprep.mubr.bf16.mxu0 %v6437_v41 }
 0x829   :  { %4839 = vmatmul.mubr.bf16.gmra.mxu0 %v6435_v54 }
 0x82a   :  { %4846 = vmatprep.mubr.bf16.mxu0 %v6440_v50 }
 0x831   :  { %4847 = vmatmul.mubr.bf16.gmra.mxu0 %v6438_v1 }
 0x859   :  { %v6151_v47 = vpop.f32.mrf.mxu0 }
 0x85b   :  { %v6152_v8 = vpop.f32.mrf.mxu0 }
 0x85c   :  { %v6153_v22 = vadd.f32 %v6152_v8, %v6151_v47  ;;  %v4953_v47 = vpop.permute.xlu1 %4952  ;;  %v9446_v8 = vld [vmem:[#allocation27_spill] sm:$0xff] }
 0x85d   :  { %v6154_v63 = vpop.f32.mrf.mxu0 }
 0x85e   :  { %v4428_v26 = vadd.f32 %v6153_v22, %v9442_v43  ;;  %v4912_v22 = vpop.permute.xlu0 %4911 }
 0x85f   :  { %v6155_v5 = vpop.f32.mrf.mxu0 }
 0x860   :  { %v6156_v46 = vadd.f32 %v6155_v5, %v6154_v63 }
 0x861   :  { %v6157_v33 = vpop.f32.mrf.mxu0 }
 0x862   :  { %v4429_v59 = vadd.f32 %v6156_v46, %v9443_v11 }
 0x863   :  { %v6158_v60 = vpop.f32.mrf.mxu0 }
 0x864   :  { %v6159_v30 = vadd.f32 %v6158_v60, %v6157_v33 }
 0x865   :  { %v6160_v29 = vpop.f32.mrf.mxu0 }
 0x866   :  { %v4430_v12 = vadd.f32 %v6159_v30, %v9444_v35 }
 0x867   :  { %v6161_v28 = vpop.f32.mrf.mxu0 }
 0x868   :  { %v6162_v27 = vadd.f32 %v6161_v28, %v6160_v29 }
 0x869   :  { %v6163_v7 = vpop.f32.mrf.mxu0 }
 0x86a   :  { %v4431_v39 = vadd.f32 %v6162_v27, %v9445_v6 }
 0x86b   :  { %v6164_v58 = vpop.f32.mrf.mxu0 }
 0x86c   :  { %v6165_v3 = vadd.f32 %v6164_v58, %v6163_v7 }
 0x86d   :  { %v6166_v24 = vpop.f32.mrf.mxu0 }
 0x86e   :  { %v4432_v63 = vadd.f32 %v6165_v3, %v9446_v8 }
 0x86f   :  { %v6167_v52 = vpop.f32.mrf.mxu0 }
 0x870   :  { %v6168_v33 = vadd.f32 %v6167_v52, %v6166_v24  ;;  %v9448_v52 = vld [vmem:[#allocation28_spill] sm:$0xff] }
 0x871   :  { %v6169_v10 = vpop.f32.mrf.mxu0 }
 0x873   :  { %v6170_v40 = vpop.f32.mrf.mxu0 }
 0x875   :  { %v9156_v13 = vpop.f32.mrf.mxu0 }
 0x877   :  { %v9158_v17 = vpop.f32.mrf.mxu0 }
 0x878   :  { %v6174_v11 = vadd.f32 %v9158_v17, %v9156_v13 }
 0x8d9   :  { %v6191_v53 = vpop.f32.mrf.mxu0 }
 0x8db   :  { %v6192_v34 = vpop.f32.mrf.mxu0 }
 0x8dc   :  { %v6193_v25 = vadd.f32 %v6192_v34, %v6191_v53  ;;  %v9447_v34 = vld [vmem:[#allocation39_spill] sm:$0xff] }
 0x8dd   :  { %v6194_v37 = vpop.f32.mrf.mxu0  ;;  %v4433_v43 = vadd.f32 %v6168_v33, %v9447_v34 }
 0x8de   :  { %v4855_v38 = vadd.f32 %v6193_v25, %v4428_v26 }
 0x8df   :  { %v6195_v44 = vpop.f32.mrf.mxu0 }
 0x8e0   :  { %v4919_v0 = vadd.f32 %v4882_v42, %v4855_v38  ;;  %v6196_v9 = vadd.f32 %v6195_v44, %v6194_v37 }
 0x8e1   :  { %v6197_v61 = vpop.f32.mrf.mxu0 }
 0x8e2   :  { %v4856_v56 = vadd.f32 %v6196_v9, %v4429_v59  ;;  %v4927_v14 = vmax.f32 %v4919_v0, 0.0 }
 0x8e3   :  { %v6198_v18 = vpop.f32.mrf.mxu0 }
 0x8e4   :  { %v4920_v16 = vadd.f32 %v4887_v49, %v4856_v56  ;;  %v6199_v19 = vadd.f32 %v6198_v18, %v6197_v61  ;;  %v4975_v48 = vmul.f32 %v4938_v21, %v4927_v14  ;;  %v4958_v21 = vpop.permute.xlu1 %4957  ;;  %v9449_v18 = vld [vmem:[#allocation29_spill] sm:$0xff] }
 0x8e5   :  { %v6200_v23 = vpop.f32.mrf.mxu0  ;;  %v4435_v35 = vadd.f32 %v6174_v11, %v9449_v18 }
 0x8e6   :  { %v4928_v55 = vmax.f32 %v4920_v16, 0.0  ;;  %v4857_v20 = vadd.f32 %v6199_v19, %v4430_v12 }
 0x8e7   :  { %v6201_v15 = vpop.f32.mrf.mxu0 }
 0x8e8   :  { %v4976_v4 = vmul.f32 %v4943_v31, %v4928_v55  ;;  %v4921_v57 = vadd.f32 %v4892_v51, %v4857_v20  ;;  %v6202_v36 = vadd.f32 %v6201_v15, %v6200_v23  ;;  %v6171_v51 = vadd.f32 %v6170_v40, %v6169_v10  ;;  %v4917_v40 = vpop.permute.xlu0 %4916 }
 0x8e9   :  { %v6203_v41 = vpop.f32.mrf.mxu0 }
 0x8ea   :  { %v4983_v54 = vadd.f32 %v4976_v4, %v4975_v48  ;;  %v4929_v50 = vmax.f32 %v4921_v57, 0.0  ;;  %v4858_v1 = vadd.f32 %v6202_v36, %v4431_v39 }
 0x8eb   :  { %v6204_v5 = vpop.f32.mrf.mxu0 }
 0x8ec   :  { %v4977_v60 = vmul.f32 %v4948_v62, %v4929_v50  ;;  %v4922_v29 = vadd.f32 %v4897_v2, %v4858_v1  ;;  %v6205_v28 = vadd.f32 %v6204_v5, %v6203_v41  ;;  %v4434_v2 = vadd.f32 %v6171_v51, %v9448_v52  ;;  %v4968_v55 = vpop.permute.xlu0 %4967 }
 0x8ed   :  { %v6206_v42 = vpop.f32.mrf.mxu0 }
 0x8ee   :  { %v4984_v7 = vadd.f32 %v4983_v54, %v4977_v60  ;;  %v4930_v58 = vmax.f32 %v4922_v29, 0.0  ;;  %v4859_v49 = vadd.f32 %v6205_v28, %v4432_v63 }
 0x8ef   :  { %v6207_v53 = vpop.f32.mrf.mxu0 }
 0x8f0   :  { %v4978_v26 = vmul.f32 %v4953_v47, %v4930_v58  ;;  %v4923_v46 = vadd.f32 %v4902_v32, %v4859_v49  ;;  %v6208_v25 = vadd.f32 %v6207_v53, %v6206_v42  ;;  %v4963_v32 = vpop.permute.xlu1 %4962  ;;  %v4999_v54 = vpop.permute.xlu0 %4998 }
 0x8f1   :  { %v6209_v37 = vpop.f32.mrf.mxu0 }
 0x8f2   :  { %v4985_v38 = vadd.f32 %v4984_v7, %v4978_v26  ;;  %v4931_v31 = vmax.f32 %v4923_v46, 0.0  ;;  %v4860_v24 = vadd.f32 %v6208_v25, %v4433_v43 }
 0x8f3   :  { %v6210_v44 = vpop.f32.mrf.mxu0 }
 0x8f4   :  { %v4979_v59 = vmul.f32 %v4958_v21, %v4931_v31  ;;  %v4924_v30 = vadd.f32 %v4907_v45, %v4860_v24  ;;  %v6211_v10 = vadd.f32 %v6210_v44, %v6209_v37  ;;  %v4973_v39 = vpop.permute.xlu1 %4972 }
 0x8f5   :  { %v6212_v0 = vpop.f32.mrf.mxu0 }
 0x8f6   :  { %v4986_v9 = vadd.f32 %v4985_v38, %v4979_v59  ;;  %v4932_v61 = vmax.f32 %v4924_v30, 0.0  ;;  %v4861_v56 = vadd.f32 %v6211_v10, %v4434_v2 }
 0x8f7   :  { %v6213_v27 = vpop.f32.mrf.mxu0 }
 0x8f8   :  { %v4980_v12 = vmul.f32 %v4963_v32, %v4932_v61  ;;  %v4925_v14 = vadd.f32 %v4912_v22, %v4861_v56  ;;  %v6214_v16 = vadd.f32 %v6213_v27, %v6212_v0 }
 0x8fa   :  { %v4987_v19 = vadd.f32 %v4986_v9, %v4980_v12  ;;  %v4933_v62 = vmax.f32 %v4925_v14, 0.0  ;;  %v4862_v23 = vadd.f32 %v6214_v16, %v4435_v35 }
 0x8fc   :  { %v4981_v13 = vmul.f32 %v4968_v55, %v4933_v62  ;;  %v4926_v17 = vadd.f32 %v4917_v40, %v4862_v23 }
 0x8fe   :  { %v4988_v20 = vadd.f32 %v4987_v19, %v4981_v13  ;;  %v4934_v6 = vmax.f32 %v4926_v17, 0.0 }
 0x900   :  { %v4982_v3 = vmul.f32 %v4973_v39, %v4934_v6 }
 0x902   :  { %v4989_v15 = vadd.f32 %v4988_v20, %v4982_v3 }
 0x904   :  { %v4990_v48 = vrot.slane %v4989_v15, 4 }
 0x906   :  { %v4991_v4 = vadd.f32 %v4990_v48, %v4989_v15 }
 0x908   :  { %v4992_v57 = vrot.slane %v4991_v4, 2 }
 0x90a   :  { %v4993_v36 = vadd.f32 %v4992_v57, %v4991_v4 }
 0x90c   :  { %v4994_v45 = vrot.slane %v4993_v36, 1 }
 0x90e   :  { %v4995_v41 = vadd.f32 %v4994_v45, %v4993_v36 }
 0x910   :  { %v5001_v50 = vadd.f32 %v4999_v54, %v4995_v41 }
 0x912   :  { %v5503_v1 = vmul.f32 -1.442695, %v5001_v50 }
 0x914   :  { %6441 = vpow2.f32 %v5503_v1 }
 0x921   :  { %v6442_v47 = vpop.eup %6441 }
 0x922   :  { %v5005_v8 = vadd.f32 1.0, %v6442_v47 }
 0x924   :  { %6443 = vrcp.f32 %v5005_v8 }
 0x931   :  { %v6444_v63 = vpop.eup %6443 }
 0x932   :  { %5008 = vst [vmem:[#allocation4] sm:$0x1] %v6444_v63 }
 0x933   :  { %6538 = shalt.err (!%p6535_p4)
}
 0x934   :  { %5018 = dma.vmem_to_hbm [thread:$0]  %s5016_s21, 16, %s9177_s4, [#allocation5]  }
 0x935   :  { %6547 = dma.done.wait [#allocation5], 16  }
 0x936   :  { %6548 = vsyncadd [#allocation5], 4294967280 }
 0x937   :  { %5022 = vsyncpa [#allocation5], 1 }

</bundles_post_ra>
